<compile_context>
chip_gen: v7x
topology: tpu7x:2x2x1
jax: 0.10.0
libtpu: 0.0.40
codegen_flags: <defaults>
</compile_context>

<pallas_src>
import functools
import math

import jax
import jax.numpy as jnp
from jax import lax
from jax.experimental import pallas as pl
from jax.experimental.pallas import tpu as pltpu


# ----------------------------------------------------------------------------
# Host-side constants: Gaussian window + banded Toeplitz filter matrices
# ----------------------------------------------------------------------------
def _gaussian_window(size, sigma):
    center = size // 2
    g = [math.exp(-((i - center) ** 2) / (2.0 * sigma * sigma)) for i in range(size)]
    s = sum(g)
    return [v / s for v in g]


def _toeplitz_filters(win, h, w, oh, ow, oh_pad, ow_pad):
    """gh: (oh_pad, h) row filter (left matmul); gw: (w, ow_pad) col filter.

    Rows >= oh of gh and cols >= ow of gw are zero, so the padded region of a
    filtered map is exactly 0 (and the padded SSIM map is exactly 1, masked
    out before the final reduction).
    """
    gh = [[0.0] * h for _ in range(oh_pad)]
    for o in range(oh):
        for k, v in enumerate(win):
            gh[o][o + k] = v
    gw = [[0.0] * ow_pad for _ in range(w)]
    for o in range(ow):
        for k, v in enumerate(win):
            gw[o + k][o] = v
    return jnp.array(gh, dtype=jnp.float32), jnp.array(gw, dtype=jnp.float32)


# ----------------------------------------------------------------------------
# Fused kernel: online-softmax MIP cascades + L1 / MSE / energy / SSIM sums
# ----------------------------------------------------------------------------
def _mip_loss_kernel(img_ref, tgt_ref, gum_ref, gh_ref, gw_ref, out_ref,
                     *, temp, num_slice, h, w, oh, ow, oh_pad, ow_pad,
                     c1, c2, unroll):
    inv_temp = jnp.float32(1.0 / temp)
    gh = gh_ref[...]                                   # (oh_pad, h)
    gw = gw_ref[...]                                   # (w, ow_pad)

    # valid-region mask of the padded SSIM maps (hoisted; padded region == 1.0)
    rows = lax.broadcasted_iota(jnp.int32, (oh_pad, ow_pad), 0)
    cols = lax.broadcasted_iota(jnp.int32, (oh_pad, ow_pad), 1)
    vmask = jnp.where(jnp.logical_and(rows < oh, cols < ow),
                      jnp.float32(1.0), jnp.float32(0.0))

    def gauss2d_batch(maps):
        """Separable 11-tap Gaussian over k maps with TWO matmuls total.

        1. sublane-stack sources       : (k*h, w) @ gw  -> (k*h, ow_pad)
        2. tile-aligned lane restack   : (h, k*ow_pad); gh @ . -> (oh_pad, k*ow_pad)
        Default MXU precision (no Precision.HIGHEST).
        """
        k = len(maps)
        stacked = jnp.concatenate(maps, axis=0)                         # (k*h, w)
        t1 = jnp.dot(stacked, gw, preferred_element_type=jnp.float32)   # (k*h, ow_pad)
        restacked = jnp.concatenate(
            [t1[i * h:(i + 1) * h, :] for i in range(k)], axis=1)       # (h, k*ow_pad)
        t2 = jnp.dot(gh, restacked, preferred_element_type=jnp.float32) # (oh_pad, k*ow_pad)
        return [t2[:, i * ow_pad:(i + 1) * ow_pad] for i in range(k)]

    def ssim_sums(pairs):
        """Masked SSIM-map sums for a list of (x, y) pairs -> list of (1,1)."""
        maps = []
        for px, py in pairs:
            maps.extend([px, py, px * px, py * py, px * py])
        filt = gauss2d_batch(maps)
        sums = []
        for i in range(len(pairs)):
            mu_x, mu_y, mu_xx, mu_yy, mu_xy = filt[5 * i:5 * i + 5]
            sig_x = mu_xx - mu_x * mu_x
            sig_y = mu_yy - mu_y * mu_y
            sig_xy = mu_xy - mu_x * mu_y
            num = (2.0 * mu_x * mu_y + c1) * (2.0 * sig_xy + c2)
            den = (mu_x * mu_x + mu_y * mu_y + c1) * (sig_x + sig_y + c2)
            sums.append(jnp.sum((num / den) * vmask, keepdims=True))    # (1,1)
        return sums

    def online_update(m, s, a, xj, yj):
        m_new = jnp.maximum(m, yj)
        alpha = jnp.exp(m - m_new)
        beta = jnp.exp(yj - m_new)
        return m_new, alpha * s + beta, alpha * a + beta * xj

    zero_hw = jnp.zeros((h, w), jnp.float32)
    neg_hw = jnp.full((h, w), -1e30, jnp.float32)   # finite sentinel; exp underflows to 0
    zero_s = jnp.zeros((1, 1), jnp.float32)

    # ---- prefix cascade (c1) + full-image stats: one O(C) sweep ----
    def prefix_body(j, carry):
        m, s, a, tm, l1c1, ssc1, l1f, sq, tsq, ssf = carry
        xj = img_ref[j]
        tj = tgt_ref[j]
        gj = gum_ref[j]
        yj = (xj + gj) * inv_temp
        m, s, a = online_update(m, s, a, xj, yj)
        tm = jnp.maximum(tm, tj)
        pred = a / s                                   # soft MIP at depth j (exact)
        d = xj - tj
        l1c1 = l1c1 + jnp.sum(jnp.abs(pred - tm), keepdims=True)
        l1f = l1f + jnp.sum(jnp.abs(d), keepdims=True)
        sq = sq + jnp.sum(d * d, keepdims=True)
        tsq = tsq + jnp.sum(tj * tj, keepdims=True)
        s_c1, s_full = ssim_sums([(pred, tm), (xj, tj)])   # 10 maps, 2 matmuls
        ssc1 = ssc1 + s_c1
        ssf = ssf + s_full
        return m, s, a, tm, l1c1, ssc1, l1f, sq, tsq, ssf

    carry = (neg_hw, zero_hw, zero_hw, neg_hw,
             zero_s, zero_s, zero_s, zero_s, zero_s, zero_s)
    carry = lax.fori_loop(0, num_slice, prefix_body, carry, unroll=unroll)
    _, _, _, _, l1c1, ssc1, l1f, sq, tsq, ssf = carry

    # ---- suffix cascade (c2): same recurrence over reversed slice order ----
    def suffix_body(j, carry):
        m, s, a, tm, l1c2, ssc2 = carry
        sl = num_slice - 1 - j
        xj = img_ref[sl]
        tj = tgt_ref[sl]
        gj = gum_ref[sl]
        yj = (xj + gj) * inv_temp
        m, s, a = online_update(m, s, a, xj, yj)
        tm = jnp.maximum(tm, tj)
        pred = a / s
        l1c2 = l1c2 + jnp.sum(jnp.abs(pred - tm), keepdims=True)
        (s_c2,) = ssim_sums([(pred, tm)])              # 5 maps, 2 matmuls
        ssc2 = ssc2 + s_c2
        return m, s, a, tm, l1c2, ssc2

    carry2 = (neg_hw, zero_hw, zero_hw, neg_hw, zero_s, zero_s)
    carry2 = lax.fori_loop(0, num_slice, suffix_body, carry2, unroll=unroll)
    _, _, _, _, l1c2, ssc2 = carry2

    # ---- single packed (1, 8) store per batch (one output DMA per step) ----
    lane = lax.broadcasted_iota(jnp.int32, (1, 8), 1)
    vals = [l1f, sq, tsq, ssf, l1c1, ssc1, l1c2, ssc2]
    packed = jnp.zeros((1, 8), jnp.float32)
    for idx, v in enumerate(vals):
        packed = packed + v * jnp.where(lane == idx, jnp.float32(1.0), jnp.float32(0.0))
    out_ref[...] = packed


def _mip_loss_sums(img_fake, target, gumbel, *, temp, win_size, win_sigma, data_range):
    B, C, H, W = img_fake.shape
    OH, OW = H - win_size + 1, W - win_size + 1
    if OH < 1 or OW < 1:
        raise ValueError("spatial dims must be >= win_size for SSIM")
    OH_PAD = max(8, ((OH + 7) // 8) * 8)
    OW_PAD = max(128, ((OW + 127) // 128) * 128)

    win = _gaussian_window(win_size, win_sigma)
    gh, gw = _toeplitz_filters(win, H, W, OH, OW, OH_PAD, OW_PAD)
    c1 = (0.01 * data_range) ** 2
    c2 = (0.03 * data_range) ** 2

    img_fake = img_fake.astype(jnp.float32)
    target = target.astype(jnp.float32)
    gumbel = gumbel.astype(jnp.float32)

    kernel = functools.partial(
        _mip_loss_kernel, temp=float(temp), num_slice=C, h=H, w=W,
        oh=OH, ow=OW, oh_pad=OH_PAD, ow_pad=OW_PAD,
        c1=float(c1), c2=float(c2), unroll=bool(C <= 8))

    full_block = pl.BlockSpec((None, C, H, W), lambda b: (b, 0, 0, 0))

    # Explicit scoped-VMEM sizing from the real block footprint (+50% headroom),
    # clamped to [32 MiB, 64 MiB] so it is safe on v5e/v6e/v7x.
    block_bytes = C * H * W * 4
    est = (3 * 2 * block_bytes                                   # 3 inputs, double-buffered
           + 2 * (OH_PAD * H + W * OW_PAD) * 4                   # filter matrices
           + 4 * H * W * 4                                       # m/s/a/tm full-map carries
           + 3 * 10 * max(H * W, H * OW_PAD, OH_PAD * OW_PAD) * 4)  # batched SSIM temps
    vmem_limit = int(min(64 * (1 << 20), max(32 * (1 << 20), int(est * 1.5))))
    # TODO(synk): at production shapes (e.g. 32x256x256) add an H-tile grid axis
    # with a (win_size-1)-row halo instead of relying on the raised limit (v7x
    # only has 64 MiB physical VMEM).

    grid_spec = pltpu.PrefetchScalarGridSpec(
        num_scalar_prefetch=0,
        grid=(B,),
        in_specs=[full_block, full_block, full_block,
                  pl.BlockSpec((OH_PAD, H), lambda b: (0, 0)),
                  pl.BlockSpec((W, OW_PAD), lambda b: (0, 0))],
        out_specs=pl.BlockSpec((None, 1, 8), lambda b: (b, 0, 0)),
    )

    return pl.pallas_call(
        kernel,
        grid_spec=grid_spec,
        out_shape=jax.ShapeDtypeStruct((B, 1, 8), jnp.float32),
        compiler_params=pltpu.CompilerParams(
            dimension_semantics=("parallel",),
            vmem_limit_bytes=vmem_limit),
    )(img_fake, target, gumbel, gh, gw)


# ----------------------------------------------------------------------------
# Full MIPloss forward
# ----------------------------------------------------------------------------
def make_mip_loss(*, temp=0.5, lamda=1.0, win_size=11, win_sigma=1.5, data_range=1.0):
    @jax.jit
    def mip_loss(img_fake, target, rng_key):
        B, C, H, W = img_fake.shape

        # reset_gumbel(): U ~ Uniform[0,1), g = -log(-log(U + 1e-20) + 1e-20).
        # Generated with jax.random (torch RNG stream is not reproducible here);
        # kept outside the kernel because pltpu.prng_* cannot lower on the
        # interpret path.
        u = jax.random.uniform(rng_key, img_fake.shape, dtype=jnp.float32)
        gumbel = -jnp.log(-jnp.log(u + 1e-20) + 1e-20)

        parts = _mip_loss_sums(img_fake, target, gumbel, temp=temp,
                               win_size=win_size, win_sigma=win_sigma,
                               data_range=data_range)            # (B, 1, 8)
        totals = jnp.sum(parts, axis=(0, 1))                      # (8,)
        l1f_s, sq_s, tsq_s, ssf_s, l1c1_s, ssc1_s, l1c2_s, ssc2_s = totals

        n_img = float(B * C * H * W)
        n_map = float(B * C * (H - win_size + 1) * (W - win_size + 1))

        mse = sq_s / n_img
        l1_full = l1f_s / n_img
        ssim_full = ssf_s / n_map
        l1_c1 = l1c1_s / n_img
        ssim_c1 = ssc1_s / n_map
        l1_c2 = l1c2_s / n_img
        ssim_c2 = ssc2_s / n_map

        psnr = 10.0 * jnp.log(1.0 / mse) / jnp.float32(math.log(10.0))
        snr = 20.0 * jnp.log10(jnp.sqrt(tsq_s) / jnp.sqrt(sq_s))

        loss_lissim = (l1_full + 1.0 - ssim_full) * lamda
        loss_mip_c1 = (l1_c1 + 1.0 - ssim_c1) * lamda
        loss_mip_c2 = (l1_c2 + 1.0 - ssim_c2) * lamda
        loss = loss_lissim + loss_mip_c1 + loss_mip_c2

        # TODO(synk): PyTorch returns .item() / numpy host floats for MIP_LOSS,
        # PSNR, SSIM and SNR (cal_snr); here they stay as device scalars.
        return {"loss": loss, "MIP_LOSS": loss, "PSNR": psnr,
                "SSIM": ssim_full, "SNR": snr}

    return mip_loss


if __name__ == "__main__":
    key = jax.random.PRNGKey(0)
    k_img, k_tgt, k_gum = jax.random.split(key, 3)

    B, C, H, W = 2, 4, 16, 16          # C == options.use_slice == num_slice
    img_fake = jax.random.uniform(k_img, (B, C, H, W), dtype=jnp.float32)
    target = jax.random.uniform(k_tgt, (B, C, H, W), dtype=jnp.float32)

    loss_fn = make_mip_loss(temp=0.5, lamda=1.0)   # options.loss.temp / lamda
    out = loss_fn(img_fake, target, k_gum)
    jax.block_until_ready(out)
    assert bool(jnp.isfinite(out["loss"])), "loss is not finite"
    print("KERNEL_OK")
</pallas_src>

<mosaic_0001>
module attributes {stable_mosaic.version = 11 : i64} {
  func.func @_mip_loss_kernel(%arg0: i32, %arg1: memref<1x4x16x16xf32, #tpu.memory_space<vmem>>, %arg2: memref<1x4x16x16xf32, #tpu.memory_space<vmem>>, %arg3: memref<1x4x16x16xf32, #tpu.memory_space<vmem>>, %arg4: memref<8x16xf32, #tpu.memory_space<vmem>>, %arg5: memref<16x128xf32, #tpu.memory_space<vmem>>, %arg6: memref<1x1x8xf32, #tpu.memory_space<vmem>>) attributes {dimension_semantics = [#tpu.dimension_semantics<parallel>], iteration_bounds = array<i64: 2>, scalar_prefetch = 0 : i64, scratch_operands = 0 : i64, tpu.core_type = #tpu.core_type<tc>, window_params = [{transform_indices = @transform_0, window_bounds = array<i64: 1, 4, 16, 16>}, {transform_indices = @transform_1, window_bounds = array<i64: 1, 4, 16, 16>}, {transform_indices = @transform_2, window_bounds = array<i64: 1, 4, 16, 16>}, {pipeline_mode = #tpu.pipeline_mode<synchronous>, transform_indices = @transform_3, window_bounds = array<i64: 8, 16>}, {pipeline_mode = #tpu.pipeline_mode<synchronous>, transform_indices = @transform_4, window_bounds = array<i64: 16, 128>}, {transform_indices = @transform_5, window_bounds = array<i64: 1, 1, 8>}]} {
    %c0 = arith.constant 0 : index
    %c0_0 = arith.constant 0 : index
    %0 = vector.load %arg4[%c0, %c0_0] : memref<8x16xf32, #tpu.memory_space<vmem>>, vector<8x16xf32>
    %c0_1 = arith.constant 0 : index
    %c0_2 = arith.constant 0 : index
    %1 = vector.load %arg5[%c0_1, %c0_2] : memref<16x128xf32, #tpu.memory_space<vmem>>, vector<16x128xf32>
    %2 = tpu.iota {dimensions = array<i32: 0>} : vector<8x128xi32>
    %3 = tpu.iota {dimensions = array<i32: 1>} : vector<8x128xi32>
    %c6_i32 = arith.constant 6 : i32
    %4 = vector.broadcast %c6_i32 : i32 to vector<8x128xi32>
    %5 = arith.cmpi slt, %2, %4 : vector<8x128xi32>
    %c6_i32_3 = arith.constant 6 : i32
    %6 = vector.broadcast %c6_i32_3 : i32 to vector<8x128xi32>
    %7 = arith.cmpi slt, %3, %6 : vector<8x128xi32>
    %8 = arith.andi %5, %7 : vector<8x128xi1>
    %cst = arith.constant 1.000000e+00 : f32
    %cst_4 = arith.constant 0.000000e+00 : f32
    %9 = vector.broadcast %cst : f32 to vector<8x128xf32>
    %10 = vector.broadcast %cst_4 : f32 to vector<8x128xf32>
    %11 = arith.select %8, %9, %10 : vector<8x128xi1>, vector<8x128xf32>
    %cst_5 = arith.constant 0.000000e+00 : f32
    %12 = vector.broadcast %cst_5 : f32 to vector<16x16xf32>
    %cst_6 = arith.constant -1.000000e+30 : f32
    %13 = vector.broadcast %cst_6 : f32 to vector<16x16xf32>
    %cst_7 = arith.constant 0.000000e+00 : f32
    %14 = vector.broadcast %cst_7 : f32 to vector<1x1xf32>
    %cst_8 = arith.constant 2.000000e+00 : f32
    %c0_i32 = arith.constant 0 : i32
    %c0_9 = arith.constant 0 : index
    %15 = arith.index_cast %c0_i32 : i32 to index
    %c0_10 = arith.constant 0 : index
    %c0_11 = arith.constant 0 : index
    %16 = vector.load %arg1[%c0_9, %15, %c0_10, %c0_11] : memref<1x4x16x16xf32, #tpu.memory_space<vmem>>, vector<1x1x16x16xf32>
    %17 = vector.shape_cast %16 : vector<1x1x16x16xf32> to vector<16x16xf32>
    %c0_12 = arith.constant 0 : index
    %18 = arith.index_cast %c0_i32 : i32 to index
    %c0_13 = arith.constant 0 : index
    %c0_14 = arith.constant 0 : index
    %19 = vector.load %arg2[%c0_12, %18, %c0_13, %c0_14] : memref<1x4x16x16xf32, #tpu.memory_space<vmem>>, vector<1x1x16x16xf32>
    %20 = vector.shape_cast %19 : vector<1x1x16x16xf32> to vector<16x16xf32>
    %c0_15 = arith.constant 0 : index
    %21 = arith.index_cast %c0_i32 : i32 to index
    %c0_16 = arith.constant 0 : index
    %c0_17 = arith.constant 0 : index
    %22 = vector.load %arg3[%c0_15, %21, %c0_16, %c0_17] : memref<1x4x16x16xf32, #tpu.memory_space<vmem>>, vector<1x1x16x16xf32>
    %23 = vector.shape_cast %22 : vector<1x1x16x16xf32> to vector<16x16xf32>
    %24 = arith.addf %17, %23 : vector<16x16xf32>
    %25 = vector.broadcast %cst_8 : f32 to vector<16x16xf32>
    %26 = arith.mulf %24, %25 : vector<16x16xf32>
    %27 = arith.maximumf %13, %26 : vector<16x16xf32>
    %28 = arith.subf %13, %27 : vector<16x16xf32>
    %29 = math.exp %28 : vector<16x16xf32>
    %30 = arith.subf %26, %27 : vector<16x16xf32>
    %31 = math.exp %30 : vector<16x16xf32>
    %32 = arith.mulf %29, %12 : vector<16x16xf32>
    %33 = arith.addf %32, %31 : vector<16x16xf32>
    %34 = arith.mulf %29, %12 : vector<16x16xf32>
    %35 = arith.mulf %31, %17 : vector<16x16xf32>
    %36 = arith.addf %34, %35 : vector<16x16xf32>
    %37 = arith.maximumf %13, %20 : vector<16x16xf32>
    %38 = arith.divf %36, %33 : vector<16x16xf32>
    %39 = arith.subf %17, %20 : vector<16x16xf32>
    %40 = arith.subf %38, %37 : vector<16x16xf32>
    %41 = math.absf %40 : vector<16x16xf32>
    %42 = vector.shape_cast %41 : vector<16x16xf32> to vector<1x16x16xf32>
    %cst_18 = arith.constant dense<0.000000e+00> : vector<1xf32>
    %43 = vector.multi_reduction <add>, %42, %cst_18 [1, 2] : vector<1x16x16xf32> to vector<1xf32>
    %44 = vector.shape_cast %43 : vector<1xf32> to vector<1x1x1xf32>
    %45 = vector.extract %44[0, 0, 0] : f32 from vector<1x1x1xf32>
    %46 = vector.broadcast %45 : f32 to vector<1x1xf32>
    %47 = arith.addf %14, %46 : vector<1x1xf32>
    %48 = math.absf %39 : vector<16x16xf32>
    %49 = vector.shape_cast %48 : vector<16x16xf32> to vector<1x16x16xf32>
    %cst_19 = arith.constant dense<0.000000e+00> : vector<1xf32>
    %50 = vector.multi_reduction <add>, %49, %cst_19 [1, 2] : vector<1x16x16xf32> to vector<1xf32>
    %51 = vector.shape_cast %50 : vector<1xf32> to vector<1x1x1xf32>
    %52 = vector.extract %51[0, 0, 0] : f32 from vector<1x1x1xf32>
    %53 = vector.broadcast %52 : f32 to vector<1x1xf32>
    %54 = arith.addf %14, %53 : vector<1x1xf32>
    %55 = arith.mulf %39, %39 : vector<16x16xf32>
    %56 = vector.shape_cast %55 : vector<16x16xf32> to vector<1x16x16xf32>
    %cst_20 = arith.constant dense<0.000000e+00> : vector<1xf32>
    %57 = vector.multi_reduction <add>, %56, %cst_20 [1, 2] : vector<1x16x16xf32> to vector<1xf32>
    %58 = vector.shape_cast %57 : vector<1xf32> to vector<1x1x1xf32>
    %59 = vector.extract %58[0, 0, 0] : f32 from vector<1x1x1xf32>
    %60 = vector.broadcast %59 : f32 to vector<1x1xf32>
    %61 = arith.addf %14, %60 : vector<1x1xf32>
    %62 = arith.mulf %20, %20 : vector<16x16xf32>
    %63 = vector.shape_cast %62 : vector<16x16xf32> to vector<1x16x16xf32>
    %cst_21 = arith.constant dense<0.000000e+00> : vector<1xf32>
    %64 = vector.multi_reduction <add>, %63, %cst_21 [1, 2] : vector<1x16x16xf32> to vector<1xf32>
    %65 = vector.shape_cast %64 : vector<1xf32> to vector<1x1x1xf32>
    %66 = vector.extract %65[0, 0, 0] : f32 from vector<1x1x1xf32>
    %67 = vector.broadcast %66 : f32 to vector<1x1xf32>
    %68 = arith.addf %14, %67 : vector<1x1xf32>
    %69 = arith.mulf %38, %38 : vector<16x16xf32>
    %70 = arith.mulf %37, %37 : vector<16x16xf32>
    %71 = arith.mulf %38, %37 : vector<16x16xf32>
    %72 = arith.mulf %17, %17 : vector<16x16xf32>
    %73 = arith.mulf %20, %20 : vector<16x16xf32>
    %74 = arith.mulf %17, %20 : vector<16x16xf32>
    %75 = tpu.concatenate %38, %37, %69, %70, %71, %17, %20, %72, %73, %74 in 0 : vector<16x16xf32>, vector<16x16xf32>, vector<16x16xf32>, vector<16x16xf32>, vector<16x16xf32>, vector<16x16xf32>, vector<16x16xf32>, vector<16x16xf32>, vector<16x16xf32>, vector<16x16xf32> -> vector<160x16xf32>
    %cst_22 = arith.constant dense<0.000000e+00> : vector<160x128xf32>
    %76 = tpu.matmul %75, %1, %cst_22 {dimension_numbers = #tpu.dot_dimension_numbers<[1], [0], [0], [1], [0, 0, 1, 1], [], []>} : vector<160x16xf32>, vector<16x128xf32>, vector<160x128xf32> -> vector<160x128xf32>
    %77 = vector.extract_strided_slice %76 {offsets = [0, 0], sizes = [16, 128], strides = [1, 1]} : vector<160x128xf32> to vector<16x128xf32>
    %78 = vector.extract_strided_slice %76 {offsets = [16, 0], sizes = [16, 128], strides = [1, 1]} : vector<160x128xf32> to vector<16x128xf32>
    %79 = vector.extract_strided_slice %76 {offsets = [32, 0], sizes = [16, 128], strides = [1, 1]} : vector<160x128xf32> to vector<16x128xf32>
    %80 = vector.extract_strided_slice %76 {offsets = [48, 0], sizes = [16, 128], strides = [1, 1]} : vector<160x128xf32> to vector<16x128xf32>
    %81 = vector.extract_strided_slice %76 {offsets = [64, 0], sizes = [16, 128], strides = [1, 1]} : vector<160x128xf32> to vector<16x128xf32>
    %82 = vector.extract_strided_slice %76 {offsets = [80, 0], sizes = [16, 128], strides = [1, 1]} : vector<160x128xf32> to vector<16x128xf32>
    %83 = vector.extract_strided_slice %76 {offsets = [96, 0], sizes = [16, 128], strides = [1, 1]} : vector<160x128xf32> to vector<16x128xf32>
    %84 = vector.extract_strided_slice %76 {offsets = [112, 0], sizes = [16, 128], strides = [1, 1]} : vector<160x128xf32> to vector<16x128xf32>
    %85 = vector.extract_strided_slice %76 {offsets = [128, 0], sizes = [16, 128], strides = [1, 1]} : vector<160x128xf32> to vector<16x128xf32>
    %86 = vector.extract_strided_slice %76 {offsets = [144, 0], sizes = [16, 128], strides = [1, 1]} : vector<160x128xf32> to vector<16x128xf32>
    %87 = tpu.concatenate %77, %78, %79, %80, %81, %82, %83, %84, %85, %86 in 1 : vector<16x128xf32>, vector<16x128xf32>, vector<16x128xf32>, vector<16x128xf32>, vector<16x128xf32>, vector<16x128xf32>, vector<16x128xf32>, vector<16x128xf32>, vector<16x128xf32>, vector<16x128xf32> -> vector<16x1280xf32>
    %cst_23 = arith.constant dense<0.000000e+00> : vector<8x1280xf32>
    %88 = tpu.matmul %0, %87, %cst_23 {dimension_numbers = #tpu.dot_dimension_numbers<[1], [0], [0], [1], [0, 0, 1, 1], [], []>} : vector<8x16xf32>, vector<16x1280xf32>, vector<8x1280xf32> -> vector<8x1280xf32>
    %89 = vector.extract_strided_slice %88 {offsets = [0, 0], sizes = [8, 128], strides = [1, 1]} : vector<8x1280xf32> to vector<8x128xf32>
    %90 = vector.extract_strided_slice %88 {offsets = [0, 128], sizes = [8, 128], strides = [1, 1]} : vector<8x1280xf32> to vector<8x128xf32>
    %91 = vector.extract_strided_slice %88 {offsets = [0, 256], sizes = [8, 128], strides = [1, 1]} : vector<8x1280xf32> to vector<8x128xf32>
    %92 = vector.extract_strided_slice %88 {offsets = [0, 384], sizes = [8, 128], strides = [1, 1]} : vector<8x1280xf32> to vector<8x128xf32>
    %93 = vector.extract_strided_slice %88 {offsets = [0, 512], sizes = [8, 128], strides = [1, 1]} : vector<8x1280xf32> to vector<8x128xf32>
    %94 = vector.extract_strided_slice %88 {offsets = [0, 640], sizes = [8, 128], strides = [1, 1]} : vector<8x1280xf32> to vector<8x128xf32>
    %95 = vector.extract_strided_slice %88 {offsets = [0, 768], sizes = [8, 128], strides = [1, 1]} : vector<8x1280xf32> to vector<8x128xf32>
    %96 = vector.extract_strided_slice %88 {offsets = [0, 896], sizes = [8, 128], strides = [1, 1]} : vector<8x1280xf32> to vector<8x128xf32>
    %97 = vector.extract_strided_slice %88 {offsets = [0, 1024], sizes = [8, 128], strides = [1, 1]} : vector<8x1280xf32> to vector<8x128xf32>
    %98 = vector.extract_strided_slice %88 {offsets = [0, 1152], sizes = [8, 128], strides = [1, 1]} : vector<8x1280xf32> to vector<8x128xf32>
    %99 = arith.mulf %89, %89 : vector<8x128xf32>
    %100 = arith.subf %91, %99 : vector<8x128xf32>
    %101 = arith.mulf %90, %90 : vector<8x128xf32>
    %102 = arith.subf %92, %101 : vector<8x128xf32>
    %103 = arith.mulf %89, %90 : vector<8x128xf32>
    %104 = arith.subf %93, %103 : vector<8x128xf32>
    %cst_24 = arith.constant 2.000000e+00 : f32
    %105 = vector.broadcast %cst_24 : f32 to vector<8x128xf32>
    %106 = arith.mulf %105, %89 : vector<8x128xf32>
    %107 = arith.mulf %106, %90 : vector<8x128xf32>
    %cst_25 = arith.constant 9.99999974E-5 : f32
    %108 = vector.broadcast %cst_25 : f32 to vector<8x128xf32>
    %109 = arith.addf %107, %108 : vector<8x128xf32>
    %cst_26 = arith.constant 2.000000e+00 : f32
    %110 = vector.broadcast %cst_26 : f32 to vector<8x128xf32>
    %111 = arith.mulf %110, %104 : vector<8x128xf32>
    %cst_27 = arith.constant 8.99999984E-4 : f32
    %112 = vector.broadcast %cst_27 : f32 to vector<8x128xf32>
    %113 = arith.addf %111, %112 : vector<8x128xf32>
    %114 = arith.mulf %109, %113 : vector<8x128xf32>
    %115 = arith.mulf %89, %89 : vector<8x128xf32>
    %116 = arith.mulf %90, %90 : vector<8x128xf32>
    %117 = arith.addf %115, %116 : vector<8x128xf32>
    %cst_28 = arith.constant 9.99999974E-5 : f32
    %118 = vector.broadcast %cst_28 : f32 to vector<8x128xf32>
    %119 = arith.addf %117, %118 : vector<8x128xf32>
    %120 = arith.addf %100, %102 : vector<8x128xf32>
    %cst_29 = arith.constant 8.99999984E-4 : f32
    %121 = vector.broadcast %cst_29 : f32 to vector<8x128xf32>
    %122 = arith.addf %120, %121 : vector<8x128xf32>
    %123 = arith.mulf %119, %122 : vector<8x128xf32>
    %124 = arith.divf %114, %123 : vector<8x128xf32>
    %125 = arith.mulf %124, %11 : vector<8x128xf32>
    %126 = vector.shape_cast %125 : vector<8x128xf32> to vector<1x8x128xf32>
    %cst_30 = arith.constant dense<0.000000e+00> : vector<1xf32>
    %127 = vector.multi_reduction <add>, %126, %cst_30 [1, 2] : vector<1x8x128xf32> to vector<1xf32>
    %128 = vector.shape_cast %127 : vector<1xf32> to vector<1x1x1xf32>
    %129 = vector.extract %128[0, 0, 0] : f32 from vector<1x1x1xf32>
    %130 = vector.broadcast %129 : f32 to vector<1x1xf32>
    %131 = arith.mulf %94, %94 : vector<8x128xf32>
    %132 = arith.subf %96, %131 : vector<8x128xf32>
    %133 = arith.mulf %95, %95 : vector<8x128xf32>
    %134 = arith.subf %97, %133 : vector<8x128xf32>
    %135 = arith.mulf %94, %95 : vector<8x128xf32>
    %136 = arith.subf %98, %135 : vector<8x128xf32>
    %cst_31 = arith.constant 2.000000e+00 : f32
    %137 = vector.broadcast %cst_31 : f32 to vector<8x128xf32>
    %138 = arith.mulf %137, %94 : vector<8x128xf32>
    %139 = arith.mulf %138, %95 : vector<8x128xf32>
    %cst_32 = arith.constant 9.99999974E-5 : f32
    %140 = vector.broadcast %cst_32 : f32 to vector<8x128xf32>
    %141 = arith.addf %139, %140 : vector<8x128xf32>
    %cst_33 = arith.constant 2.000000e+00 : f32
    %142 = vector.broadcast %cst_33 : f32 to vector<8x128xf32>
    %143 = arith.mulf %142, %136 : vector<8x128xf32>
    %cst_34 = arith.constant 8.99999984E-4 : f32
    %144 = vector.broadcast %cst_34 : f32 to vector<8x128xf32>
    %145 = arith.addf %143, %144 : vector<8x128xf32>
    %146 = arith.mulf %141, %145 : vector<8x128xf32>
    %147 = arith.mulf %94, %94 : vector<8x128xf32>
    %148 = arith.mulf %95, %95 : vector<8x128xf32>
    %149 = arith.addf %147, %148 : vector<8x128xf32>
    %cst_35 = arith.constant 9.99999974E-5 : f32
    %150 = vector.broadcast %cst_35 : f32 to vector<8x128xf32>
    %151 = arith.addf %149, %150 : vector<8x128xf32>
    %152 = arith.addf %132, %134 : vector<8x128xf32>
    %cst_36 = arith.constant 8.99999984E-4 : f32
    %153 = vector.broadcast %cst_36 : f32 to vector<8x128xf32>
    %154 = arith.addf %152, %153 : vector<8x128xf32>
    %155 = arith.mulf %151, %154 : vector<8x128xf32>
    %156 = arith.divf %146, %155 : vector<8x128xf32>
    %157 = arith.mulf %156, %11 : vector<8x128xf32>
    %158 = vector.shape_cast %157 : vector<8x128xf32> to vector<1x8x128xf32>
    %cst_37 = arith.constant dense<0.000000e+00> : vector<1xf32>
    %159 = vector.multi_reduction <add>, %158, %cst_37 [1, 2] : vector<1x8x128xf32> to vector<1xf32>
    %160 = vector.shape_cast %159 : vector<1xf32> to vector<1x1x1xf32>
    %161 = vector.extract %160[0, 0, 0] : f32 from vector<1x1x1xf32>
    %162 = vector.broadcast %161 : f32 to vector<1x1xf32>
    %163 = arith.addf %14, %130 : vector<1x1xf32>
    %164 = arith.addf %14, %162 : vector<1x1xf32>
    %c1_i32 = arith.constant 1 : i32
    %c0_38 = arith.constant 0 : index
    %165 = arith.index_cast %c1_i32 : i32 to index
    %c0_39 = arith.constant 0 : index
    %c0_40 = arith.constant 0 : index
    %166 = vector.load %arg1[%c0_38, %165, %c0_39, %c0_40] : memref<1x4x16x16xf32, #tpu.memory_space<vmem>>, vector<1x1x16x16xf32>
    %167 = vector.shape_cast %166 : vector<1x1x16x16xf32> to vector<16x16xf32>
    %c0_41 = arith.constant 0 : index
    %168 = arith.index_cast %c1_i32 : i32 to index
    %c0_42 = arith.constant 0 : index
    %c0_43 = arith.constant 0 : index
    %169 = vector.load %arg2[%c0_41, %168, %c0_42, %c0_43] : memref<1x4x16x16xf32, #tpu.memory_space<vmem>>, vector<1x1x16x16xf32>
    %170 = vector.shape_cast %169 : vector<1x1x16x16xf32> to vector<16x16xf32>
    %c0_44 = arith.constant 0 : index
    %171 = arith.index_cast %c1_i32 : i32 to index
    %c0_45 = arith.constant 0 : index
    %c0_46 = arith.constant 0 : index
    %172 = vector.load %arg3[%c0_44, %171, %c0_45, %c0_46] : memref<1x4x16x16xf32, #tpu.memory_space<vmem>>, vector<1x1x16x16xf32>
    %173 = vector.shape_cast %172 : vector<1x1x16x16xf32> to vector<16x16xf32>
    %174 = arith.addf %167, %173 : vector<16x16xf32>
    %175 = vector.broadcast %cst_8 : f32 to vector<16x16xf32>
    %176 = arith.mulf %174, %175 : vector<16x16xf32>
    %177 = arith.maximumf %27, %176 : vector<16x16xf32>
    %178 = arith.subf %27, %177 : vector<16x16xf32>
    %179 = math.exp %178 : vector<16x16xf32>
    %180 = arith.subf %176, %177 : vector<16x16xf32>
    %181 = math.exp %180 : vector<16x16xf32>
    %182 = arith.mulf %179, %33 : vector<16x16xf32>
    %183 = arith.addf %182, %181 : vector<16x16xf32>
    %184 = arith.mulf %179, %36 : vector<16x16xf32>
    %185 = arith.mulf %181, %167 : vector<16x16xf32>
    %186 = arith.addf %184, %185 : vector<16x16xf32>
    %187 = arith.maximumf %37, %170 : vector<16x16xf32>
    %188 = arith.divf %186, %183 : vector<16x16xf32>
    %189 = arith.subf %167, %170 : vector<16x16xf32>
    %190 = arith.subf %188, %187 : vector<16x16xf32>
    %191 = math.absf %190 : vector<16x16xf32>
    %192 = vector.shape_cast %191 : vector<16x16xf32> to vector<1x16x16xf32>
    %cst_47 = arith.constant dense<0.000000e+00> : vector<1xf32>
    %193 = vector.multi_reduction <add>, %192, %cst_47 [1, 2] : vector<1x16x16xf32> to vector<1xf32>
    %194 = vector.shape_cast %193 : vector<1xf32> to vector<1x1x1xf32>
    %195 = vector.extract %194[0, 0, 0] : f32 from vector<1x1x1xf32>
    %196 = vector.broadcast %195 : f32 to vector<1x1xf32>
    %197 = arith.addf %47, %196 : vector<1x1xf32>
    %198 = math.absf %189 : vector<16x16xf32>
    %199 = vector.shape_cast %198 : vector<16x16xf32> to vector<1x16x16xf32>
    %cst_48 = arith.constant dense<0.000000e+00> : vector<1xf32>
    %200 = vector.multi_reduction <add>, %199, %cst_48 [1, 2] : vector<1x16x16xf32> to vector<1xf32>
    %201 = vector.shape_cast %200 : vector<1xf32> to vector<1x1x1xf32>
    %202 = vector.extract %201[0, 0, 0] : f32 from vector<1x1x1xf32>
    %203 = vector.broadcast %202 : f32 to vector<1x1xf32>
    %204 = arith.addf %54, %203 : vector<1x1xf32>
    %205 = arith.mulf %189, %189 : vector<16x16xf32>
    %206 = vector.shape_cast %205 : vector<16x16xf32> to vector<1x16x16xf32>
    %cst_49 = arith.constant dense<0.000000e+00> : vector<1xf32>
    %207 = vector.multi_reduction <add>, %206, %cst_49 [1, 2] : vector<1x16x16xf32> to vector<1xf32>
    %208 = vector.shape_cast %207 : vector<1xf32> to vector<1x1x1xf32>
    %209 = vector.extract %208[0, 0, 0] : f32 from vector<1x1x1xf32>
    %210 = vector.broadcast %209 : f32 to vector<1x1xf32>
    %211 = arith.addf %61, %210 : vector<1x1xf32>
    %212 = arith.mulf %170, %170 : vector<16x16xf32>
    %213 = vector.shape_cast %212 : vector<16x16xf32> to vector<1x16x16xf32>
    %cst_50 = arith.constant dense<0.000000e+00> : vector<1xf32>
    %214 = vector.multi_reduction <add>, %213, %cst_50 [1, 2] : vector<1x16x16xf32> to vector<1xf32>
    %215 = vector.shape_cast %214 : vector<1xf32> to vector<1x1x1xf32>
    %216 = vector.extract %215[0, 0, 0] : f32 from vector<1x1x1xf32>
    %217 = vector.broadcast %216 : f32 to vector<1x1xf32>
    %218 = arith.addf %68, %217 : vector<1x1xf32>
    %219 = arith.mulf %188, %188 : vector<16x16xf32>
    %220 = arith.mulf %187, %187 : vector<16x16xf32>
    %221 = arith.mulf %188, %187 : vector<16x16xf32>
    %222 = arith.mulf %167, %167 : vector<16x16xf32>
    %223 = arith.mulf %170, %170 : vector<16x16xf32>
    %224 = arith.mulf %167, %170 : vector<16x16xf32>
    %225 = tpu.concatenate %188, %187, %219, %220, %221, %167, %170, %222, %223, %224 in 0 : vector<16x16xf32>, vector<16x16xf32>, vector<16x16xf32>, vector<16x16xf32>, vector<16x16xf32>, vector<16x16xf32>, vector<16x16xf32>, vector<16x16xf32>, vector<16x16xf32>, vector<16x16xf32> -> vector<160x16xf32>
    %cst_51 = arith.constant dense<0.000000e+00> : vector<160x128xf32>
    %226 = tpu.matmul %225, %1, %cst_51 {dimension_numbers = #tpu.dot_dimension_numbers<[1], [0], [0], [1], [0, 0, 1, 1], [], []>} : vector<160x16xf32>, vector<16x128xf32>, vector<160x128xf32> -> vector<160x128xf32>
    %227 = vector.extract_strided_slice %226 {offsets = [0, 0], sizes = [16, 128], strides = [1, 1]} : vector<160x128xf32> to vector<16x128xf32>
    %228 = vector.extract_strided_slice %226 {offsets = [16, 0], sizes = [16, 128], strides = [1, 1]} : vector<160x128xf32> to vector<16x128xf32>
    %229 = vector.extract_strided_slice %226 {offsets = [32, 0], sizes = [16, 128], strides = [1, 1]} : vector<160x128xf32> to vector<16x128xf32>
    %230 = vector.extract_strided_slice %226 {offsets = [48, 0], sizes = [16, 128], strides = [1, 1]} : vector<160x128xf32> to vector<16x128xf32>
    %231 = vector.extract_strided_slice %226 {offsets = [64, 0], sizes = [16, 128], strides = [1, 1]} : vector<160x128xf32> to vector<16x128xf32>
    %232 = vector.extract_strided_slice %226 {offsets = [80, 0], sizes = [16, 128], strides = [1, 1]} : vector<160x128xf32> to vector<16x128xf32>
    %233 = vector.extract_strided_slice %226 {offsets = [96, 0], sizes = [16, 128], strides = [1, 1]} : vector<160x128xf32> to vector<16x128xf32>
    %234 = vector.extract_strided_slice %226 {offsets = [112, 0], sizes = [16, 128], strides = [1, 1]} : vector<160x128xf32> to vector<16x128xf32>
    %235 = vector.extract_strided_slice %226 {offsets = [128, 0], sizes = [16, 128], strides = [1, 1]} : vector<160x128xf32> to vector<16x128xf32>
    %236 = vector.extract_strided_slice %226 {offsets = [144, 0], sizes = [16, 128], strides = [1, 1]} : vector<160x128xf32> to vector<16x128xf32>
    %237 = tpu.concatenate %227, %228, %229, %230, %231, %232, %233, %234, %235, %236 in 1 : vector<16x128xf32>, vector<16x128xf32>, vector<16x128xf32>, vector<16x128xf32>, vector<16x128xf32>, vector<16x128xf32>, vector<16x128xf32>, vector<16x128xf32>, vector<16x128xf32>, vector<16x128xf32> -> vector<16x1280xf32>
    %cst_52 = arith.constant dense<0.000000e+00> : vector<8x1280xf32>
    %238 = tpu.matmul %0, %237, %cst_52 {dimension_numbers = #tpu.dot_dimension_numbers<[1], [0], [0], [1], [0, 0, 1, 1], [], []>} : vector<8x16xf32>, vector<16x1280xf32>, vector<8x1280xf32> -> vector<8x1280xf32>
    %239 = vector.extract_strided_slice %238 {offsets = [0, 0], sizes = [8, 128], strides = [1, 1]} : vector<8x1280xf32> to vector<8x128xf32>
    %240 = vector.extract_strided_slice %238 {offsets = [0, 128], sizes = [8, 128], strides = [1, 1]} : vector<8x1280xf32> to vector<8x128xf32>
    %241 = vector.extract_strided_slice %238 {offsets = [0, 256], sizes = [8, 128], strides = [1, 1]} : vector<8x1280xf32> to vector<8x128xf32>
    %242 = vector.extract_strided_slice %238 {offsets = [0, 384], sizes = [8, 128], strides = [1, 1]} : vector<8x1280xf32> to vector<8x128xf32>
    %243 = vector.extract_strided_slice %238 {offsets = [0, 512], sizes = [8, 128], strides = [1, 1]} : vector<8x1280xf32> to vector<8x128xf32>
    %244 = vector.extract_strided_slice %238 {offsets = [0, 640], sizes = [8, 128], strides = [1, 1]} : vector<8x1280xf32> to vector<8x128xf32>
    %245 = vector.extract_strided_slice %238 {offsets = [0, 768], sizes = [8, 128], strides = [1, 1]} : vector<8x1280xf32> to vector<8x128xf32>
    %246 = vector.extract_strided_slice %238 {offsets = [0, 896], sizes = [8, 128], strides = [1, 1]} : vector<8x1280xf32> to vector<8x128xf32>
    %247 = vector.extract_strided_slice %238 {offsets = [0, 1024], sizes = [8, 128], strides = [1, 1]} : vector<8x1280xf32> to vector<8x128xf32>
    %248 = vector.extract_strided_slice %238 {offsets = [0, 1152], sizes = [8, 128], strides = [1, 1]} : vector<8x1280xf32> to vector<8x128xf32>
    %249 = arith.mulf %239, %239 : vector<8x128xf32>
    %250 = arith.subf %241, %249 : vector<8x128xf32>
    %251 = arith.mulf %240, %240 : vector<8x128xf32>
    %252 = arith.subf %242, %251 : vector<8x128xf32>
    %253 = arith.mulf %239, %240 : vector<8x128xf32>
    %254 = arith.subf %243, %253 : vector<8x128xf32>
    %cst_53 = arith.constant 2.000000e+00 : f32
    %255 = vector.broadcast %cst_53 : f32 to vector<8x128xf32>
    %256 = arith.mulf %255, %239 : vector<8x128xf32>
    %257 = arith.mulf %256, %240 : vector<8x128xf32>
    %cst_54 = arith.constant 9.99999974E-5 : f32
    %258 = vector.broadcast %cst_54 : f32 to vector<8x128xf32>
    %259 = arith.addf %257, %258 : vector<8x128xf32>
    %cst_55 = arith.constant 2.000000e+00 : f32
    %260 = vector.broadcast %cst_55 : f32 to vector<8x128xf32>
    %261 = arith.mulf %260, %254 : vector<8x128xf32>
    %cst_56 = arith.constant 8.99999984E-4 : f32
    %262 = vector.broadcast %cst_56 : f32 to vector<8x128xf32>
    %263 = arith.addf %261, %262 : vector<8x128xf32>
    %264 = arith.mulf %259, %263 : vector<8x128xf32>
    %265 = arith.mulf %239, %239 : vector<8x128xf32>
    %266 = arith.mulf %240, %240 : vector<8x128xf32>
    %267 = arith.addf %265, %266 : vector<8x128xf32>
    %cst_57 = arith.constant 9.99999974E-5 : f32
    %268 = vector.broadcast %cst_57 : f32 to vector<8x128xf32>
    %269 = arith.addf %267, %268 : vector<8x128xf32>
    %270 = arith.addf %250, %252 : vector<8x128xf32>
    %cst_58 = arith.constant 8.99999984E-4 : f32
    %271 = vector.broadcast %cst_58 : f32 to vector<8x128xf32>
    %272 = arith.addf %270, %271 : vector<8x128xf32>
    %273 = arith.mulf %269, %272 : vector<8x128xf32>
    %274 = arith.divf %264, %273 : vector<8x128xf32>
    %275 = arith.mulf %274, %11 : vector<8x128xf32>
    %276 = vector.shape_cast %275 : vector<8x128xf32> to vector<1x8x128xf32>
    %cst_59 = arith.constant dense<0.000000e+00> : vector<1xf32>
    %277 = vector.multi_reduction <add>, %276, %cst_59 [1, 2] : vector<1x8x128xf32> to vector<1xf32>
    %278 = vector.shape_cast %277 : vector<1xf32> to vector<1x1x1xf32>
    %279 = vector.extract %278[0, 0, 0] : f32 from vector<1x1x1xf32>
    %280 = vector.broadcast %279 : f32 to vector<1x1xf32>
    %281 = arith.mulf %244, %244 : vector<8x128xf32>
    %282 = arith.subf %246, %281 : vector<8x128xf32>
    %283 = arith.mulf %245, %245 : vector<8x128xf32>
    %284 = arith.subf %247, %283 : vector<8x128xf32>
    %285 = arith.mulf %244, %245 : vector<8x128xf32>
    %286 = arith.subf %248, %285 : vector<8x128xf32>
    %cst_60 = arith.constant 2.000000e+00 : f32
    %287 = vector.broadcast %cst_60 : f32 to vector<8x128xf32>
    %288 = arith.mulf %287, %244 : vector<8x128xf32>
    %289 = arith.mulf %288, %245 : vector<8x128xf32>
    %cst_61 = arith.constant 9.99999974E-5 : f32
    %290 = vector.broadcast %cst_61 : f32 to vector<8x128xf32>
    %291 = arith.addf %289, %290 : vector<8x128xf32>
    %cst_62 = arith.constant 2.000000e+00 : f32
    %292 = vector.broadcast %cst_62 : f32 to vector<8x128xf32>
    %293 = arith.mulf %292, %286 : vector<8x128xf32>
    %cst_63 = arith.constant 8.99999984E-4 : f32
    %294 = vector.broadcast %cst_63 : f32 to vector<8x128xf32>
    %295 = arith.addf %293, %294 : vector<8x128xf32>
    %296 = arith.mulf %291, %295 : vector<8x128xf32>
    %297 = arith.mulf %244, %244 : vector<8x128xf32>
    %298 = arith.mulf %245, %245 : vector<8x128xf32>
    %299 = arith.addf %297, %298 : vector<8x128xf32>
    %cst_64 = arith.constant 9.99999974E-5 : f32
    %300 = vector.broadcast %cst_64 : f32 to vector<8x128xf32>
    %301 = arith.addf %299, %300 : vector<8x128xf32>
    %302 = arith.addf %282, %284 : vector<8x128xf32>
    %cst_65 = arith.constant 8.99999984E-4 : f32
    %303 = vector.broadcast %cst_65 : f32 to vector<8x128xf32>
    %304 = arith.addf %302, %303 : vector<8x128xf32>
    %305 = arith.mulf %301, %304 : vector<8x128xf32>
    %306 = arith.divf %296, %305 : vector<8x128xf32>
    %307 = arith.mulf %306, %11 : vector<8x128xf32>
    %308 = vector.shape_cast %307 : vector<8x128xf32> to vector<1x8x128xf32>
    %cst_66 = arith.constant dense<0.000000e+00> : vector<1xf32>
    %309 = vector.multi_reduction <add>, %308, %cst_66 [1, 2] : vector<1x8x128xf32> to vector<1xf32>
    %310 = vector.shape_cast %309 : vector<1xf32> to vector<1x1x1xf32>
    %311 = vector.extract %310[0, 0, 0] : f32 from vector<1x1x1xf32>
    %312 = vector.broadcast %311 : f32 to vector<1x1xf32>
    %313 = arith.addf %163, %280 : vector<1x1xf32>
    %314 = arith.addf %164, %312 : vector<1x1xf32>
    %c2_i32 = arith.constant 2 : i32
    %c0_67 = arith.constant 0 : index
    %315 = arith.index_cast %c2_i32 : i32 to index
    %c0_68 = arith.constant 0 : index
    %c0_69 = arith.constant 0 : index
    %316 = vector.load %arg1[%c0_67, %315, %c0_68, %c0_69] : memref<1x4x16x16xf32, #tpu.memory_space<vmem>>, vector<1x1x16x16xf32>
    %317 = vector.shape_cast %316 : vector<1x1x16x16xf32> to vector<16x16xf32>
    %c0_70 = arith.constant 0 : index
    %318 = arith.index_cast %c2_i32 : i32 to index
    %c0_71 = arith.constant 0 : index
    %c0_72 = arith.constant 0 : index
    %319 = vector.load %arg2[%c0_70, %318, %c0_71, %c0_72] : memref<1x4x16x16xf32, #tpu.memory_space<vmem>>, vector<1x1x16x16xf32>
    %320 = vector.shape_cast %319 : vector<1x1x16x16xf32> to vector<16x16xf32>
    %c0_73 = arith.constant 0 : index
    %321 = arith.index_cast %c2_i32 : i32 to index
    %c0_74 = arith.constant 0 : index
    %c0_75 = arith.constant 0 : index
    %322 = vector.load %arg3[%c0_73, %321, %c0_74, %c0_75] : memref<1x4x16x16xf32, #tpu.memory_space<vmem>>, vector<1x1x16x16xf32>
    %323 = vector.shape_cast %322 : vector<1x1x16x16xf32> to vector<16x16xf32>
    %324 = arith.addf %317, %323 : vector<16x16xf32>
    %325 = vector.broadcast %cst_8 : f32 to vector<16x16xf32>
    %326 = arith.mulf %324, %325 : vector<16x16xf32>
    %327 = arith.maximumf %177, %326 : vector<16x16xf32>
    %328 = arith.subf %177, %327 : vector<16x16xf32>
    %329 = math.exp %328 : vector<16x16xf32>
    %330 = arith.subf %326, %327 : vector<16x16xf32>
    %331 = math.exp %330 : vector<16x16xf32>
    %332 = arith.mulf %329, %183 : vector<16x16xf32>
    %333 = arith.addf %332, %331 : vector<16x16xf32>
    %334 = arith.mulf %329, %186 : vector<16x16xf32>
    %335 = arith.mulf %331, %317 : vector<16x16xf32>
    %336 = arith.addf %334, %335 : vector<16x16xf32>
    %337 = arith.maximumf %187, %320 : vector<16x16xf32>
    %338 = arith.divf %336, %333 : vector<16x16xf32>
    %339 = arith.subf %317, %320 : vector<16x16xf32>
    %340 = arith.subf %338, %337 : vector<16x16xf32>
    %341 = math.absf %340 : vector<16x16xf32>
    %342 = vector.shape_cast %341 : vector<16x16xf32> to vector<1x16x16xf32>
    %cst_76 = arith.constant dense<0.000000e+00> : vector<1xf32>
    %343 = vector.multi_reduction <add>, %342, %cst_76 [1, 2] : vector<1x16x16xf32> to vector<1xf32>
    %344 = vector.shape_cast %343 : vector<1xf32> to vector<1x1x1xf32>
    %345 = vector.extract %344[0, 0, 0] : f32 from vector<1x1x1xf32>
    %346 = vector.broadcast %345 : f32 to vector<1x1xf32>
    %347 = arith.addf %197, %346 : vector<1x1xf32>
    %348 = math.absf %339 : vector<16x16xf32>
    %349 = vector.shape_cast %348 : vector<16x16xf32> to vector<1x16x16xf32>
    %cst_77 = arith.constant dense<0.000000e+00> : vector<1xf32>
    %350 = vector.multi_reduction <add>, %349, %cst_77 [1, 2] : vector<1x16x16xf32> to vector<1xf32>
    %351 = vector.shape_cast %350 : vector<1xf32> to vector<1x1x1xf32>
    %352 = vector.extract %351[0, 0, 0] : f32 from vector<1x1x1xf32>
    %353 = vector.broadcast %352 : f32 to vector<1x1xf32>
    %354 = arith.addf %204, %353 : vector<1x1xf32>
    %355 = arith.mulf %339, %339 : vector<16x16xf32>
    %356 = vector.shape_cast %355 : vector<16x16xf32> to vector<1x16x16xf32>
    %cst_78 = arith.constant dense<0.000000e+00> : vector<1xf32>
    %357 = vector.multi_reduction <add>, %356, %cst_78 [1, 2] : vector<1x16x16xf32> to vector<1xf32>
    %358 = vector.shape_cast %357 : vector<1xf32> to vector<1x1x1xf32>
    %359 = vector.extract %358[0, 0, 0] : f32 from vector<1x1x1xf32>
    %360 = vector.broadcast %359 : f32 to vector<1x1xf32>
    %361 = arith.addf %211, %360 : vector<1x1xf32>
    %362 = arith.mulf %320, %320 : vector<16x16xf32>
    %363 = vector.shape_cast %362 : vector<16x16xf32> to vector<1x16x16xf32>
    %cst_79 = arith.constant dense<0.000000e+00> : vector<1xf32>
    %364 = vector.multi_reduction <add>, %363, %cst_79 [1, 2] : vector<1x16x16xf32> to vector<1xf32>
    %365 = vector.shape_cast %364 : vector<1xf32> to vector<1x1x1xf32>
    %366 = vector.extract %365[0, 0, 0] : f32 from vector<1x1x1xf32>
    %367 = vector.broadcast %366 : f32 to vector<1x1xf32>
    %368 = arith.addf %218, %367 : vector<1x1xf32>
    %369 = arith.mulf %338, %338 : vector<16x16xf32>
    %370 = arith.mulf %337, %337 : vector<16x16xf32>
    %371 = arith.mulf %338, %337 : vector<16x16xf32>
    %372 = arith.mulf %317, %317 : vector<16x16xf32>
    %373 = arith.mulf %320, %320 : vector<16x16xf32>
    %374 = arith.mulf %317, %320 : vector<16x16xf32>
    %375 = tpu.concatenate %338, %337, %369, %370, %371, %317, %320, %372, %373, %374 in 0 : vector<16x16xf32>, vector<16x16xf32>, vector<16x16xf32>, vector<16x16xf32>, vector<16x16xf32>, vector<16x16xf32>, vector<16x16xf32>, vector<16x16xf32>, vector<16x16xf32>, vector<16x16xf32> -> vector<160x16xf32>
    %cst_80 = arith.constant dense<0.000000e+00> : vector<160x128xf32>
    %376 = tpu.matmul %375, %1, %cst_80 {dimension_numbers = #tpu.dot_dimension_numbers<[1], [0], [0], [1], [0, 0, 1, 1], [], []>} : vector<160x16xf32>, vector<16x128xf32>, vector<160x128xf32> -> vector<160x128xf32>
    %377 = vector.extract_strided_slice %376 {offsets = [0, 0], sizes = [16, 128], strides = [1, 1]} : vector<160x128xf32> to vector<16x128xf32>
    %378 = vector.extract_strided_slice %376 {offsets = [16, 0], sizes = [16, 128], strides = [1, 1]} : vector<160x128xf32> to vector<16x128xf32>
    %379 = vector.extract_strided_slice %376 {offsets = [32, 0], sizes = [16, 128], strides = [1, 1]} : vector<160x128xf32> to vector<16x128xf32>
    %380 = vector.extract_strided_slice %376 {offsets = [48, 0], sizes = [16, 128], strides = [1, 1]} : vector<160x128xf32> to vector<16x128xf32>
    %381 = vector.extract_strided_slice %376 {offsets = [64, 0], sizes = [16, 128], strides = [1, 1]} : vector<160x128xf32> to vector<16x128xf32>
    %382 = vector.extract_strided_slice %376 {offsets = [80, 0], sizes = [16, 128], strides = [1, 1]} : vector<160x128xf32> to vector<16x128xf32>
    %383 = vector.extract_strided_slice %376 {offsets = [96, 0], sizes = [16, 128], strides = [1, 1]} : vector<160x128xf32> to vector<16x128xf32>
    %384 = vector.extract_strided_slice %376 {offsets = [112, 0], sizes = [16, 128], strides = [1, 1]} : vector<160x128xf32> to vector<16x128xf32>
    %385 = vector.extract_strided_slice %376 {offsets = [128, 0], sizes = [16, 128], strides = [1, 1]} : vector<160x128xf32> to vector<16x128xf32>
    %386 = vector.extract_strided_slice %376 {offsets = [144, 0], sizes = [16, 128], strides = [1, 1]} : vector<160x128xf32> to vector<16x128xf32>
    %387 = tpu.concatenate %377, %378, %379, %380, %381, %382, %383, %384, %385, %386 in 1 : vector<16x128xf32>, vector<16x128xf32>, vector<16x128xf32>, vector<16x128xf32>, vector<16x128xf32>, vector<16x128xf32>, vector<16x128xf32>, vector<16x128xf32>, vector<16x128xf32>, vector<16x128xf32> -> vector<16x1280xf32>
    %cst_81 = arith.constant dense<0.000000e+00> : vector<8x1280xf32>
    %388 = tpu.matmul %0, %387, %cst_81 {dimension_numbers = #tpu.dot_dimension_numbers<[1], [0], [0], [1], [0, 0, 1, 1], [], []>} : vector<8x16xf32>, vector<16x1280xf32>, vector<8x1280xf32> -> vector<8x1280xf32>
    %389 = vector.extract_strided_slice %388 {offsets = [0, 0], sizes = [8, 128], strides = [1, 1]} : vector<8x1280xf32> to vector<8x128xf32>
    %390 = vector.extract_strided_slice %388 {offsets = [0, 128], sizes = [8, 128], strides = [1, 1]} : vector<8x1280xf32> to vector<8x128xf32>
    %391 = vector.extract_strided_slice %388 {offsets = [0, 256], sizes = [8, 128], strides = [1, 1]} : vector<8x1280xf32> to vector<8x128xf32>
    %392 = vector.extract_strided_slice %388 {offsets = [0, 384], sizes = [8, 128], strides = [1, 1]} : vector<8x1280xf32> to vector<8x128xf32>
    %393 = vector.extract_strided_slice %388 {offsets = [0, 512], sizes = [8, 128], strides = [1, 1]} : vector<8x1280xf32> to vector<8x128xf32>
    %394 = vector.extract_strided_slice %388 {offsets = [0, 640], sizes = [8, 128], strides = [1, 1]} : vector<8x1280xf32> to vector<8x128xf32>
    %395 = vector.extract_strided_slice %388 {offsets = [0, 768], sizes = [8, 128], strides = [1, 1]} : vector<8x1280xf32> to vector<8x128xf32>
    %396 = vector.extract_strided_slice %388 {offsets = [0, 896], sizes = [8, 128], strides = [1, 1]} : vector<8x1280xf32> to vector<8x128xf32>
    %397 = vector.extract_strided_slice %388 {offsets = [0, 1024], sizes = [8, 128], strides = [1, 1]} : vector<8x1280xf32> to vector<8x128xf32>
    %398 = vector.extract_strided_slice %388 {offsets = [0, 1152], sizes = [8, 128], strides = [1, 1]} : vector<8x1280xf32> to vector<8x128xf32>
    %399 = arith.mulf %389, %389 : vector<8x128xf32>
    %400 = arith.subf %391, %399 : vector<8x128xf32>
    %401 = arith.mulf %390, %390 : vector<8x128xf32>
    %402 = arith.subf %392, %401 : vector<8x128xf32>
    %403 = arith.mulf %389, %390 : vector<8x128xf32>
    %404 = arith.subf %393, %403 : vector<8x128xf32>
    %cst_82 = arith.constant 2.000000e+00 : f32
    %405 = vector.broadcast %cst_82 : f32 to vector<8x128xf32>
    %406 = arith.mulf %405, %389 : vector<8x128xf32>
    %407 = arith.mulf %406, %390 : vector<8x128xf32>
    %cst_83 = arith.constant 9.99999974E-5 : f32
    %408 = vector.broadcast %cst_83 : f32 to vector<8x128xf32>
    %409 = arith.addf %407, %408 : vector<8x128xf32>
    %cst_84 = arith.constant 2.000000e+00 : f32
    %410 = vector.broadcast %cst_84 : f32 to vector<8x128xf32>
    %411 = arith.mulf %410, %404 : vector<8x128xf32>
    %cst_85 = arith.constant 8.99999984E-4 : f32
    %412 = vector.broadcast %cst_85 : f32 to vector<8x128xf32>
    %413 = arith.addf %411, %412 : vector<8x128xf32>
    %414 = arith.mulf %409, %413 : vector<8x128xf32>
    %415 = arith.mulf %389, %389 : vector<8x128xf32>
    %416 = arith.mulf %390, %390 : vector<8x128xf32>
    %417 = arith.addf %415, %416 : vector<8x128xf32>
    %cst_86 = arith.constant 9.99999974E-5 : f32
    %418 = vector.broadcast %cst_86 : f32 to vector<8x128xf32>
    %419 = arith.addf %417, %418 : vector<8x128xf32>
    %420 = arith.addf %400, %402 : vector<8x128xf32>
    %cst_87 = arith.constant 8.99999984E-4 : f32
    %421 = vector.broadcast %cst_87 : f32 to vector<8x128xf32>
    %422 = arith.addf %420, %421 : vector<8x128xf32>
    %423 = arith.mulf %419, %422 : vector<8x128xf32>
    %424 = arith.divf %414, %423 : vector<8x128xf32>
    %425 = arith.mulf %424, %11 : vector<8x128xf32>
    %426 = vector.shape_cast %425 : vector<8x128xf32> to vector<1x8x128xf32>
    %cst_88 = arith.constant dense<0.000000e+00> : vector<1xf32>
    %427 = vector.multi_reduction <add>, %426, %cst_88 [1, 2] : vector<1x8x128xf32> to vector<1xf32>
    %428 = vector.shape_cast %427 : vector<1xf32> to vector<1x1x1xf32>
    %429 = vector.extract %428[0, 0, 0] : f32 from vector<1x1x1xf32>
    %430 = vector.broadcast %429 : f32 to vector<1x1xf32>
    %431 = arith.mulf %394, %394 : vector<8x128xf32>
    %432 = arith.subf %396, %431 : vector<8x128xf32>
    %433 = arith.mulf %395, %395 : vector<8x128xf32>
    %434 = arith.subf %397, %433 : vector<8x128xf32>
    %435 = arith.mulf %394, %395 : vector<8x128xf32>
    %436 = arith.subf %398, %435 : vector<8x128xf32>
    %cst_89 = arith.constant 2.000000e+00 : f32
    %437 = vector.broadcast %cst_89 : f32 to vector<8x128xf32>
    %438 = arith.mulf %437, %394 : vector<8x128xf32>
    %439 = arith.mulf %438, %395 : vector<8x128xf32>
    %cst_90 = arith.constant 9.99999974E-5 : f32
    %440 = vector.broadcast %cst_90 : f32 to vector<8x128xf32>
    %441 = arith.addf %439, %440 : vector<8x128xf32>
    %cst_91 = arith.constant 2.000000e+00 : f32
    %442 = vector.broadcast %cst_91 : f32 to vector<8x128xf32>
    %443 = arith.mulf %442, %436 : vector<8x128xf32>
    %cst_92 = arith.constant 8.99999984E-4 : f32
    %444 = vector.broadcast %cst_92 : f32 to vector<8x128xf32>
    %445 = arith.addf %443, %444 : vector<8x128xf32>
    %446 = arith.mulf %441, %445 : vector<8x128xf32>
    %447 = arith.mulf %394, %394 : vector<8x128xf32>
    %448 = arith.mulf %395, %395 : vector<8x128xf32>
    %449 = arith.addf %447, %448 : vector<8x128xf32>
    %cst_93 = arith.constant 9.99999974E-5 : f32
    %450 = vector.broadcast %cst_93 : f32 to vector<8x128xf32>
    %451 = arith.addf %449, %450 : vector<8x128xf32>
    %452 = arith.addf %432, %434 : vector<8x128xf32>
    %cst_94 = arith.constant 8.99999984E-4 : f32
    %453 = vector.broadcast %cst_94 : f32 to vector<8x128xf32>
    %454 = arith.addf %452, %453 : vector<8x128xf32>
    %455 = arith.mulf %451, %454 : vector<8x128xf32>
    %456 = arith.divf %446, %455 : vector<8x128xf32>
    %457 = arith.mulf %456, %11 : vector<8x128xf32>
    %458 = vector.shape_cast %457 : vector<8x128xf32> to vector<1x8x128xf32>
    %cst_95 = arith.constant dense<0.000000e+00> : vector<1xf32>
    %459 = vector.multi_reduction <add>, %458, %cst_95 [1, 2] : vector<1x8x128xf32> to vector<1xf32>
    %460 = vector.shape_cast %459 : vector<1xf32> to vector<1x1x1xf32>
    %461 = vector.extract %460[0, 0, 0] : f32 from vector<1x1x1xf32>
    %462 = vector.broadcast %461 : f32 to vector<1x1xf32>
    %463 = arith.addf %313, %430 : vector<1x1xf32>
    %464 = arith.addf %314, %462 : vector<1x1xf32>
    %c3_i32 = arith.constant 3 : i32
    %c0_96 = arith.constant 0 : index
    %465 = arith.index_cast %c3_i32 : i32 to index
    %c0_97 = arith.constant 0 : index
    %c0_98 = arith.constant 0 : index
    %466 = vector.load %arg1[%c0_96, %465, %c0_97, %c0_98] : memref<1x4x16x16xf32, #tpu.memory_space<vmem>>, vector<1x1x16x16xf32>
    %467 = vector.shape_cast %466 : vector<1x1x16x16xf32> to vector<16x16xf32>
    %c0_99 = arith.constant 0 : index
    %468 = arith.index_cast %c3_i32 : i32 to index
    %c0_100 = arith.constant 0 : index
    %c0_101 = arith.constant 0 : index
    %469 = vector.load %arg2[%c0_99, %468, %c0_100, %c0_101] : memref<1x4x16x16xf32, #tpu.memory_space<vmem>>, vector<1x1x16x16xf32>
    %470 = vector.shape_cast %469 : vector<1x1x16x16xf32> to vector<16x16xf32>
    %c0_102 = arith.constant 0 : index
    %471 = arith.index_cast %c3_i32 : i32 to index
    %c0_103 = arith.constant 0 : index
    %c0_104 = arith.constant 0 : index
    %472 = vector.load %arg3[%c0_102, %471, %c0_103, %c0_104] : memref<1x4x16x16xf32, #tpu.memory_space<vmem>>, vector<1x1x16x16xf32>
    %473 = vector.shape_cast %472 : vector<1x1x16x16xf32> to vector<16x16xf32>
    %474 = arith.addf %467, %473 : vector<16x16xf32>
    %475 = vector.broadcast %cst_8 : f32 to vector<16x16xf32>
    %476 = arith.mulf %474, %475 : vector<16x16xf32>
    %477 = arith.maximumf %327, %476 : vector<16x16xf32>
    %478 = arith.subf %327, %477 : vector<16x16xf32>
    %479 = math.exp %478 : vector<16x16xf32>
    %480 = arith.subf %476, %477 : vector<16x16xf32>
    %481 = math.exp %480 : vector<16x16xf32>
    %482 = arith.mulf %479, %333 : vector<16x16xf32>
    %483 = arith.addf %482, %481 : vector<16x16xf32>
    %484 = arith.mulf %479, %336 : vector<16x16xf32>
    %485 = arith.mulf %481, %467 : vector<16x16xf32>
    %486 = arith.addf %484, %485 : vector<16x16xf32>
    %487 = arith.maximumf %337, %470 : vector<16x16xf32>
    %488 = arith.divf %486, %483 : vector<16x16xf32>
    %489 = arith.subf %467, %470 : vector<16x16xf32>
    %490 = arith.subf %488, %487 : vector<16x16xf32>
    %491 = math.absf %490 : vector<16x16xf32>
    %492 = vector.shape_cast %491 : vector<16x16xf32> to vector<1x16x16xf32>
    %cst_105 = arith.constant dense<0.000000e+00> : vector<1xf32>
    %493 = vector.multi_reduction <add>, %492, %cst_105 [1, 2] : vector<1x16x16xf32> to vector<1xf32>
    %494 = vector.shape_cast %493 : vector<1xf32> to vector<1x1x1xf32>
    %495 = vector.extract %494[0, 0, 0] : f32 from vector<1x1x1xf32>
    %496 = vector.broadcast %495 : f32 to vector<1x1xf32>
    %497 = arith.addf %347, %496 : vector<1x1xf32>
    %498 = math.absf %489 : vector<16x16xf32>
    %499 = vector.shape_cast %498 : vector<16x16xf32> to vector<1x16x16xf32>
    %cst_106 = arith.constant dense<0.000000e+00> : vector<1xf32>
    %500 = vector.multi_reduction <add>, %499, %cst_106 [1, 2] : vector<1x16x16xf32> to vector<1xf32>
    %501 = vector.shape_cast %500 : vector<1xf32> to vector<1x1x1xf32>
    %502 = vector.extract %501[0, 0, 0] : f32 from vector<1x1x1xf32>
    %503 = vector.broadcast %502 : f32 to vector<1x1xf32>
    %504 = arith.addf %354, %503 : vector<1x1xf32>
    %505 = arith.mulf %489, %489 : vector<16x16xf32>
    %506 = vector.shape_cast %505 : vector<16x16xf32> to vector<1x16x16xf32>
    %cst_107 = arith.constant dense<0.000000e+00> : vector<1xf32>
    %507 = vector.multi_reduction <add>, %506, %cst_107 [1, 2] : vector<1x16x16xf32> to vector<1xf32>
    %508 = vector.shape_cast %507 : vector<1xf32> to vector<1x1x1xf32>
    %509 = vector.extract %508[0, 0, 0] : f32 from vector<1x1x1xf32>
    %510 = vector.broadcast %509 : f32 to vector<1x1xf32>
    %511 = arith.addf %361, %510 : vector<1x1xf32>
    %512 = arith.mulf %470, %470 : vector<16x16xf32>
    %513 = vector.shape_cast %512 : vector<16x16xf32> to vector<1x16x16xf32>
    %cst_108 = arith.constant dense<0.000000e+00> : vector<1xf32>
    %514 = vector.multi_reduction <add>, %513, %cst_108 [1, 2] : vector<1x16x16xf32> to vector<1xf32>
    %515 = vector.shape_cast %514 : vector<1xf32> to vector<1x1x1xf32>
    %516 = vector.extract %515[0, 0, 0] : f32 from vector<1x1x1xf32>
    %517 = vector.broadcast %516 : f32 to vector<1x1xf32>
    %518 = arith.addf %368, %517 : vector<1x1xf32>
    %519 = arith.mulf %488, %488 : vector<16x16xf32>
    %520 = arith.mulf %487, %487 : vector<16x16xf32>
    %521 = arith.mulf %488, %487 : vector<16x16xf32>
    %522 = arith.mulf %467, %467 : vector<16x16xf32>
    %523 = arith.mulf %470, %470 : vector<16x16xf32>
    %524 = arith.mulf %467, %470 : vector<16x16xf32>
    %525 = tpu.concatenate %488, %487, %519, %520, %521, %467, %470, %522, %523, %524 in 0 : vector<16x16xf32>, vector<16x16xf32>, vector<16x16xf32>, vector<16x16xf32>, vector<16x16xf32>, vector<16x16xf32>, vector<16x16xf32>, vector<16x16xf32>, vector<16x16xf32>, vector<16x16xf32> -> vector<160x16xf32>
    %cst_109 = arith.constant dense<0.000000e+00> : vector<160x128xf32>
    %526 = tpu.matmul %525, %1, %cst_109 {dimension_numbers = #tpu.dot_dimension_numbers<[1], [0], [0], [1], [0, 0, 1, 1], [], []>} : vector<160x16xf32>, vector<16x128xf32>, vector<160x128xf32> -> vector<160x128xf32>
    %527 = vector.extract_strided_slice %526 {offsets = [0, 0], sizes = [16, 128], strides = [1, 1]} : vector<160x128xf32> to vector<16x128xf32>
    %528 = vector.extract_strided_slice %526 {offsets = [16, 0], sizes = [16, 128], strides = [1, 1]} : vector<160x128xf32> to vector<16x128xf32>
    %529 = vector.extract_strided_slice %526 {offsets = [32, 0], sizes = [16, 128], strides = [1, 1]} : vector<160x128xf32> to vector<16x128xf32>
    %530 = vector.extract_strided_slice %526 {offsets = [48, 0], sizes = [16, 128], strides = [1, 1]} : vector<160x128xf32> to vector<16x128xf32>
    %531 = vector.extract_strided_slice %526 {offsets = [64, 0], sizes = [16, 128], strides = [1, 1]} : vector<160x128xf32> to vector<16x128xf32>
    %532 = vector.extract_strided_slice %526 {offsets = [80, 0], sizes = [16, 128], strides = [1, 1]} : vector<160x128xf32> to vector<16x128xf32>
    %533 = vector.extract_strided_slice %526 {offsets = [96, 0], sizes = [16, 128], strides = [1, 1]} : vector<160x128xf32> to vector<16x128xf32>
    %534 = vector.extract_strided_slice %526 {offsets = [112, 0], sizes = [16, 128], strides = [1, 1]} : vector<160x128xf32> to vector<16x128xf32>
    %535 = vector.extract_strided_slice %526 {offsets = [128, 0], sizes = [16, 128], strides = [1, 1]} : vector<160x128xf32> to vector<16x128xf32>
    %536 = vector.extract_strided_slice %526 {offsets = [144, 0], sizes = [16, 128], strides = [1, 1]} : vector<160x128xf32> to vector<16x128xf32>
    %537 = tpu.concatenate %527, %528, %529, %530, %531, %532, %533, %534, %535, %536 in 1 : vector<16x128xf32>, vector<16x128xf32>, vector<16x128xf32>, vector<16x128xf32>, vector<16x128xf32>, vector<16x128xf32>, vector<16x128xf32>, vector<16x128xf32>, vector<16x128xf32>, vector<16x128xf32> -> vector<16x1280xf32>
    %cst_110 = arith.constant dense<0.000000e+00> : vector<8x1280xf32>
    %538 = tpu.matmul %0, %537, %cst_110 {dimension_numbers = #tpu.dot_dimension_numbers<[1], [0], [0], [1], [0, 0, 1, 1], [], []>} : vector<8x16xf32>, vector<16x1280xf32>, vector<8x1280xf32> -> vector<8x1280xf32>
    %539 = vector.extract_strided_slice %538 {offsets = [0, 0], sizes = [8, 128], strides = [1, 1]} : vector<8x1280xf32> to vector<8x128xf32>
    %540 = vector.extract_strided_slice %538 {offsets = [0, 128], sizes = [8, 128], strides = [1, 1]} : vector<8x1280xf32> to vector<8x128xf32>
    %541 = vector.extract_strided_slice %538 {offsets = [0, 256], sizes = [8, 128], strides = [1, 1]} : vector<8x1280xf32> to vector<8x128xf32>
    %542 = vector.extract_strided_slice %538 {offsets = [0, 384], sizes = [8, 128], strides = [1, 1]} : vector<8x1280xf32> to vector<8x128xf32>
    %543 = vector.extract_strided_slice %538 {offsets = [0, 512], sizes = [8, 128], strides = [1, 1]} : vector<8x1280xf32> to vector<8x128xf32>
    %544 = vector.extract_strided_slice %538 {offsets = [0, 640], sizes = [8, 128], strides = [1, 1]} : vector<8x1280xf32> to vector<8x128xf32>
    %545 = vector.extract_strided_slice %538 {offsets = [0, 768], sizes = [8, 128], strides = [1, 1]} : vector<8x1280xf32> to vector<8x128xf32>
    %546 = vector.extract_strided_slice %538 {offsets = [0, 896], sizes = [8, 128], strides = [1, 1]} : vector<8x1280xf32> to vector<8x128xf32>
    %547 = vector.extract_strided_slice %538 {offsets = [0, 1024], sizes = [8, 128], strides = [1, 1]} : vector<8x1280xf32> to vector<8x128xf32>
    %548 = vector.extract_strided_slice %538 {offsets = [0, 1152], sizes = [8, 128], strides = [1, 1]} : vector<8x1280xf32> to vector<8x128xf32>
    %549 = arith.mulf %539, %539 : vector<8x128xf32>
    %550 = arith.subf %541, %549 : vector<8x128xf32>
    %551 = arith.mulf %540, %540 : vector<8x128xf32>
    %552 = arith.subf %542, %551 : vector<8x128xf32>
    %553 = arith.mulf %539, %540 : vector<8x128xf32>
    %554 = arith.subf %543, %553 : vector<8x128xf32>
    %cst_111 = arith.constant 2.000000e+00 : f32
    %555 = vector.broadcast %cst_111 : f32 to vector<8x128xf32>
    %556 = arith.mulf %555, %539 : vector<8x128xf32>
    %557 = arith.mulf %556, %540 : vector<8x128xf32>
    %cst_112 = arith.constant 9.99999974E-5 : f32
    %558 = vector.broadcast %cst_112 : f32 to vector<8x128xf32>
    %559 = arith.addf %557, %558 : vector<8x128xf32>
    %cst_113 = arith.constant 2.000000e+00 : f32
    %560 = vector.broadcast %cst_113 : f32 to vector<8x128xf32>
    %561 = arith.mulf %560, %554 : vector<8x128xf32>
    %cst_114 = arith.constant 8.99999984E-4 : f32
    %562 = vector.broadcast %cst_114 : f32 to vector<8x128xf32>
    %563 = arith.addf %561, %562 : vector<8x128xf32>
    %564 = arith.mulf %559, %563 : vector<8x128xf32>
    %565 = arith.mulf %539, %539 : vector<8x128xf32>
    %566 = arith.mulf %540, %540 : vector<8x128xf32>
    %567 = arith.addf %565, %566 : vector<8x128xf32>
    %cst_115 = arith.constant 9.99999974E-5 : f32
    %568 = vector.broadcast %cst_115 : f32 to vector<8x128xf32>
    %569 = arith.addf %567, %568 : vector<8x128xf32>
    %570 = arith.addf %550, %552 : vector<8x128xf32>
    %cst_116 = arith.constant 8.99999984E-4 : f32
    %571 = vector.broadcast %cst_116 : f32 to vector<8x128xf32>
    %572 = arith.addf %570, %571 : vector<8x128xf32>
    %573 = arith.mulf %569, %572 : vector<8x128xf32>
    %574 = arith.divf %564, %573 : vector<8x128xf32>
    %575 = arith.mulf %574, %11 : vector<8x128xf32>
    %576 = vector.shape_cast %575 : vector<8x128xf32> to vector<1x8x128xf32>
    %cst_117 = arith.constant dense<0.000000e+00> : vector<1xf32>
    %577 = vector.multi_reduction <add>, %576, %cst_117 [1, 2] : vector<1x8x128xf32> to vector<1xf32>
    %578 = vector.shape_cast %577 : vector<1xf32> to vector<1x1x1xf32>
    %579 = vector.extract %578[0, 0, 0] : f32 from vector<1x1x1xf32>
    %580 = vector.broadcast %579 : f32 to vector<1x1xf32>
    %581 = arith.mulf %544, %544 : vector<8x128xf32>
    %582 = arith.subf %546, %581 : vector<8x128xf32>
    %583 = arith.mulf %545, %545 : vector<8x128xf32>
    %584 = arith.subf %547, %583 : vector<8x128xf32>
    %585 = arith.mulf %544, %545 : vector<8x128xf32>
    %586 = arith.subf %548, %585 : vector<8x128xf32>
    %cst_118 = arith.constant 2.000000e+00 : f32
    %587 = vector.broadcast %cst_118 : f32 to vector<8x128xf32>
    %588 = arith.mulf %587, %544 : vector<8x128xf32>
    %589 = arith.mulf %588, %545 : vector<8x128xf32>
    %cst_119 = arith.constant 9.99999974E-5 : f32
    %590 = vector.broadcast %cst_119 : f32 to vector<8x128xf32>
    %591 = arith.addf %589, %590 : vector<8x128xf32>
    %cst_120 = arith.constant 2.000000e+00 : f32
    %592 = vector.broadcast %cst_120 : f32 to vector<8x128xf32>
    %593 = arith.mulf %592, %586 : vector<8x128xf32>
    %cst_121 = arith.constant 8.99999984E-4 : f32
    %594 = vector.broadcast %cst_121 : f32 to vector<8x128xf32>
    %595 = arith.addf %593, %594 : vector<8x128xf32>
    %596 = arith.mulf %591, %595 : vector<8x128xf32>
    %597 = arith.mulf %544, %544 : vector<8x128xf32>
    %598 = arith.mulf %545, %545 : vector<8x128xf32>
    %599 = arith.addf %597, %598 : vector<8x128xf32>
    %cst_122 = arith.constant 9.99999974E-5 : f32
    %600 = vector.broadcast %cst_122 : f32 to vector<8x128xf32>
    %601 = arith.addf %599, %600 : vector<8x128xf32>
    %602 = arith.addf %582, %584 : vector<8x128xf32>
    %cst_123 = arith.constant 8.99999984E-4 : f32
    %603 = vector.broadcast %cst_123 : f32 to vector<8x128xf32>
    %604 = arith.addf %602, %603 : vector<8x128xf32>
    %605 = arith.mulf %601, %604 : vector<8x128xf32>
    %606 = arith.divf %596, %605 : vector<8x128xf32>
    %607 = arith.mulf %606, %11 : vector<8x128xf32>
    %608 = vector.shape_cast %607 : vector<8x128xf32> to vector<1x8x128xf32>
    %cst_124 = arith.constant dense<0.000000e+00> : vector<1xf32>
    %609 = vector.multi_reduction <add>, %608, %cst_124 [1, 2] : vector<1x8x128xf32> to vector<1xf32>
    %610 = vector.shape_cast %609 : vector<1xf32> to vector<1x1x1xf32>
    %611 = vector.extract %610[0, 0, 0] : f32 from vector<1x1x1xf32>
    %612 = vector.broadcast %611 : f32 to vector<1x1xf32>
    %613 = arith.addf %463, %580 : vector<1x1xf32>
    %614 = arith.addf %464, %612 : vector<1x1xf32>
    %c4_i32 = arith.constant 4 : i32
    %cst_125 = arith.constant 2.000000e+00 : f32
    %c0_i32_126 = arith.constant 0 : i32
    %c3_i32_127 = arith.constant 3 : i32
    %615 = arith.subi %c3_i32_127, %c0_i32_126 : i32
    %c0_128 = arith.constant 0 : index
    %616 = arith.index_cast %615 : i32 to index
    %c0_129 = arith.constant 0 : index
    %c0_130 = arith.constant 0 : index
    %617 = vector.load %arg1[%c0_128, %616, %c0_129, %c0_130] : memref<1x4x16x16xf32, #tpu.memory_space<vmem>>, vector<1x1x16x16xf32>
    %618 = vector.shape_cast %617 : vector<1x1x16x16xf32> to vector<16x16xf32>
    %c0_131 = arith.constant 0 : index
    %619 = arith.index_cast %615 : i32 to index
    %c0_132 = arith.constant 0 : index
    %c0_133 = arith.constant 0 : index
    %620 = vector.load %arg2[%c0_131, %619, %c0_132, %c0_133] : memref<1x4x16x16xf32, #tpu.memory_space<vmem>>, vector<1x1x16x16xf32>
    %621 = vector.shape_cast %620 : vector<1x1x16x16xf32> to vector<16x16xf32>
    %c0_134 = arith.constant 0 : index
    %622 = arith.index_cast %615 : i32 to index
    %c0_135 = arith.constant 0 : index
    %c0_136 = arith.constant 0 : index
    %623 = vector.load %arg3[%c0_134, %622, %c0_135, %c0_136] : memref<1x4x16x16xf32, #tpu.memory_space<vmem>>, vector<1x1x16x16xf32>
    %624 = vector.shape_cast %623 : vector<1x1x16x16xf32> to vector<16x16xf32>
    %625 = arith.addf %618, %624 : vector<16x16xf32>
    %626 = vector.broadcast %cst_125 : f32 to vector<16x16xf32>
    %627 = arith.mulf %625, %626 : vector<16x16xf32>
    %628 = arith.maximumf %13, %627 : vector<16x16xf32>
    %629 = arith.subf %13, %628 : vector<16x16xf32>
    %630 = math.exp %629 : vector<16x16xf32>
    %631 = arith.subf %627, %628 : vector<16x16xf32>
    %632 = math.exp %631 : vector<16x16xf32>
    %633 = arith.mulf %630, %12 : vector<16x16xf32>
    %634 = arith.addf %633, %632 : vector<16x16xf32>
    %635 = arith.mulf %630, %12 : vector<16x16xf32>
    %636 = arith.mulf %632, %618 : vector<16x16xf32>
    %637 = arith.addf %635, %636 : vector<16x16xf32>
    %638 = arith.maximumf %13, %621 : vector<16x16xf32>
    %639 = arith.divf %637, %634 : vector<16x16xf32>
    %640 = arith.subf %639, %638 : vector<16x16xf32>
    %641 = math.absf %640 : vector<16x16xf32>
    %642 = vector.shape_cast %641 : vector<16x16xf32> to vector<1x16x16xf32>
    %cst_137 = arith.constant dense<0.000000e+00> : vector<1xf32>
    %643 = vector.multi_reduction <add>, %642, %cst_137 [1, 2] : vector<1x16x16xf32> to vector<1xf32>
    %644 = vector.shape_cast %643 : vector<1xf32> to vector<1x1x1xf32>
    %645 = vector.extract %644[0, 0, 0] : f32 from vector<1x1x1xf32>
    %646 = vector.broadcast %645 : f32 to vector<1x1xf32>
    %647 = arith.addf %14, %646 : vector<1x1xf32>
    %648 = arith.mulf %639, %639 : vector<16x16xf32>
    %649 = arith.mulf %638, %638 : vector<16x16xf32>
    %650 = arith.mulf %639, %638 : vector<16x16xf32>
    %651 = tpu.concatenate %639, %638, %648, %649, %650 in 0 : vector<16x16xf32>, vector<16x16xf32>, vector<16x16xf32>, vector<16x16xf32>, vector<16x16xf32> -> vector<80x16xf32>
    %cst_138 = arith.constant dense<0.000000e+00> : vector<80x128xf32>
    %652 = tpu.matmul %651, %1, %cst_138 {dimension_numbers = #tpu.dot_dimension_numbers<[1], [0], [0], [1], [0, 0, 1, 1], [], []>} : vector<80x16xf32>, vector<16x128xf32>, vector<80x128xf32> -> vector<80x128xf32>
    %653 = vector.extract_strided_slice %652 {offsets = [0, 0], sizes = [16, 128], strides = [1, 1]} : vector<80x128xf32> to vector<16x128xf32>
    %654 = vector.extract_strided_slice %652 {offsets = [16, 0], sizes = [16, 128], strides = [1, 1]} : vector<80x128xf32> to vector<16x128xf32>
    %655 = vector.extract_strided_slice %652 {offsets = [32, 0], sizes = [16, 128], strides = [1, 1]} : vector<80x128xf32> to vector<16x128xf32>
    %656 = vector.extract_strided_slice %652 {offsets = [48, 0], sizes = [16, 128], strides = [1, 1]} : vector<80x128xf32> to vector<16x128xf32>
    %657 = vector.extract_strided_slice %652 {offsets = [64, 0], sizes = [16, 128], strides = [1, 1]} : vector<80x128xf32> to vector<16x128xf32>
    %658 = tpu.concatenate %653, %654, %655, %656, %657 in 1 : vector<16x128xf32>, vector<16x128xf32>, vector<16x128xf32>, vector<16x128xf32>, vector<16x128xf32> -> vector<16x640xf32>
    %cst_139 = arith.constant dense<0.000000e+00> : vector<8x640xf32>
    %659 = tpu.matmul %0, %658, %cst_139 {dimension_numbers = #tpu.dot_dimension_numbers<[1], [0], [0], [1], [0, 0, 1, 1], [], []>} : vector<8x16xf32>, vector<16x640xf32>, vector<8x640xf32> -> vector<8x640xf32>
    %660 = vector.extract_strided_slice %659 {offsets = [0, 0], sizes = [8, 128], strides = [1, 1]} : vector<8x640xf32> to vector<8x128xf32>
    %661 = vector.extract_strided_slice %659 {offsets = [0, 128], sizes = [8, 128], strides = [1, 1]} : vector<8x640xf32> to vector<8x128xf32>
    %662 = vector.extract_strided_slice %659 {offsets = [0, 256], sizes = [8, 128], strides = [1, 1]} : vector<8x640xf32> to vector<8x128xf32>
    %663 = vector.extract_strided_slice %659 {offsets = [0, 384], sizes = [8, 128], strides = [1, 1]} : vector<8x640xf32> to vector<8x128xf32>
    %664 = vector.extract_strided_slice %659 {offsets = [0, 512], sizes = [8, 128], strides = [1, 1]} : vector<8x640xf32> to vector<8x128xf32>
    %665 = arith.mulf %660, %660 : vector<8x128xf32>
    %666 = arith.subf %662, %665 : vector<8x128xf32>
    %667 = arith.mulf %661, %661 : vector<8x128xf32>
    %668 = arith.subf %663, %667 : vector<8x128xf32>
    %669 = arith.mulf %660, %661 : vector<8x128xf32>
    %670 = arith.subf %664, %669 : vector<8x128xf32>
    %cst_140 = arith.constant 2.000000e+00 : f32
    %671 = vector.broadcast %cst_140 : f32 to vector<8x128xf32>
    %672 = arith.mulf %671, %660 : vector<8x128xf32>
    %673 = arith.mulf %672, %661 : vector<8x128xf32>
    %cst_141 = arith.constant 9.99999974E-5 : f32
    %674 = vector.broadcast %cst_141 : f32 to vector<8x128xf32>
    %675 = arith.addf %673, %674 : vector<8x128xf32>
    %cst_142 = arith.constant 2.000000e+00 : f32
    %676 = vector.broadcast %cst_142 : f32 to vector<8x128xf32>
    %677 = arith.mulf %676, %670 : vector<8x128xf32>
    %cst_143 = arith.constant 8.99999984E-4 : f32
    %678 = vector.broadcast %cst_143 : f32 to vector<8x128xf32>
    %679 = arith.addf %677, %678 : vector<8x128xf32>
    %680 = arith.mulf %675, %679 : vector<8x128xf32>
    %681 = arith.mulf %660, %660 : vector<8x128xf32>
    %682 = arith.mulf %661, %661 : vector<8x128xf32>
    %683 = arith.addf %681, %682 : vector<8x128xf32>
    %cst_144 = arith.constant 9.99999974E-5 : f32
    %684 = vector.broadcast %cst_144 : f32 to vector<8x128xf32>
    %685 = arith.addf %683, %684 : vector<8x128xf32>
    %686 = arith.addf %666, %668 : vector<8x128xf32>
    %cst_145 = arith.constant 8.99999984E-4 : f32
    %687 = vector.broadcast %cst_145 : f32 to vector<8x128xf32>
    %688 = arith.addf %686, %687 : vector<8x128xf32>
    %689 = arith.mulf %685, %688 : vector<8x128xf32>
    %690 = arith.divf %680, %689 : vector<8x128xf32>
    %691 = arith.mulf %690, %11 : vector<8x128xf32>
    %692 = vector.shape_cast %691 : vector<8x128xf32> to vector<1x8x128xf32>
    %cst_146 = arith.constant dense<0.000000e+00> : vector<1xf32>
    %693 = vector.multi_reduction <add>, %692, %cst_146 [1, 2] : vector<1x8x128xf32> to vector<1xf32>
    %694 = vector.shape_cast %693 : vector<1xf32> to vector<1x1x1xf32>
    %695 = vector.extract %694[0, 0, 0] : f32 from vector<1x1x1xf32>
    %696 = vector.broadcast %695 : f32 to vector<1x1xf32>
    %697 = arith.addf %14, %696 : vector<1x1xf32>
    %c1_i32_147 = arith.constant 1 : i32
    %c3_i32_148 = arith.constant 3 : i32
    %698 = arith.subi %c3_i32_148, %c1_i32_147 : i32
    %c0_149 = arith.constant 0 : index
    %699 = arith.index_cast %698 : i32 to index
    %c0_150 = arith.constant 0 : index
    %c0_151 = arith.constant 0 : index
    %700 = vector.load %arg1[%c0_149, %699, %c0_150, %c0_151] : memref<1x4x16x16xf32, #tpu.memory_space<vmem>>, vector<1x1x16x16xf32>
    %701 = vector.shape_cast %700 : vector<1x1x16x16xf32> to vector<16x16xf32>
    %c0_152 = arith.constant 0 : index
    %702 = arith.index_cast %698 : i32 to index
    %c0_153 = arith.constant 0 : index
    %c0_154 = arith.constant 0 : index
    %703 = vector.load %arg2[%c0_152, %702, %c0_153, %c0_154] : memref<1x4x16x16xf32, #tpu.memory_space<vmem>>, vector<1x1x16x16xf32>
    %704 = vector.shape_cast %703 : vector<1x1x16x16xf32> to vector<16x16xf32>
    %c0_155 = arith.constant 0 : index
    %705 = arith.index_cast %698 : i32 to index
    %c0_156 = arith.constant 0 : index
    %c0_157 = arith.constant 0 : index
    %706 = vector.load %arg3[%c0_155, %705, %c0_156, %c0_157] : memref<1x4x16x16xf32, #tpu.memory_space<vmem>>, vector<1x1x16x16xf32>
    %707 = vector.shape_cast %706 : vector<1x1x16x16xf32> to vector<16x16xf32>
    %708 = arith.addf %701, %707 : vector<16x16xf32>
    %709 = vector.broadcast %cst_125 : f32 to vector<16x16xf32>
    %710 = arith.mulf %708, %709 : vector<16x16xf32>
    %711 = arith.maximumf %628, %710 : vector<16x16xf32>
    %712 = arith.subf %628, %711 : vector<16x16xf32>
    %713 = math.exp %712 : vector<16x16xf32>
    %714 = arith.subf %710, %711 : vector<16x16xf32>
    %715 = math.exp %714 : vector<16x16xf32>
    %716 = arith.mulf %713, %634 : vector<16x16xf32>
    %717 = arith.addf %716, %715 : vector<16x16xf32>
    %718 = arith.mulf %713, %637 : vector<16x16xf32>
    %719 = arith.mulf %715, %701 : vector<16x16xf32>
    %720 = arith.addf %718, %719 : vector<16x16xf32>
    %721 = arith.maximumf %638, %704 : vector<16x16xf32>
    %722 = arith.divf %720, %717 : vector<16x16xf32>
    %723 = arith.subf %722, %721 : vector<16x16xf32>
    %724 = math.absf %723 : vector<16x16xf32>
    %725 = vector.shape_cast %724 : vector<16x16xf32> to vector<1x16x16xf32>
    %cst_158 = arith.constant dense<0.000000e+00> : vector<1xf32>
    %726 = vector.multi_reduction <add>, %725, %cst_158 [1, 2] : vector<1x16x16xf32> to vector<1xf32>
    %727 = vector.shape_cast %726 : vector<1xf32> to vector<1x1x1xf32>
    %728 = vector.extract %727[0, 0, 0] : f32 from vector<1x1x1xf32>
    %729 = vector.broadcast %728 : f32 to vector<1x1xf32>
    %730 = arith.addf %647, %729 : vector<1x1xf32>
    %731 = arith.mulf %722, %722 : vector<16x16xf32>
    %732 = arith.mulf %721, %721 : vector<16x16xf32>
    %733 = arith.mulf %722, %721 : vector<16x16xf32>
    %734 = tpu.concatenate %722, %721, %731, %732, %733 in 0 : vector<16x16xf32>, vector<16x16xf32>, vector<16x16xf32>, vector<16x16xf32>, vector<16x16xf32> -> vector<80x16xf32>
    %cst_159 = arith.constant dense<0.000000e+00> : vector<80x128xf32>
    %735 = tpu.matmul %734, %1, %cst_159 {dimension_numbers = #tpu.dot_dimension_numbers<[1], [0], [0], [1], [0, 0, 1, 1], [], []>} : vector<80x16xf32>, vector<16x128xf32>, vector<80x128xf32> -> vector<80x128xf32>
    %736 = vector.extract_strided_slice %735 {offsets = [0, 0], sizes = [16, 128], strides = [1, 1]} : vector<80x128xf32> to vector<16x128xf32>
    %737 = vector.extract_strided_slice %735 {offsets = [16, 0], sizes = [16, 128], strides = [1, 1]} : vector<80x128xf32> to vector<16x128xf32>
    %738 = vector.extract_strided_slice %735 {offsets = [32, 0], sizes = [16, 128], strides = [1, 1]} : vector<80x128xf32> to vector<16x128xf32>
    %739 = vector.extract_strided_slice %735 {offsets = [48, 0], sizes = [16, 128], strides = [1, 1]} : vector<80x128xf32> to vector<16x128xf32>
    %740 = vector.extract_strided_slice %735 {offsets = [64, 0], sizes = [16, 128], strides = [1, 1]} : vector<80x128xf32> to vector<16x128xf32>
    %741 = tpu.concatenate %736, %737, %738, %739, %740 in 1 : vector<16x128xf32>, vector<16x128xf32>, vector<16x128xf32>, vector<16x128xf32>, vector<16x128xf32> -> vector<16x640xf32>
    %cst_160 = arith.constant dense<0.000000e+00> : vector<8x640xf32>
    %742 = tpu.matmul %0, %741, %cst_160 {dimension_numbers = #tpu.dot_dimension_numbers<[1], [0], [0], [1], [0, 0, 1, 1], [], []>} : vector<8x16xf32>, vector<16x640xf32>, vector<8x640xf32> -> vector<8x640xf32>
    %743 = vector.extract_strided_slice %742 {offsets = [0, 0], sizes = [8, 128], strides = [1, 1]} : vector<8x640xf32> to vector<8x128xf32>
    %744 = vector.extract_strided_slice %742 {offsets = [0, 128], sizes = [8, 128], strides = [1, 1]} : vector<8x640xf32> to vector<8x128xf32>
    %745 = vector.extract_strided_slice %742 {offsets = [0, 256], sizes = [8, 128], strides = [1, 1]} : vector<8x640xf32> to vector<8x128xf32>
    %746 = vector.extract_strided_slice %742 {offsets = [0, 384], sizes = [8, 128], strides = [1, 1]} : vector<8x640xf32> to vector<8x128xf32>
    %747 = vector.extract_strided_slice %742 {offsets = [0, 512], sizes = [8, 128], strides = [1, 1]} : vector<8x640xf32> to vector<8x128xf32>
    %748 = arith.mulf %743, %743 : vector<8x128xf32>
    %749 = arith.subf %745, %748 : vector<8x128xf32>
    %750 = arith.mulf %744, %744 : vector<8x128xf32>
    %751 = arith.subf %746, %750 : vector<8x128xf32>
    %752 = arith.mulf %743, %744 : vector<8x128xf32>
    %753 = arith.subf %747, %752 : vector<8x128xf32>
    %cst_161 = arith.constant 2.000000e+00 : f32
    %754 = vector.broadcast %cst_161 : f32 to vector<8x128xf32>
    %755 = arith.mulf %754, %743 : vector<8x128xf32>
    %756 = arith.mulf %755, %744 : vector<8x128xf32>
    %cst_162 = arith.constant 9.99999974E-5 : f32
    %757 = vector.broadcast %cst_162 : f32 to vector<8x128xf32>
    %758 = arith.addf %756, %757 : vector<8x128xf32>
    %cst_163 = arith.constant 2.000000e+00 : f32
    %759 = vector.broadcast %cst_163 : f32 to vector<8x128xf32>
    %760 = arith.mulf %759, %753 : vector<8x128xf32>
    %cst_164 = arith.constant 8.99999984E-4 : f32
    %761 = vector.broadcast %cst_164 : f32 to vector<8x128xf32>
    %762 = arith.addf %760, %761 : vector<8x128xf32>
    %763 = arith.mulf %758, %762 : vector<8x128xf32>
    %764 = arith.mulf %743, %743 : vector<8x128xf32>
    %765 = arith.mulf %744, %744 : vector<8x128xf32>
    %766 = arith.addf %764, %765 : vector<8x128xf32>
    %cst_165 = arith.constant 9.99999974E-5 : f32
    %767 = vector.broadcast %cst_165 : f32 to vector<8x128xf32>
    %768 = arith.addf %766, %767 : vector<8x128xf32>
    %769 = arith.addf %749, %751 : vector<8x128xf32>
    %cst_166 = arith.constant 8.99999984E-4 : f32
    %770 = vector.broadcast %cst_166 : f32 to vector<8x128xf32>
    %771 = arith.addf %769, %770 : vector<8x128xf32>
    %772 = arith.mulf %768, %771 : vector<8x128xf32>
    %773 = arith.divf %763, %772 : vector<8x128xf32>
    %774 = arith.mulf %773, %11 : vector<8x128xf32>
    %775 = vector.shape_cast %774 : vector<8x128xf32> to vector<1x8x128xf32>
    %cst_167 = arith.constant dense<0.000000e+00> : vector<1xf32>
    %776 = vector.multi_reduction <add>, %775, %cst_167 [1, 2] : vector<1x8x128xf32> to vector<1xf32>
    %777 = vector.shape_cast %776 : vector<1xf32> to vector<1x1x1xf32>
    %778 = vector.extract %777[0, 0, 0] : f32 from vector<1x1x1xf32>
    %779 = vector.broadcast %778 : f32 to vector<1x1xf32>
    %780 = arith.addf %697, %779 : vector<1x1xf32>
    %c2_i32_168 = arith.constant 2 : i32
    %c3_i32_169 = arith.constant 3 : i32
    %781 = arith.subi %c3_i32_169, %c2_i32_168 : i32
    %c0_170 = arith.constant 0 : index
    %782 = arith.index_cast %781 : i32 to index
    %c0_171 = arith.constant 0 : index
    %c0_172 = arith.constant 0 : index
    %783 = vector.load %arg1[%c0_170, %782, %c0_171, %c0_172] : memref<1x4x16x16xf32, #tpu.memory_space<vmem>>, vector<1x1x16x16xf32>
    %784 = vector.shape_cast %783 : vector<1x1x16x16xf32> to vector<16x16xf32>
    %c0_173 = arith.constant 0 : index
    %785 = arith.index_cast %781 : i32 to index
    %c0_174 = arith.constant 0 : index
    %c0_175 = arith.constant 0 : index
    %786 = vector.load %arg2[%c0_173, %785, %c0_174, %c0_175] : memref<1x4x16x16xf32, #tpu.memory_space<vmem>>, vector<1x1x16x16xf32>
    %787 = vector.shape_cast %786 : vector<1x1x16x16xf32> to vector<16x16xf32>
    %c0_176 = arith.constant 0 : index
    %788 = arith.index_cast %781 : i32 to index
    %c0_177 = arith.constant 0 : index
    %c0_178 = arith.constant 0 : index
    %789 = vector.load %arg3[%c0_176, %788, %c0_177, %c0_178] : memref<1x4x16x16xf32, #tpu.memory_space<vmem>>, vector<1x1x16x16xf32>
    %790 = vector.shape_cast %789 : vector<1x1x16x16xf32> to vector<16x16xf32>
    %791 = arith.addf %784, %790 : vector<16x16xf32>
    %792 = vector.broadcast %cst_125 : f32 to vector<16x16xf32>
    %793 = arith.mulf %791, %792 : vector<16x16xf32>
    %794 = arith.maximumf %711, %793 : vector<16x16xf32>
    %795 = arith.subf %711, %794 : vector<16x16xf32>
    %796 = math.exp %795 : vector<16x16xf32>
    %797 = arith.subf %793, %794 : vector<16x16xf32>
    %798 = math.exp %797 : vector<16x16xf32>
    %799 = arith.mulf %796, %717 : vector<16x16xf32>
    %800 = arith.addf %799, %798 : vector<16x16xf32>
    %801 = arith.mulf %796, %720 : vector<16x16xf32>
    %802 = arith.mulf %798, %784 : vector<16x16xf32>
    %803 = arith.addf %801, %802 : vector<16x16xf32>
    %804 = arith.maximumf %721, %787 : vector<16x16xf32>
    %805 = arith.divf %803, %800 : vector<16x16xf32>
    %806 = arith.subf %805, %804 : vector<16x16xf32>
    %807 = math.absf %806 : vector<16x16xf32>
    %808 = vector.shape_cast %807 : vector<16x16xf32> to vector<1x16x16xf32>
    %cst_179 = arith.constant dense<0.000000e+00> : vector<1xf32>
    %809 = vector.multi_reduction <add>, %808, %cst_179 [1, 2] : vector<1x16x16xf32> to vector<1xf32>
    %810 = vector.shape_cast %809 : vector<1xf32> to vector<1x1x1xf32>
    %811 = vector.extract %810[0, 0, 0] : f32 from vector<1x1x1xf32>
    %812 = vector.broadcast %811 : f32 to vector<1x1xf32>
    %813 = arith.addf %730, %812 : vector<1x1xf32>
    %814 = arith.mulf %805, %805 : vector<16x16xf32>
    %815 = arith.mulf %804, %804 : vector<16x16xf32>
    %816 = arith.mulf %805, %804 : vector<16x16xf32>
    %817 = tpu.concatenate %805, %804, %814, %815, %816 in 0 : vector<16x16xf32>, vector<16x16xf32>, vector<16x16xf32>, vector<16x16xf32>, vector<16x16xf32> -> vector<80x16xf32>
    %cst_180 = arith.constant dense<0.000000e+00> : vector<80x128xf32>
    %818 = tpu.matmul %817, %1, %cst_180 {dimension_numbers = #tpu.dot_dimension_numbers<[1], [0], [0], [1], [0, 0, 1, 1], [], []>} : vector<80x16xf32>, vector<16x128xf32>, vector<80x128xf32> -> vector<80x128xf32>
    %819 = vector.extract_strided_slice %818 {offsets = [0, 0], sizes = [16, 128], strides = [1, 1]} : vector<80x128xf32> to vector<16x128xf32>
    %820 = vector.extract_strided_slice %818 {offsets = [16, 0], sizes = [16, 128], strides = [1, 1]} : vector<80x128xf32> to vector<16x128xf32>
    %821 = vector.extract_strided_slice %818 {offsets = [32, 0], sizes = [16, 128], strides = [1, 1]} : vector<80x128xf32> to vector<16x128xf32>
    %822 = vector.extract_strided_slice %818 {offsets = [48, 0], sizes = [16, 128], strides = [1, 1]} : vector<80x128xf32> to vector<16x128xf32>
    %823 = vector.extract_strided_slice %818 {offsets = [64, 0], sizes = [16, 128], strides = [1, 1]} : vector<80x128xf32> to vector<16x128xf32>
    %824 = tpu.concatenate %819, %820, %821, %822, %823 in 1 : vector<16x128xf32>, vector<16x128xf32>, vector<16x128xf32>, vector<16x128xf32>, vector<16x128xf32> -> vector<16x640xf32>
    %cst_181 = arith.constant dense<0.000000e+00> : vector<8x640xf32>
    %825 = tpu.matmul %0, %824, %cst_181 {dimension_numbers = #tpu.dot_dimension_numbers<[1], [0], [0], [1], [0, 0, 1, 1], [], []>} : vector<8x16xf32>, vector<16x640xf32>, vector<8x640xf32> -> vector<8x640xf32>
    %826 = vector.extract_strided_slice %825 {offsets = [0, 0], sizes = [8, 128], strides = [1, 1]} : vector<8x640xf32> to vector<8x128xf32>
    %827 = vector.extract_strided_slice %825 {offsets = [0, 128], sizes = [8, 128], strides = [1, 1]} : vector<8x640xf32> to vector<8x128xf32>
    %828 = vector.extract_strided_slice %825 {offsets = [0, 256], sizes = [8, 128], strides = [1, 1]} : vector<8x640xf32> to vector<8x128xf32>
    %829 = vector.extract_strided_slice %825 {offsets = [0, 384], sizes = [8, 128], strides = [1, 1]} : vector<8x640xf32> to vector<8x128xf32>
    %830 = vector.extract_strided_slice %825 {offsets = [0, 512], sizes = [8, 128], strides = [1, 1]} : vector<8x640xf32> to vector<8x128xf32>
    %831 = arith.mulf %826, %826 : vector<8x128xf32>
    %832 = arith.subf %828, %831 : vector<8x128xf32>
    %833 = arith.mulf %827, %827 : vector<8x128xf32>
    %834 = arith.subf %829, %833 : vector<8x128xf32>
    %835 = arith.mulf %826, %827 : vector<8x128xf32>
    %836 = arith.subf %830, %835 : vector<8x128xf32>
    %cst_182 = arith.constant 2.000000e+00 : f32
    %837 = vector.broadcast %cst_182 : f32 to vector<8x128xf32>
    %838 = arith.mulf %837, %826 : vector<8x128xf32>
    %839 = arith.mulf %838, %827 : vector<8x128xf32>
    %cst_183 = arith.constant 9.99999974E-5 : f32
    %840 = vector.broadcast %cst_183 : f32 to vector<8x128xf32>
    %841 = arith.addf %839, %840 : vector<8x128xf32>
    %cst_184 = arith.constant 2.000000e+00 : f32
    %842 = vector.broadcast %cst_184 : f32 to vector<8x128xf32>
    %843 = arith.mulf %842, %836 : vector<8x128xf32>
    %cst_185 = arith.constant 8.99999984E-4 : f32
    %844 = vector.broadcast %cst_185 : f32 to vector<8x128xf32>
    %845 = arith.addf %843, %844 : vector<8x128xf32>
    %846 = arith.mulf %841, %845 : vector<8x128xf32>
    %847 = arith.mulf %826, %826 : vector<8x128xf32>
    %848 = arith.mulf %827, %827 : vector<8x128xf32>
    %849 = arith.addf %847, %848 : vector<8x128xf32>
    %cst_186 = arith.constant 9.99999974E-5 : f32
    %850 = vector.broadcast %cst_186 : f32 to vector<8x128xf32>
    %851 = arith.addf %849, %850 : vector<8x128xf32>
    %852 = arith.addf %832, %834 : vector<8x128xf32>
    %cst_187 = arith.constant 8.99999984E-4 : f32
    %853 = vector.broadcast %cst_187 : f32 to vector<8x128xf32>
    %854 = arith.addf %852, %853 : vector<8x128xf32>
    %855 = arith.mulf %851, %854 : vector<8x128xf32>
    %856 = arith.divf %846, %855 : vector<8x128xf32>
    %857 = arith.mulf %856, %11 : vector<8x128xf32>
    %858 = vector.shape_cast %857 : vector<8x128xf32> to vector<1x8x128xf32>
    %cst_188 = arith.constant dense<0.000000e+00> : vector<1xf32>
    %859 = vector.multi_reduction <add>, %858, %cst_188 [1, 2] : vector<1x8x128xf32> to vector<1xf32>
    %860 = vector.shape_cast %859 : vector<1xf32> to vector<1x1x1xf32>
    %861 = vector.extract %860[0, 0, 0] : f32 from vector<1x1x1xf32>
    %862 = vector.broadcast %861 : f32 to vector<1x1xf32>
    %863 = arith.addf %780, %862 : vector<1x1xf32>
    %c3_i32_189 = arith.constant 3 : i32
    %c3_i32_190 = arith.constant 3 : i32
    %864 = arith.subi %c3_i32_190, %c3_i32_189 : i32
    %c0_191 = arith.constant 0 : index
    %865 = arith.index_cast %864 : i32 to index
    %c0_192 = arith.constant 0 : index
    %c0_193 = arith.constant 0 : index
    %866 = vector.load %arg1[%c0_191, %865, %c0_192, %c0_193] : memref<1x4x16x16xf32, #tpu.memory_space<vmem>>, vector<1x1x16x16xf32>
    %867 = vector.shape_cast %866 : vector<1x1x16x16xf32> to vector<16x16xf32>
    %c0_194 = arith.constant 0 : index
    %868 = arith.index_cast %864 : i32 to index
    %c0_195 = arith.constant 0 : index
    %c0_196 = arith.constant 0 : index
    %869 = vector.load %arg2[%c0_194, %868, %c0_195, %c0_196] : memref<1x4x16x16xf32, #tpu.memory_space<vmem>>, vector<1x1x16x16xf32>
    %870 = vector.shape_cast %869 : vector<1x1x16x16xf32> to vector<16x16xf32>
    %c0_197 = arith.constant 0 : index
    %871 = arith.index_cast %864 : i32 to index
    %c0_198 = arith.constant 0 : index
    %c0_199 = arith.constant 0 : index
    %872 = vector.load %arg3[%c0_197, %871, %c0_198, %c0_199] : memref<1x4x16x16xf32, #tpu.memory_space<vmem>>, vector<1x1x16x16xf32>
    %873 = vector.shape_cast %872 : vector<1x1x16x16xf32> to vector<16x16xf32>
    %874 = arith.addf %867, %873 : vector<16x16xf32>
    %875 = vector.broadcast %cst_125 : f32 to vector<16x16xf32>
    %876 = arith.mulf %874, %875 : vector<16x16xf32>
    %877 = arith.maximumf %794, %876 : vector<16x16xf32>
    %878 = arith.subf %794, %877 : vector<16x16xf32>
    %879 = math.exp %878 : vector<16x16xf32>
    %880 = arith.subf %876, %877 : vector<16x16xf32>
    %881 = math.exp %880 : vector<16x16xf32>
    %882 = arith.mulf %879, %800 : vector<16x16xf32>
    %883 = arith.addf %882, %881 : vector<16x16xf32>
    %884 = arith.mulf %879, %803 : vector<16x16xf32>
    %885 = arith.mulf %881, %867 : vector<16x16xf32>
    %886 = arith.addf %884, %885 : vector<16x16xf32>
    %887 = arith.maximumf %804, %870 : vector<16x16xf32>
    %888 = arith.divf %886, %883 : vector<16x16xf32>
    %889 = arith.subf %888, %887 : vector<16x16xf32>
    %890 = math.absf %889 : vector<16x16xf32>
    %891 = vector.shape_cast %890 : vector<16x16xf32> to vector<1x16x16xf32>
    %cst_200 = arith.constant dense<0.000000e+00> : vector<1xf32>
    %892 = vector.multi_reduction <add>, %891, %cst_200 [1, 2] : vector<1x16x16xf32> to vector<1xf32>
    %893 = vector.shape_cast %892 : vector<1xf32> to vector<1x1x1xf32>
    %894 = vector.extract %893[0, 0, 0] : f32 from vector<1x1x1xf32>
    %895 = vector.broadcast %894 : f32 to vector<1x1xf32>
    %896 = arith.addf %813, %895 : vector<1x1xf32>
    %897 = arith.mulf %888, %888 : vector<16x16xf32>
    %898 = arith.mulf %887, %887 : vector<16x16xf32>
    %899 = arith.mulf %888, %887 : vector<16x16xf32>
    %900 = tpu.concatenate %888, %887, %897, %898, %899 in 0 : vector<16x16xf32>, vector<16x16xf32>, vector<16x16xf32>, vector<16x16xf32>, vector<16x16xf32> -> vector<80x16xf32>
    %cst_201 = arith.constant dense<0.000000e+00> : vector<80x128xf32>
    %901 = tpu.matmul %900, %1, %cst_201 {dimension_numbers = #tpu.dot_dimension_numbers<[1], [0], [0], [1], [0, 0, 1, 1], [], []>} : vector<80x16xf32>, vector<16x128xf32>, vector<80x128xf32> -> vector<80x128xf32>
    %902 = vector.extract_strided_slice %901 {offsets = [0, 0], sizes = [16, 128], strides = [1, 1]} : vector<80x128xf32> to vector<16x128xf32>
    %903 = vector.extract_strided_slice %901 {offsets = [16, 0], sizes = [16, 128], strides = [1, 1]} : vector<80x128xf32> to vector<16x128xf32>
    %904 = vector.extract_strided_slice %901 {offsets = [32, 0], sizes = [16, 128], strides = [1, 1]} : vector<80x128xf32> to vector<16x128xf32>
    %905 = vector.extract_strided_slice %901 {offsets = [48, 0], sizes = [16, 128], strides = [1, 1]} : vector<80x128xf32> to vector<16x128xf32>
    %906 = vector.extract_strided_slice %901 {offsets = [64, 0], sizes = [16, 128], strides = [1, 1]} : vector<80x128xf32> to vector<16x128xf32>
    %907 = tpu.concatenate %902, %903, %904, %905, %906 in 1 : vector<16x128xf32>, vector<16x128xf32>, vector<16x128xf32>, vector<16x128xf32>, vector<16x128xf32> -> vector<16x640xf32>
    %cst_202 = arith.constant dense<0.000000e+00> : vector<8x640xf32>
    %908 = tpu.matmul %0, %907, %cst_202 {dimension_numbers = #tpu.dot_dimension_numbers<[1], [0], [0], [1], [0, 0, 1, 1], [], []>} : vector<8x16xf32>, vector<16x640xf32>, vector<8x640xf32> -> vector<8x640xf32>
    %909 = vector.extract_strided_slice %908 {offsets = [0, 0], sizes = [8, 128], strides = [1, 1]} : vector<8x640xf32> to vector<8x128xf32>
    %910 = vector.extract_strided_slice %908 {offsets = [0, 128], sizes = [8, 128], strides = [1, 1]} : vector<8x640xf32> to vector<8x128xf32>
    %911 = vector.extract_strided_slice %908 {offsets = [0, 256], sizes = [8, 128], strides = [1, 1]} : vector<8x640xf32> to vector<8x128xf32>
    %912 = vector.extract_strided_slice %908 {offsets = [0, 384], sizes = [8, 128], strides = [1, 1]} : vector<8x640xf32> to vector<8x128xf32>
    %913 = vector.extract_strided_slice %908 {offsets = [0, 512], sizes = [8, 128], strides = [1, 1]} : vector<8x640xf32> to vector<8x128xf32>
    %914 = arith.mulf %909, %909 : vector<8x128xf32>
    %915 = arith.subf %911, %914 : vector<8x128xf32>
    %916 = arith.mulf %910, %910 : vector<8x128xf32>
    %917 = arith.subf %912, %916 : vector<8x128xf32>
    %918 = arith.mulf %909, %910 : vector<8x128xf32>
    %919 = arith.subf %913, %918 : vector<8x128xf32>
    %cst_203 = arith.constant 2.000000e+00 : f32
    %920 = vector.broadcast %cst_203 : f32 to vector<8x128xf32>
    %921 = arith.mulf %920, %909 : vector<8x128xf32>
    %922 = arith.mulf %921, %910 : vector<8x128xf32>
    %cst_204 = arith.constant 9.99999974E-5 : f32
    %923 = vector.broadcast %cst_204 : f32 to vector<8x128xf32>
    %924 = arith.addf %922, %923 : vector<8x128xf32>
    %cst_205 = arith.constant 2.000000e+00 : f32
    %925 = vector.broadcast %cst_205 : f32 to vector<8x128xf32>
    %926 = arith.mulf %925, %919 : vector<8x128xf32>
    %cst_206 = arith.constant 8.99999984E-4 : f32
    %927 = vector.broadcast %cst_206 : f32 to vector<8x128xf32>
    %928 = arith.addf %926, %927 : vector<8x128xf32>
    %929 = arith.mulf %924, %928 : vector<8x128xf32>
    %930 = arith.mulf %909, %909 : vector<8x128xf32>
    %931 = arith.mulf %910, %910 : vector<8x128xf32>
    %932 = arith.addf %930, %931 : vector<8x128xf32>
    %cst_207 = arith.constant 9.99999974E-5 : f32
    %933 = vector.broadcast %cst_207 : f32 to vector<8x128xf32>
    %934 = arith.addf %932, %933 : vector<8x128xf32>
    %935 = arith.addf %915, %917 : vector<8x128xf32>
    %cst_208 = arith.constant 8.99999984E-4 : f32
    %936 = vector.broadcast %cst_208 : f32 to vector<8x128xf32>
    %937 = arith.addf %935, %936 : vector<8x128xf32>
    %938 = arith.mulf %934, %937 : vector<8x128xf32>
    %939 = arith.divf %929, %938 : vector<8x128xf32>
    %940 = arith.mulf %939, %11 : vector<8x128xf32>
    %941 = vector.shape_cast %940 : vector<8x128xf32> to vector<1x8x128xf32>
    %cst_209 = arith.constant dense<0.000000e+00> : vector<1xf32>
    %942 = vector.multi_reduction <add>, %941, %cst_209 [1, 2] : vector<1x8x128xf32> to vector<1xf32>
    %943 = vector.shape_cast %942 : vector<1xf32> to vector<1x1x1xf32>
    %944 = vector.extract %943[0, 0, 0] : f32 from vector<1x1x1xf32>
    %945 = vector.broadcast %944 : f32 to vector<1x1xf32>
    %946 = arith.addf %863, %945 : vector<1x1xf32>
    %c4_i32_210 = arith.constant 4 : i32
    %947 = tpu.iota {dimensions = array<i32: 1>} : vector<1x8xi32>
    %cst_211 = arith.constant 0.000000e+00 : f32
    %948 = vector.broadcast %cst_211 : f32 to vector<1x8xf32>
    %c0_i32_212 = arith.constant 0 : i32
    %949 = vector.broadcast %c0_i32_212 : i32 to vector<1x8xi32>
    %950 = arith.cmpi eq, %947, %949 : vector<1x8xi32>
    %cst_213 = arith.constant 1.000000e+00 : f32
    %cst_214 = arith.constant 0.000000e+00 : f32
    %951 = vector.broadcast %cst_213 : f32 to vector<1x8xf32>
    %952 = vector.broadcast %cst_214 : f32 to vector<1x8xf32>
    %953 = arith.select %950, %951, %952 : vector<1x8xi1>, vector<1x8xf32>
    %954 = vector.broadcast %504 : vector<1x1xf32> to vector<1x8xf32>
    %955 = arith.mulf %954, %953 : vector<1x8xf32>
    %956 = arith.addf %948, %955 : vector<1x8xf32>
    %c1_i32_215 = arith.constant 1 : i32
    %957 = vector.broadcast %c1_i32_215 : i32 to vector<1x8xi32>
    %958 = arith.cmpi eq, %947, %957 : vector<1x8xi32>
    %cst_216 = arith.constant 1.000000e+00 : f32
    %cst_217 = arith.constant 0.000000e+00 : f32
    %959 = vector.broadcast %cst_216 : f32 to vector<1x8xf32>
    %960 = vector.broadcast %cst_217 : f32 to vector<1x8xf32>
    %961 = arith.select %958, %959, %960 : vector<1x8xi1>, vector<1x8xf32>
    %962 = vector.broadcast %511 : vector<1x1xf32> to vector<1x8xf32>
    %963 = arith.mulf %962, %961 : vector<1x8xf32>
    %964 = arith.addf %956, %963 : vector<1x8xf32>
    %c2_i32_218 = arith.constant 2 : i32
    %965 = vector.broadcast %c2_i32_218 : i32 to vector<1x8xi32>
    %966 = arith.cmpi eq, %947, %965 : vector<1x8xi32>
    %cst_219 = arith.constant 1.000000e+00 : f32
    %cst_220 = arith.constant 0.000000e+00 : f32
    %967 = vector.broadcast %cst_219 : f32 to vector<1x8xf32>
    %968 = vector.broadcast %cst_220 : f32 to vector<1x8xf32>
    %969 = arith.select %966, %967, %968 : vector<1x8xi1>, vector<1x8xf32>
    %970 = vector.broadcast %518 : vector<1x1xf32> to vector<1x8xf32>
    %971 = arith.mulf %970, %969 : vector<1x8xf32>
    %972 = arith.addf %964, %971 : vector<1x8xf32>
    %c3_i32_221 = arith.constant 3 : i32
    %973 = vector.broadcast %c3_i32_221 : i32 to vector<1x8xi32>
    %974 = arith.cmpi eq, %947, %973 : vector<1x8xi32>
    %cst_222 = arith.constant 1.000000e+00 : f32
    %cst_223 = arith.constant 0.000000e+00 : f32
    %975 = vector.broadcast %cst_222 : f32 to vector<1x8xf32>
    %976 = vector.broadcast %cst_223 : f32 to vector<1x8xf32>
    %977 = arith.select %974, %975, %976 : vector<1x8xi1>, vector<1x8xf32>
    %978 = vector.broadcast %614 : vector<1x1xf32> to vector<1x8xf32>
    %979 = arith.mulf %978, %977 : vector<1x8xf32>
    %980 = arith.addf %972, %979 : vector<1x8xf32>
    %c4_i32_224 = arith.constant 4 : i32
    %981 = vector.broadcast %c4_i32_224 : i32 to vector<1x8xi32>
    %982 = arith.cmpi eq, %947, %981 : vector<1x8xi32>
    %cst_225 = arith.constant 1.000000e+00 : f32
    %cst_226 = arith.constant 0.000000e+00 : f32
    %983 = vector.broadcast %cst_225 : f32 to vector<1x8xf32>
    %984 = vector.broadcast %cst_226 : f32 to vector<1x8xf32>
    %985 = arith.select %982, %983, %984 : vector<1x8xi1>, vector<1x8xf32>
    %986 = vector.broadcast %497 : vector<1x1xf32> to vector<1x8xf32>
    %987 = arith.mulf %986, %985 : vector<1x8xf32>
    %988 = arith.addf %980, %987 : vector<1x8xf32>
    %c5_i32 = arith.constant 5 : i32
    %989 = vector.broadcast %c5_i32 : i32 to vector<1x8xi32>
    %990 = arith.cmpi eq, %947, %989 : vector<1x8xi32>
    %cst_227 = arith.constant 1.000000e+00 : f32
    %cst_228 = arith.constant 0.000000e+00 : f32
    %991 = vector.broadcast %cst_227 : f32 to vector<1x8xf32>
    %992 = vector.broadcast %cst_228 : f32 to vector<1x8xf32>
    %993 = arith.select %990, %991, %992 : vector<1x8xi1>, vector<1x8xf32>
    %994 = vector.broadcast %613 : vector<1x1xf32> to vector<1x8xf32>
    %995 = arith.mulf %994, %993 : vector<1x8xf32>
    %996 = arith.addf %988, %995 : vector<1x8xf32>
    %c6_i32_229 = arith.constant 6 : i32
    %997 = vector.broadcast %c6_i32_229 : i32 to vector<1x8xi32>
    %998 = arith.cmpi eq, %947, %997 : vector<1x8xi32>
    %cst_230 = arith.constant 1.000000e+00 : f32
    %cst_231 = arith.constant 0.000000e+00 : f32
    %999 = vector.broadcast %cst_230 : f32 to vector<1x8xf32>
    %1000 = vector.broadcast %cst_231 : f32 to vector<1x8xf32>
    %1001 = arith.select %998, %999, %1000 : vector<1x8xi1>, vector<1x8xf32>
    %1002 = vector.broadcast %896 : vector<1x1xf32> to vector<1x8xf32>
    %1003 = arith.mulf %1002, %1001 : vector<1x8xf32>
    %1004 = arith.addf %996, %1003 : vector<1x8xf32>
    %c7_i32 = arith.constant 7 : i32
    %1005 = vector.broadcast %c7_i32 : i32 to vector<1x8xi32>
    %1006 = arith.cmpi eq, %947, %1005 : vector<1x8xi32>
    %cst_232 = arith.constant 1.000000e+00 : f32
    %cst_233 = arith.constant 0.000000e+00 : f32
    %1007 = vector.broadcast %cst_232 : f32 to vector<1x8xf32>
    %1008 = vector.broadcast %cst_233 : f32 to vector<1x8xf32>
    %1009 = arith.select %1006, %1007, %1008 : vector<1x8xi1>, vector<1x8xf32>
    %1010 = vector.broadcast %946 : vector<1x1xf32> to vector<1x8xf32>
    %1011 = arith.mulf %1010, %1009 : vector<1x8xf32>
    %1012 = arith.addf %1004, %1011 : vector<1x8xf32>
    %c0_234 = arith.constant 0 : index
    %c0_235 = arith.constant 0 : index
    %c0_236 = arith.constant 0 : index
    %1013 = vector.load %arg6[%c0_234, %c0_235, %c0_236] : memref<1x1x8xf32, #tpu.memory_space<vmem>>, vector<1x1x8xf32>
    %1014 = vector.shape_cast %1013 : vector<1x1x8xf32> to vector<1x8xf32>
    %1015 = vector.shape_cast %1012 : vector<1x8xf32> to vector<1x1x8xf32>
    tpu.vector_store %arg6[%c0_234, %c0_235, %c0_236], %1015 {strides = array<i32>} : memref<1x1x8xf32, #tpu.memory_space<vmem>>, vector<1x1x8xf32>,
    return
  }
  func.func @transform_0(%arg0: i32) -> (i32, i32, i32, i32) {
    %c0_i32 = arith.constant 0 : i32
    %c0_i32_0 = arith.constant 0 : i32
    %c0_i32_1 = arith.constant 0 : i32
    %c0_i32_2 = arith.constant 0 : i32
    return %arg0, %c0_i32, %c0_i32_0, %c0_i32_1 : i32, i32, i32, i32
  }
  func.func @transform_1(%arg0: i32) -> (i32, i32, i32, i32) {
    %c0_i32 = arith.constant 0 : i32
    %c0_i32_0 = arith.constant 0 : i32
    %c0_i32_1 = arith.constant 0 : i32
    %c0_i32_2 = arith.constant 0 : i32
    return %arg0, %c0_i32, %c0_i32_0, %c0_i32_1 : i32, i32, i32, i32
  }
  func.func @transform_2(%arg0: i32) -> (i32, i32, i32, i32) {
    %c0_i32 = arith.constant 0 : i32
    %c0_i32_0 = arith.constant 0 : i32
    %c0_i32_1 = arith.constant 0 : i32
    %c0_i32_2 = arith.constant 0 : i32
    return %arg0, %c0_i32, %c0_i32_0, %c0_i32_1 : i32, i32, i32, i32
  }
  func.func @transform_3(%arg0: i32) -> (i32, i32) {
    %c0_i32 = arith.constant 0 : i32
    %c0_i32_0 = arith.constant 0 : i32
    %c0_i32_1 = arith.constant 0 : i32
    return %c0_i32, %c0_i32_0 : i32, i32
  }
  func.func @transform_4(%arg0: i32) -> (i32, i32) {
    %c0_i32 = arith.constant 0 : i32
    %c0_i32_0 = arith.constant 0 : i32
    %c0_i32_1 = arith.constant 0 : i32
    return %c0_i32, %c0_i32_0 : i32, i32
  }
  func.func @transform_5(%arg0: i32) -> (i32, i32, i32) {
    %c0_i32 = arith.constant 0 : i32
    %c0_i32_0 = arith.constant 0 : i32
    %c0_i32_1 = arith.constant 0 : i32
    return %arg0, %c0_i32, %c0_i32_0 : i32, i32, i32
  }
}

</mosaic_0001>

<bundles_post_ra>
// kernel: mip_loss.1
= control target key start
LH: loop header
LB: loop body
LE: loop exit
PB: predicated region body
PF: predicated region fallthrough
CT: control target
= control target key end

     0   :  { %10 = vsyncpa [#allocation3], 0  ;;  %s7436_s0 = inlined_call_operand.vmem [shape: f32[2,4,16,16], index: 0, kind: input, shape index: {}]   ;;  %s7437_s1 = inlined_call_operand.hbm [shape: f32[2,4,16,16], index: 1, kind: input, shape index: {}]   ;;  %s7438_s2 = inlined_call_operand.vmem [shape: f32[2,4,16,16], index: 2, kind: input, shape index: {}]   ;;  %s7439_s3 = inlined_call_operand.vmem [shape: f32[8,16], index: 3, kind: input, shape index: {}]   ;;  %s7440_s4 = inlined_call_operand.vmem [shape: f32[16,128], index: 4, kind: input, shape index: {}]   ;;  %s7441_s5 = inlined_call_operand.vmem [shape: f32[2,1,8], index: 5, kind: output, shape index: {}]  }
   0x1   :  { %12 = vsyncpa [#allocation3 + $0x1], 0  ;;  %s6305_s18 = smov 0   ;;  %s6307_s19 = smov 0  }
   0x2   :  { %s6309_s20 = smov 0   ;;  %s6311_s21 = smov 0  }
   0x3 LB: > { %s6324_s22 = sadd.s32 4294967295, %s6267_s21   ;;  %s6327_s23 = sadd.s32 1, %s6267_s21   ;;  %s6267_s21 = sphi %s6311_s21, %s7478_s21   ;;  %s6263_s20 = sphi %s6309_s20, %s7477_s20   ;;  %s6259_s19 = sphi %s6307_s19, %s7476_s19   ;;  %s6255_s18 = sphi %s6305_s18, %s7475_s18  }
   0x4   : > { %s48_s24 = ssub.s32 %s6267_s21, %s6327_s23  ;;  %s51_s25 = sadd.s32 1, %s6263_s20 }
   0x5   : > { %p49_p0 = scmp.eq.s32.totalorder %s48_s24, 0  ;;  %p58_p1 = scmp.ne.s32.totalorder %s6263_s20, %s6259_s19 }
   0x6   : > { %p59_p2 = scmp.eq.s32.totalorder %s6267_s21, 0  ;;  %p64_p3 = scmp.ne.s32.totalorder %s6259_s19, %s6255_s18 }
   0x7   : > { %s6337_s26 = scalar_select %p49_p0, %s6263_s20, %s51_s25  }
   0x8   : > { %p60_p4 = por %p59_p2, %p58_p1  ;;  %p65_p5 = scmp.eq.s32.totalorder %s6324_s22, 0 }
   0x9   : > { %p6027_p6 = scmp.lt.s32.totalorder %s6267_s21, 2  ;;  %s196_s28 = sand.u32 1, %s6263_s20  }
   0xa   : > { %p6341_p7 = por %p65_p5, %p64_p3  ;;  %s5229_s29 = sshll.u32 %s196_s28, 6 }
   0xb   : > { %s5410_s30 = sshll.u32 %s6267_s21, 10  ;;  %s200_s9 = scalar_lea.vmem [#allocation2], %s5229_s29 }
   0xc   : > { %s6350_s8 = scalar_lea.hbm %s7437_s1, %s5410_s30  ;;  %s207_s10 = sshll.u32 %s200_s9, 4  ;;  %s6352_s10 = int_to_ptr.vmem [resolvable:$true] %s207_s10 }
   0xd   : > { %p6354_p8 = pnand %p6027_p6, %p60_p4  ;;  %s6359_s12 = scalar_lea.sflag [#allocation3], %s196_s28 }
   0xe   : > { %s6203_s13 = scalar_lea.hbm %s6350_s8, 1024  ;;  %s6208_s16 = scalar_lea.hbm %s7437_s1, 2048 }
   0xf   : > { %p6204_p10 = scmp.ne.s32.totalorder %s6350_s8, %s6203_s13  ;;  %p6205_p11 = pneg %p6354_p8 }
  0x10   : > { %p6209_p0 = scmp.lt.u32.totalorder %s6350_s8, %s7437_s1  ;;  %p6210_p1 = scmp.lt.u32.totalorder %s6208_s16, %s6203_s13 }
  0x11   : > { %p6206_p12 = pnand %p6205_p11, %p6204_p10  ;;  %p6212_p3 = scmp.lt.u32.totalorder %s6203_s13, %s6350_s8 }
  0x12   : > { %p6211_p2 = por %p6210_p1, %p6209_p0 }
  0x13   : > { %p6207_p13 = pneg %p6206_p12 }
  0x14   : > { %p6213_p4 = por %p6212_p3, %p6211_p2 }
  0x16   : > { %p6214_p5 = pnand %p6213_p4, %p6207_p13 }
  0x18   : > { %6217 = shalt.err (!%p6214_p5)
}
  0x19   : > { %s6218_s24 = scalar_lea.vmem %s6352_s10, 1024  ;;  %s6269_s25 = smov [#allocation2]  }
  0x1a   : > { %p6219_p6 = scmp.ne.s32.totalorder %s6352_s10, %s6218_s24  ;;  %s6223_s28 = sshll.u32 %s6269_s25, 4  ;;  %s6224_s28 = int_to_ptr.vmem [resolvable:$false] %s6223_s28 }
  0x1b   : > { %s6225_s29 = scalar_lea.vmem %s6224_s28, 2048  ;;  %p6226_p9 = scmp.lt.s32.totalorder %s6352_s10, %s6224_s28 }
  0x1c   : > { %p6221_p10 = pnand %p6219_p6, %p6205_p11  ;;  %p6227_p0 = scmp.lt.s32.totalorder %s6225_s29, %s6218_s24 }
  0x1e   : > { %p6222_p12 = pneg %p6221_p10  ;;  %p6228_p1 = por %p6227_p0, %p6226_p9 }
  0x20   : > { %p6229_p2 = pnand %p6228_p1, %p6222_p12 }
  0x22   : > { %6232 = shalt.err (!%p6229_p2)
}
  0x23   : > { %s6270_s30 = smov 128   ;;  %s6271_s6 = smov 8  }
  0x24   : > { %6026 = dma.hbm_to_vmem [thread:$0]  (!%p6354_p8), %s6350_s8, 1024, %s6352_s10, %s6359_s12, %s6270_s30, %s6270_s30, %s6271_s6  }
  0x25   : > { %p223_p11 = scmp.lt.s32.totalorder %s6267_s21, 3  ;;  %p7459_p13 = scmp.ge.s32.totalorder %s6267_s21, 1 }
  0x27   : > { %p224_p3 = pnand %p7459_p13, %p223_p11 }
  0x29   : > { %227 = sbr.rel (%p224_p3) target bundleno = 2532 (0x9e4), region = 40 }
  0x30   : > { %s229_s7 = sand.u32 1, %s6259_s19  }
  0x31   : > { %s5233_s9 = sshll.u32 %s229_s7, 6  ;;  %s230_s13 = scalar_lea.sflag [#allocation3], %s229_s7 }
  0x32   : > { %s6391_s14 = scalar_lea.vmem [#allocation2], %s5233_s9 }
  0x33   : > { %6250 = dma.done.wait (%p6341_p7), %s230_s13, 1024  }
  0x34   : > { %6252 = vsyncadd (%p6341_p7), %s230_s13, 4294966272  ;;  %p268_p9 = scmp.lt.s32.totalorder %s6324_s22, 1  ;;  %v282_v0 = vld [vmem:[%s7440_s4] sm:$0xff]  ;;  %v283_v1 = vld [vmem:[%s7440_s4 + $0x8] sm:$0xff]  ;;  %vm336_vm0 = vcmask 130048   ;;  %vm6274_vm4 = vmmov 0  }
  0x35   : > { %v6421_v3 = vpack.c.bf16 %v283_v1, %v282_v0  ;;  %vm5141_vm13 = vcmask 57344  }
  0x36   : > { %s7480_s22 = smov (!%p268_p9, %s6324_s22), 1 }
  0x37   : > { %s5411_s21 = sshll.u32 %s7480_s22, 6  ;;  %7460 = vst [vmem:[#allocation5_spill] sm:$0xff] %v6421_v3  ;;  %5802 = vmatprep.subr.bf16.mxu0 %v6421_v3 }
  0x38   : > { %s6405_s11 = scalar_lea.vmem %s7436_s0, %s5411_s21  ;;  %s6410_s27 = scalar_lea.vmem %s7438_s2, %s5411_s21  ;;  %5804 = vmatpush3.bf16.msra.mxu0 %v6421_v3 }
  0x39   : > { %v6419_v2 = vld [vmem:[%s6405_s11] sm:$0xff]  ;;  %v6425_v5 = vld [vmem:[%s6405_s11 + $0x10] sm:$0xff]  ;;  %v6431_v9 = vld [vmem:[%s6405_s11 + $0x8] sm:$0xff] }
  0x3a   : > { %v296_v4 = vld [vmem:[%s6410_s27] sm:$0xff]  ;;  %v5267_v6 = vld [vmem:[%s6410_s27 + $0x10] sm:$0xff]  ;;  %v297_v10 = vld [vmem:[%s6410_s27 + $0x8] sm:$0xff] }
  0x3b   : > { %v298_v7 = vadd.f32 %v296_v4, %v6419_v2  ;;  %v1063_v8 = vadd.f32 %v5267_v6, %v6425_v5  ;;  %v6435_v11 = vld [vmem:[%s6405_s11 + $0x18] sm:$0xff]  ;;  %v299_v12 = vadd.f32 %v297_v10, %v6431_v9  ;;  %v6441_v14 = vld [vmem:[%s6405_s11 + $0x28] sm:$0xff] }
  0x3c   : > { %v5268_v13 = vld [vmem:[%s6410_s27 + $0x18] sm:$0xff]  ;;  %v5299_v15 = vld [vmem:[%s6410_s27 + $0x28] sm:$0xff] }
  0x3d   : > { %v6445_v16 = vmul.f32 2.0, %v298_v7  ;;  %v6447_v17 = vmul.f32 2.0, %v1063_v8  ;;  %v1064_v18 = vadd.f32 %v5268_v13, %v6435_v11  ;;  %v6450_v19 = vmul.f32 2.0, %v299_v12 }
  0x3e   : > { %v1827_v22 = vadd.f32 %v5299_v15, %v6441_v14 }
  0x3f   : > { %7461 = vst [vmem:[#allocation6_spill] sm:$0xff] %v6445_v16  ;;  %7462 = vst [vmem:[#allocation7_spill] sm:$0xff] %v6447_v17  ;;  %v302_v20 = vmax.f32 %v6445_v16, -1e+30  ;;  %v6453_v21 = vmul.f32 2.0, %v1064_v18  ;;  %v294_v18 = vld [vmem:[%s6391_s14] sm:$0xff] }
  0x40   : > { %7463 = vst [vmem:[#allocation8_spill] sm:$0xff] %v6450_v19  ;;  %v303_v23 = vmax.f32 %v6450_v19, -1e+30  ;;  %v6464_v33 = vmul.f32 2.0, %v1827_v22  ;;  %v6496_v22 = vmax.f32 %v294_v18, -1e+30 }
  0x41   : > { %v304_v24 = vsub.f32 -1e+30, %v302_v20  ;;  %v310_v25 = vsub.f32 %v6445_v16, %v302_v20  ;;  %v6459_v26 = vmax.f32 %v302_v20, %v6447_v17 }
  0x42   : > { %v305_v27 = vsub.f32 -1e+30, %v303_v23  ;;  %v311_v28 = vsub.f32 %v6450_v19, %v303_v23  ;;  %v1068_v29 = vmax.f32 %v303_v23, %v6453_v21 }
  0x43   : > { %v306_v30 = vmul.f32 1.442695, %v304_v24  ;;  %v312_v31 = vmul.f32 1.442695, %v310_v25  ;;  %v1069_v32 = vsub.f32 %v302_v20, %v6459_v26 }
  0x44   : > { %v1070_v34 = vsub.f32 %v303_v23, %v1068_v29  ;;  %v1076_v35 = vsub.f32 %v6453_v21, %v1068_v29  ;;  %v308_v37 = vmul.f32 1.442695, %v305_v27  ;;  %v6468_v38 = vmax.f32 %v1068_v29, %v6464_v33  ;;  %v295_v23 = vld [vmem:[%s6391_s14 + $0x8] sm:$0xff] }
  0x45   : > { %6065 = vpow2.f32 %v306_v30  ;;  %v1071_v36 = vmul.f32 1.442695, %v1069_v32  ;;  %v314_v39 = vmul.f32 1.442695, %v311_v28  ;;  %v6503_v25 = vmax.f32 %v295_v23, -1e+30 }
  0x46   : > { %6067 = vpow2.f32 %v312_v31  ;;  %v1073_v40 = vmul.f32 1.442695, %v1070_v34  ;;  %v1833_v41 = vsub.f32 %v1068_v29, %v6468_v38  ;;  %v1079_v42 = vmul.f32 1.442695, %v1076_v35 }
  0x47   : > { %6069 = vpow2.f32 %v1071_v36  ;;  %v1839_v43 = vsub.f32 %v6464_v33, %v6468_v38  ;;  %v401_v29 = vmul.f32 %v6496_v22, %v6496_v22  ;;  %v402_v30 = vmul.f32 %v6503_v25, %v6503_v25 }
  0x48   : > { %6071 = vpow2.f32 %v308_v37  ;;  %v1836_v44 = vmul.f32 1.442695, %v1833_v41  ;;  %v405_v34 = vmul.f32 %v6419_v2, %v6419_v2  ;;  %v406_v35 = vmul.f32 %v6431_v9, %v6431_v9 }
  0x49   : > { %6073 = vpow2.f32 %v314_v39  ;;  %v1842_v45 = vmul.f32 1.442695, %v1839_v43  ;;  %v6538_v36 = vmul.f32 %v294_v18, %v294_v18  ;;  %v6541_v37 = vmul.f32 %v295_v23, %v295_v23 }
  0x4a   : > { %6075 = vpow2.f32 %v1073_v40  ;;  %v407_v39 = vmul.f32 %v294_v18, %v6419_v2  ;;  %v408_v40 = vmul.f32 %v295_v23, %v6431_v9  ;;  %v7442_v41 = vmov 0.0  }
  0x4b   : > { %6077 = vpow2.f32 %v1079_v42  ;;  %701 = vmatprep.mubr.f32.mxu1 %v7442_v41 }
  0x4c   : > { %6079 = vpow2.f32 %v1836_v44  ;;  %v6556_v44 = vld [vmem:[%s6391_s14 + $0x10] sm:$0xff] }
  0x4d   : > { %6081 = vpow2.f32 %v1842_v45  ;;  %v6559_v45 = vld [vmem:[%s6391_s14 + $0x18] sm:$0xff] }
  0x4f   : > { %v6066_v46 = vpop.eup %6065 }
  0x50   : > { %v6068_v47 = vpop.eup %6067  ;;  %v316_v48 = vmul.f32 0.0, %v6066_v46  ;;  %v6562_v46 = vld [vmem:[%s6405_s11 + $0x20] sm:$0xff] }
  0x51   : > { %v6473_v49 = vpop.eup %6069  ;;  %v320_v59 = vmul.f32 %v6068_v47, %v6419_v2 }
  0x52   : > { %v318_v50 = vadd.f32 %v6068_v47, %v316_v48  ;;  %v6072_v51 = vpop.eup %6071  ;;  %v6565_v47 = vsub.f32 %v6419_v2, %v294_v18 }
  0x53   : > { %v6074_v52 = vpop.eup %6073  ;;  %v317_v54 = vmul.f32 0.0, %v6072_v51  ;;  %v6483_v6 = vadd.f32 %v320_v59, %v316_v48  ;;  %v6568_v48 = vsub.f32 %v6431_v9, %v295_v23  ;;  %v6576_v51 = vsub.f32 %v6435_v11, %v6559_v45 }
  0x54   : > { %6083 = vrcp.f32 %v318_v50  ;;  %v6476_v53 = vmul.f32 %v6473_v49, %v318_v50  ;;  %v6076_v55 = vpop.eup %6075  ;;  %v321_v56 = vmul.f32 %v6074_v52, %v6431_v9  ;;  %v6572_v50 = vsub.f32 %v6425_v5, %v6556_v44 }
  0x55   : > { %v6078_v57 = vpop.eup %6077  ;;  %v319_v58 = vadd.f32 %v6074_v52, %v317_v54  ;;  %v6579_v52 = vld [vmem:[%s6391_s14 + $0x20] sm:$0xff] }
  0x56   : > { %v323_v60 = vadd.f32 %v321_v56, %v317_v54  ;;  %v1088_v61 = vmul.f32 %v6078_v57, %v6435_v11  ;;  %v6080_v63 = vpop.eup %6079  ;;  %v6582_v54 = vld [vmem:[%s6391_s14 + $0x28] sm:$0xff]  ;;  %v6596_v56 = vld [vmem:[%s6405_s11 + $0x30] sm:$0xff]  ;;  %v1133_v59 = vmul.f32 %v6572_v50, %v6572_v50 }
  0x57   : > { %6085 = vrcp.f32 %v319_v58  ;;  %v1082_v62 = vmul.f32 %v6076_v55, %v319_v58  ;;  %v6481_v4 = vpop.eup %6081  ;;  %v352_v58 = vand.u32 2147483647, %v6568_v48 }
  0x58   : > { %v1086_v0 = vmul.f32 %v6076_v55, %v323_v60  ;;  %v6593_v55 = vld [vmem:[%s6391_s14 + $0x30] sm:$0xff] }
  0x59   : > { %v1084_v1 = vadd.f32 %v6078_v57, %v1082_v62  ;;  %v351_v57 = vand.u32 2147483647, %v6565_v47 }
  0x5a   : > { %v1090_v7 = vadd.f32 %v1088_v61, %v1086_v0  ;;  %v6613_v0 = vsub.f32 %v6596_v56, %v6593_v55 }
  0x5b   : > { %v1845_v8 = vmul.f32 %v6080_v63, %v1084_v1  ;;  %6087 = vrcp.f32 %v1084_v1  ;;  %v353_v1 = vsel %vm336_vm0, %v351_v57, 0.0 }
  0x5c   : > { %v6485_v10 = vmul.f32 %v6080_v63, %v1090_v7  ;;  %v6609_v63 = vld [vmem:[%s6391_s14 + $0x38] sm:$0xff] }
  0x5d   : > { %v6488_v13 = vadd.f32 %v6481_v4, %v1845_v8  ;;  %v1135_v8 = vsel %vm336_vm0, %v1133_v59, 0.0 }
  0x5e   : > { %v6084_v12 = vpop.eup %6083 }
  0x5f   : > { %v6491_v15 = vmul.f32 %v6084_v12, %v6483_v6 }
  0x61   : > { %5565 = vmatprep.mubr.msk.f32.mxu0 %vm336_vm0, %v6491_v15  ;;  %v6086_v20 = vpop.eup %6085  ;;  %v399_v27 = vmul.f32 %v6491_v15, %v6491_v15  ;;  %v403_v31 = vmul.f32 %v6491_v15, %v6496_v22 }
  0x62   : > { %v6499_v24 = vmul.f32 %v6086_v20, %v323_v60  ;;  %v1134_v60 = vmul.f32 %v6576_v51, %v6576_v51  ;;  %v6620_v20 = vld [vmem:[%s6405_s11 + $0x38] sm:$0xff] }
  0x64   : > { %5566 = vmatmul.mubr.msk.f32.vlgmr.msra.gmra.mrb[0].mxu0 %vm336_vm0, %v6499_v24  ;;  %v400_v28 = vmul.f32 %v6499_v24, %v6499_v24  ;;  %v404_v32 = vmul.f32 %v6499_v24, %v6503_v25  ;;  %v1136_v12 = vsel %vm336_vm0, %v1134_v60, 0.0 }
  0x65   : > { %5568 = vmatprep.mubr.msk.f32.mxu0 %vm336_vm0, %v6496_v22  ;;  %v6088_v42 = vpop.eup %6087 }
  0x66   : > { %v6553_v43 = vmul.f32 %v6088_v42, %v1090_v7  ;;  %v354_v7 = vsel %vm336_vm0, %v352_v58, 0.0  ;;  %v1075_v58 = vsub.f32 %v6447_v17, %v6459_v26 }
  0x68   : > { %5569 = vmatmul.mubr.msk.f32.gmra.mrb[2].mxu0 %vm336_vm0, %v6503_v25 }
  0x69   : > { %5571 = vmatprep.mubr.msk.f32.mxu0 %vm336_vm0, %v399_v27  ;;  %v1137_v27 = vadd.f32 %v1136_v12, %v1135_v8  ;;  %v6639_v8 = vld [vmem:[%s7439_s3] sm:$0xff] }
  0x6c   : > { %5572 = vmatmul.mubr.msk.f32.gmra.mrb[4].mxu0 %vm336_vm0, %v400_v28 }
  0x6d   : > { %5574 = vmatprep.mubr.msk.f32.mxu0 %vm336_vm0, %v401_v29 }
  0x70   : > { %5575 = vmatmul.mubr.msk.f32.gmra.mrb[6].mxu0 %vm336_vm0, %v402_v30  ;;  %v2659_v30 = vmul.f32 %v6613_v0, %v6613_v0 }
  0x71   : > { %5577 = vmatprep.mubr.msk.f32.mxu0 %vm336_vm0, %v403_v31 }
  0x74   : > { %5578 = vmatmul.mubr.msk.f32.gmra.mrb[8].mxu0 %vm336_vm0, %v404_v32 }
  0x75   : > { %5580 = vmatprep.mubr.msk.f32.mxu0 %vm336_vm0, %v6419_v2  ;;  %v6586_v2 = vsub.f32 %v6562_v46, %v6579_v52 }
  0x77   : > { %v1896_v61 = vmul.f32 %v6586_v2, %v6586_v2 }
  0x78   : > { %5581 = vmatmul.mubr.msk.f32.gmra.mrb[10].mxu0 %vm336_vm0, %v6431_v9  ;;  %v6590_v9 = vsub.f32 %v6441_v14, %v6582_v54 }
  0x79   : > { %5583 = vmatprep.mubr.msk.f32.mxu0 %vm336_vm0, %v294_v18  ;;  %v355_v18 = vadd.f32 %v354_v7, %v353_v1  ;;  %v1898_v28 = vsel %vm336_vm0, %v1896_v61, 0.0 }
  0x7a   : > { %v1897_v62 = vmul.f32 %v6590_v9, %v6590_v9 }
  0x7b   : > { %356 = vadd.xlane.f32.xlu0 %v355_v18 }
  0x7c   : > { %5584 = vmatmul.mubr.msk.f32.gmra.mrb[12].mxu0 %vm336_vm0, %v295_v23  ;;  %v6624_v23 = vsub.f32 %v6620_v20, %v6609_v63  ;;  %v1899_v29 = vsel %vm336_vm0, %v1897_v62, 0.0  ;;  %v1077_v62 = vmul.f32 1.442695, %v1075_v58 }
  0x7d   : > { %5586 = vmatprep.mubr.msk.f32.mxu0 %vm336_vm0, %v405_v34  ;;  %v1900_v32 = vadd.f32 %v1899_v29, %v1898_v28  ;;  %v2661_v34 = vsel %vm336_vm0, %v2659_v30, 0.0 }
  0x7e   : > { %v2660_v31 = vmul.f32 %v6624_v23, %v6624_v23  ;;  %6089 = vpow2.f32 %v1077_v62 }
  0x7f   : > { %1138 = vadd.xlane.f32.xlu0 %v1137_v27 }
  0x80   : > { %5587 = vmatmul.mubr.msk.f32.gmra.mrb[14].mxu0 %vm336_vm0, %v406_v35  ;;  %v2662_v35 = vsel %vm336_vm0, %v2660_v31, 0.0 }
  0x81   : > { %5589 = vmatprep.mubr.msk.f32.mxu0 %vm336_vm0, %v6538_v36 }
  0x83   : > { %1901 = vadd.xlane.f32.xlu0 %v1900_v32 }
  0x84   : > { %5590 = vmatmul.mubr.msk.f32.gmra.mrb[16].mxu0 %vm336_vm0, %v6541_v37 }
  0x85   : > { %5592 = vmatprep.mubr.msk.f32.mxu0 %vm336_vm0, %v407_v39  ;;  %v2663_v39 = vadd.f32 %v2662_v35, %v2661_v34 }
  0x87   : > { %2664 = vadd.xlane.f32.xlu0 %v2663_v39 }
  0x88   : > { %5593 = vmatmul.mubr.msk.f32.gmra.mrb[18].mxu0 %vm336_vm0, %v408_v40  ;;  %v6090_v34 = vpop.eup %6089 }
  0x89   : > { %1464 = vmatprep.mubr.f32.mxu0 %v7442_v41 }
 0x137   : > { %v5567_v40 = vpop.f32.mrb[0].mxu0 }
 0x138   : > { %v535_v42 = vpop.f32.mrb[1].mxu0 }
 0x139   : > { %v5807_v57 = vpack.c.bf16 %v5567_v40, %v535_v42  ;;  %v6648_v40 = vadd.f32 %v6090_v34, %v6476_v53  ;;  %v1085_v53 = vmul.f32 %v6473_v49, %v6483_v6  ;;  %v6673_v49 = vmax.f32 %v6496_v22, %v6556_v44 }
 0x13a   : > { %v6679_v6 = vmax.f32 %v6503_v25, %v6559_v45 }
 0x13b   : > { %v5570_v59 = vpop.f32.mrb[2].mxu0  ;;  %6091 = vrcp.f32 %v6648_v40 }
 0x13c   : > { %v545_v60 = vpop.f32.mrb[3].mxu0 }
 0x13d   : > { %v5805_v61 = vpack.c.bf16 %v5570_v59, %v545_v60 }
 0x13f   : > { %v5573_v1 = vpop.f32.mrb[4].mxu0  ;;  %5806 = vmatprep.subr.bf16.mxu1 %v5805_v61 }
 0x140   : > { %v555_v7 = vpop.f32.mrb[5].mxu0  ;;  %5808 = vmatpush1.bf16.msra.mxu1 %v5807_v57 }
 0x141   : > { %v5811_v12 = vpack.c.bf16 %v5573_v1, %v555_v7  ;;  %v1087_v7 = vmul.f32 %v6090_v34, %v6425_v5  ;;  %v1166_v34 = vmul.f32 %v6553_v43, %v6553_v43 }
 0x143   : > { %v5576_v18 = vpop.f32.mrb[6].mxu0  ;;  %5258 = vmatmul.mubr.msk.f32.vlgmr.msra.gmra.mrb[0].mxu1 %vm336_vm0, %v6639_v8 }
 0x144   : > { %v565_v27 = vpop.f32.mrb[7].mxu0  ;;  %772 = vmatprep.mubr.f32.mxu1 %v7442_v41 }
 0x145   : > { %v5809_v28 = vpack.c.bf16 %v5576_v18, %v565_v27 }
 0x147   : > { %v5579_v29 = vpop.f32.mrb[8].mxu0  ;;  %5810 = vmatprep.subr.bf16.mxu1 %v5809_v28  ;;  %v6660_v28 = vadd.f32 %v1087_v7, %v1085_v53 }
 0x148   : > { %v575_v30 = vpop.f32.mrb[9].mxu0  ;;  %5812 = vmatpush1.bf16.msra.mxu1 %v5811_v12 }
 0x149   : > { %v5815_v31 = vpack.c.bf16 %v5579_v29, %v575_v30  ;;  %v6092_v29 = vpop.eup %6091 }
 0x14b   : > { %v5582_v32 = vpop.f32.mrb[10].mxu0  ;;  %5259 = vmatmul.mubr.msk.f32.vlgmr.msra.gmra.mrb[2].mxu1 %vm336_vm0, %v6639_v8 }
 0x14c   : > { %v585_v35 = vpop.f32.mrb[11].mxu0  ;;  %843 = vmatprep.mubr.f32.mxu1 %v7442_v41 }
 0x14d   : > { %v5813_v39 = vpack.c.bf16 %v5582_v32, %v585_v35  ;;  %v1167_v35 = vmul.f32 %v6673_v49, %v6673_v49 }
 0x14f   : > { %v5585_v42 = vpop.f32.mrb[12].mxu0  ;;  %5814 = vmatprep.subr.bf16.mxu1 %v5813_v39  ;;  %v5329_v39 = vld [vmem:[%s6410_s27 + $0x30] sm:$0xff] }
 0x150   : > { %v595_v57 = vpop.f32.mrb[13].mxu0  ;;  %5816 = vmatpush1.bf16.msra.mxu1 %v5815_v31  ;;  %v6663_v31 = vmul.f32 %v6092_v29, %v6660_v28 }
 0x151   : > { %v5819_v58 = vpack.c.bf16 %v5585_v42, %v595_v57  ;;  %v1168_v42 = vmul.f32 %v6679_v6, %v6679_v6  ;;  %v5330_v57 = vld [vmem:[%s6410_s27 + $0x38] sm:$0xff] }
 0x152   : > { %v1165_v32 = vmul.f32 %v6663_v31, %v6663_v31 }
 0x153   : > { %v5588_v59 = vpop.f32.mrb[14].mxu0  ;;  %5260 = vmatmul.mubr.msk.f32.vlgmr.msra.gmra.mrb[4].mxu1 %vm336_vm0, %v6639_v8 }
 0x154   : > { %v605_v60 = vpop.f32.mrb[15].mxu0  ;;  %914 = vmatprep.mubr.f32.mxu1 %v7442_v41 }
 0x155   : > { %v5817_v61 = vpack.c.bf16 %v5588_v59, %v605_v60  ;;  %v5298_v59 = vld [vmem:[%s6410_s27 + $0x20] sm:$0xff]  ;;  %v2589_v60 = vadd.f32 %v5329_v39, %v6596_v56 }
 0x157   : > { %v5591_v62 = vpop.f32.mrb[16].mxu0  ;;  %5818 = vmatprep.subr.bf16.mxu1 %v5817_v61  ;;  %v2590_v61 = vadd.f32 %v5330_v57, %v6620_v20  ;;  %v6708_v53 = vmul.f32 2.0, %v2589_v60  ;;  %v6734_v60 = vmul.f32 %v6556_v44, %v6556_v44 }
 0x158   : > { %v615_v1 = vpop.f32.mrb[17].mxu0  ;;  %5820 = vmatpush1.bf16.msra.mxu1 %v5819_v58  ;;  %v1169_v58 = vmul.f32 %v6663_v31, %v6673_v49 }
 0x159   : > { %v5823_v12 = vpack.c.bf16 %v5591_v62, %v615_v1  ;;  %v1170_v62 = vmul.f32 %v6553_v43, %v6679_v6  ;;  %v1826_v1 = vadd.f32 %v5298_v59, %v6562_v46  ;;  %v6710_v7 = vmul.f32 2.0, %v2590_v61 }
 0x15a   : > { %v1172_v59 = vmul.f32 %v6435_v11, %v6435_v11 }
 0x15b   : > { %v5594_v18 = vpop.f32.mrb[18].mxu0  ;;  %5261 = vmatmul.mubr.msk.f32.vlgmr.msra.gmra.mrb[6].mxu1 %vm336_vm0, %v6639_v8 }
 0x15c   : > { %v625_v27 = vpop.f32.mrb[19].mxu0  ;;  %985 = vmatprep.mubr.f32.mxu1 %v7442_v41 }
 0x15d   : > { %v5821_v30 = vpack.c.bf16 %v5594_v18, %v625_v27  ;;  %v3343_v18 = vmax.f32 %v6708_v53, -1e+30  ;;  %v3344_v27 = vmax.f32 %v6710_v7, -1e+30 }
 0x15f   : > { %5822 = vmatprep.subr.bf16.mxu1 %v5821_v30  ;;  %v1171_v30 = vmul.f32 %v6425_v5, %v6425_v5  ;;  %v3352_v57 = vsub.f32 %v6710_v7, %v3344_v27 }
 0x160   : > { %5824 = vmatpush1.bf16.msra.mxu1 %v5823_v12  ;;  %v1828_v12 = vmul.f32 2.0, %v1826_v1 }
 0x161   : > { %5826 = vmatprep.subr.bf16.mxu1 %v6421_v3 }
 0x162   : > { %v1830_v29 = vmax.f32 %v6459_v26, %v1828_v12 }
 0x163   : > { %5262 = vmatmul.mubr.msk.f32.vlgmr.msra.gmra.mrb[8].mxu1 %vm336_vm0, %v6639_v8 }
 0x164   : > { %5828 = vmatpush3.bf16.msra.mxu1 %v6421_v3  ;;  %5599 = vmatprep.mubr.msk.f32.mxu1 %vm336_vm0, %v6663_v31  ;;  %v2593_v1 = vmax.f32 %v1830_v29, %v6708_v53 }
 0x167   : > { %5600 = vmatmul.mubr.msk.f32.vlgmr.msra.gmra.mrb[10].mxu1 %vm336_vm0, %v6553_v43 }
 0x168   : > { %5602 = vmatprep.mubr.msk.f32.mxu1 %vm336_vm0, %v6673_v49 }
 0x16b   : > { %5603 = vmatmul.mubr.msk.f32.gmra.mrb[12].mxu1 %vm336_vm0, %v6679_v6 }
 0x16c   : > { %5605 = vmatprep.mubr.msk.f32.mxu1 %vm336_vm0, %v1165_v32  ;;  %v3345_v32 = vsub.f32 -1e+30, %v3343_v18 }
 0x16f   : > { %5606 = vmatmul.mubr.msk.f32.gmra.mrb[14].mxu1 %vm336_vm0, %v1166_v34  ;;  %v3346_v34 = vsub.f32 -1e+30, %v3344_v27 }
 0x170   : > { %5608 = vmatprep.mubr.msk.f32.mxu1 %vm336_vm0, %v1167_v35  ;;  %v3347_v35 = vmul.f32 1.442695, %v3345_v32  ;;  %v6740_v32 = vmax.f32 %v3344_v27, %v6464_v33 }
 0x171   : > { %v3349_v39 = vmul.f32 1.442695, %v3346_v34 }
 0x172   : > { %6093 = vpow2.f32 %v3347_v35  ;;  %v1838_v35 = vsub.f32 %v1828_v12, %v1830_v29  ;;  %v3792_v19 = vsub.f32 %v6464_v33, %v6740_v32  ;;  %v2594_v33 = vmax.f32 %v6468_v38, %v6710_v7 }
 0x173   : > { %5609 = vmatmul.mubr.msk.f32.gmra.mrb[16].mxu1 %vm336_vm0, %v1168_v42  ;;  %v3351_v42 = vsub.f32 %v6708_v53, %v3343_v18  ;;  %6095 = vpow2.f32 %v3349_v39  ;;  %v1173_v39 = vmul.f32 %v6556_v44, %v6425_v5 }
 0x174   : > { %5611 = vmatprep.mubr.msk.f32.mxu1 %vm336_vm0, %v1169_v58  ;;  %v1832_v58 = vsub.f32 %v6459_v26, %v1830_v29  ;;  %v6737_v26 = vmax.f32 %v3343_v18, %v1828_v12 }
 0x175   : > { %v3353_v61 = vmul.f32 1.442695, %v3351_v42 }
 0x176   : > { %7464 = vst [vmem:[#allocation9_spill] sm:$0xff] %v6737_v26  ;;  %v1834_v34 = vmul.f32 1.442695, %v1832_v58  ;;  %v3785_v42 = vsub.f32 %v3343_v18, %v6737_v26  ;;  %v3795_v18 = vmul.f32 1.442695, %v3792_v19 }
 0x177   : > { %5612 = vmatmul.mubr.msk.f32.gmra.mrb[18].mxu1 %vm336_vm0, %v1170_v62  ;;  %v3355_v62 = vmul.f32 1.442695, %v3352_v57  ;;  %6097 = vpow2.f32 %v3353_v61  ;;  %v3786_v57 = vsub.f32 %v3344_v27, %v6740_v32  ;;  %v2595_v61 = vsub.f32 %v1830_v29, %v2593_v1 }
 0x178   : > { %5614 = vmatprep.mubr.msk.f32.mxu1 %vm336_vm0, %v6425_v5  ;;  %v3787_v58 = vmul.f32 1.442695, %v3785_v42  ;;  %v1840_v5 = vmul.f32 1.442695, %v1838_v35  ;;  %v7465_v35 = vmov 0.0  }
 0x179   : > { %6099 = vpow2.f32 %v3355_v62  ;;  %v3789_v41 = vmul.f32 1.442695, %v3786_v57  ;;  %v1174_v62 = vmul.f32 %v6559_v45, %v6435_v11  ;;  %v2597_v27 = vmul.f32 1.442695, %v2595_v61 }
 0x17a   : > { %6101 = vpow2.f32 %v1834_v34  ;;  %v2601_v61 = vsub.f32 %v6708_v53, %v2593_v1 }
 0x17b   : > { %5615 = vmatmul.mubr.msk.f32.gmra.mrb[20].mxu1 %vm336_vm0, %v6435_v11  ;;  %6103 = vpow2.f32 %v3787_v58  ;;  %v2602_v58 = vsub.f32 %v6710_v7, %v2594_v33 }
 0x17c   : > { %5617 = vmatprep.mubr.msk.f32.mxu1 %vm336_vm0, %v6556_v44  ;;  %6105 = vpow2.f32 %v3789_v41  ;;  %v6094_v29 = vpop.eup %6093 }
 0x17d   : > { %v3357_v34 = vmul.f32 0.0, %v6094_v29 }
 0x17f   : > { %5618 = vmatmul.mubr.msk.f32.gmra.mrb[22].mxu1 %vm336_vm0, %v6559_v45 }
 0x180   : > { %5620 = vmatprep.mubr.msk.f32.mxu1 %vm336_vm0, %v1171_v30  ;;  %v6745_v30 = vmul.f32 %v6559_v45, %v6559_v45  ;;  %v2596_v45 = vsub.f32 %v6468_v38, %v2594_v33 }
 0x182   : > { %v2599_v57 = vmul.f32 1.442695, %v2596_v45 }
 0x183   : > { %5621 = vmatmul.mubr.msk.f32.gmra.mrb[24].mxu1 %vm336_vm0, %v1172_v59  ;;  %v3791_v59 = vsub.f32 %v1828_v12, %v6737_v26  ;;  %v6096_v12 = vpop.eup %6095 }
 0x184   : > { %5623 = vmatprep.mubr.msk.f32.mxu1 %vm336_vm0, %v6734_v60  ;;  %v6098_v42 = vpop.eup %6097  ;;  %v3358_v11 = vmul.f32 0.0, %v6096_v12 }
 0x185   : > { %v3793_v44 = vmul.f32 1.442695, %v3791_v59  ;;  %v6100_v19 = vpop.eup %6099  ;;  %v3359_v41 = vadd.f32 %v6098_v42, %v3357_v34  ;;  %v2603_v59 = vmul.f32 1.442695, %v2601_v61  ;;  %v3361_v53 = vmul.f32 %v6098_v42, %v6596_v56 }
 0x186   : > { %v3362_v7 = vmul.f32 %v6100_v19, %v6620_v20 }
 0x187   : > { %5624 = vmatmul.mubr.msk.f32.gmra.mrb[26].mxu1 %vm336_vm0, %v6745_v30  ;;  %6107 = vpow2.f32 %v3793_v44  ;;  %v6102_v44 = vpop.eup %6101  ;;  %v3363_v61 = vadd.f32 %v3361_v53, %v3357_v34 }
 0x188   : > { %5626 = vmatprep.mubr.msk.f32.mxu1 %vm336_vm0, %v1173_v39  ;;  %6109 = vpow2.f32 %v3795_v18  ;;  %v3360_v39 = vadd.f32 %v6100_v19, %v3358_v11  ;;  %v1848_v42 = vmul.f32 %v6102_v44, %v6660_v28 }
 0x189   : > { %6111 = vpow2.f32 %v1840_v5  ;;  %v6104_v5 = vpop.eup %6103 }
 0x18a   : > { %6113 = vpow2.f32 %v2597_v27  ;;  %v6106_v38 = vpop.eup %6105  ;;  %v3797_v18 = vmul.f32 %v6104_v5, %v3359_v41 }
 0x18b   : > { %5627 = vmatmul.mubr.msk.f32.gmra.mrb[28].mxu1 %vm336_vm0, %v1174_v62  ;;  %6115 = vrcp.f32 %v3359_v41  ;;  %v2605_v62 = vmul.f32 1.442695, %v2602_v58  ;;  %v3798_v27 = vmul.f32 %v6106_v38, %v3360_v39  ;;  %v1844_v41 = vmul.f32 %v6102_v44, %v6648_v40 }
 0x18c   : > { %2227 = vmatprep.mubr.f32.mxu1 %v7465_v35  ;;  %6117 = vrcp.f32 %v3360_v39  ;;  %v332_v39 = vsub.f32 %v6491_v15, %v6496_v22  ;;  %v3364_v58 = vadd.f32 %v3362_v7, %v3358_v11  ;;  %v6791_v22 = vmax.f32 %v6609_v63, -1e+30 }
 0x18d   : > { %6119 = vpow2.f32 %v2599_v57  ;;  %v333_v57 = vsub.f32 %v6499_v24, %v6503_v25 }
 0x18e   : > { %6121 = vpow2.f32 %v2603_v59  ;;  %v3802_v26 = vmul.f32 %v6106_v38, %v3364_v58 }
 0x18f   : > { %6123 = vpow2.f32 %v2605_v62 }
 0x190   : > { %6125 = vrcp.f32 %v6488_v13 }
 0x191   : > { %v6108_v29 = vpop.eup %6107 }
 0x192   : > { %v6110_v12 = vpop.eup %6109  ;;  %v6768_v16 = vadd.f32 %v6108_v29, %v3797_v18  ;;  %v334_v18 = vand.u32 2147483647, %v332_v39 }
 0x193   : > { %v6112_v45 = vpop.eup %6111  ;;  %v6773_v1 = vadd.f32 %v6110_v12, %v3798_v27  ;;  %v335_v27 = vand.u32 2147483647, %v333_v57  ;;  %v3804_v17 = vmul.f32 %v6110_v12, %v6441_v14 }
 0x194   : > { %7466 = vst [vmem:[#allocation10_spill] sm:$0xff] %v6768_v16  ;;  %v6775_v33 = vpop.eup %6113  ;;  %6127 = vrcp.f32 %v6768_v16  ;;  %v1846_v19 = vadd.f32 %v6112_v45, %v1844_v41  ;;  %v6786_v16 = vmax.f32 %v6593_v55, -1e+30  ;;  %v337_v34 = vsel %vm336_vm0, %v334_v18, 0.0 }
 0x195   : > { %v6116_v59 = vpop.eup %6115  ;;  %6129 = vrcp.f32 %v6773_v1  ;;  %v338_v11 = vsel %vm336_vm0, %v335_v27, 0.0  ;;  %v1850_v41 = vmul.f32 %v6112_v45, %v6562_v46  ;;  %v3803_v18 = vmul.f32 %v6108_v29, %v6562_v46 }
 0x196   : > { %v6118_v62 = vpop.eup %6117  ;;  %v6788_v40 = vmul.f32 %v6116_v59, %v3363_v61  ;;  %6131 = vrcp.f32 %v1846_v19  ;;  %v2607_v25 = vmul.f32 %v6775_v33, %v1846_v19  ;;  %v339_v39 = vadd.f32 %v338_v11, %v337_v34 }
 0x197   : > { %v6120_v15 = vpop.eup %6119  ;;  %v6793_v24 = vmul.f32 %v6118_v62, %v3364_v58  ;;  %v3801_v19 = vmul.f32 %v6104_v5, %v3363_v61  ;;  %v1099_v45 = vsub.f32 %v6663_v31, %v6673_v49  ;;  %v1852_v38 = vadd.f32 %v1850_v41, %v1848_v42 }
 0x198   : > { %7467 = vst [vmem:[#allocation11_spill] sm:$0xff] %v6788_v40  ;;  %v6122_v28 = vpop.eup %6121  ;;  %v3371_v44 = vsub.f32 %v6788_v40, %v6786_v16  ;;  %v2608_v53 = vmul.f32 %v6120_v15, %v6488_v13  ;;  %340 = vadd.xlane.f32.xlu0 %v339_v39  ;;  %v6814_v29 = vadd.f32 %v3804_v17, %v3802_v26 }
 0x199   : > { %v6124_v7 = vpop.eup %6123  ;;  %v3372_v57 = vsub.f32 %v6793_v24, %v6791_v22  ;;  %v2609_v59 = vadd.f32 %v6122_v28, %v2607_v25  ;;  %v1100_v25 = vsub.f32 %v6553_v43, %v6679_v6  ;;  %v6811_v34 = vadd.f32 %v3803_v18, %v3801_v19 }
 0x19a   : > { %v3373_v62 = vand.u32 2147483647, %v3371_v44  ;;  %v2610_v40 = vadd.f32 %v6124_v7, %v2608_v53  ;;  %v6126_v13 = vpop.eup %6125  ;;  %v1101_v61 = vand.u32 2147483647, %v1099_v45  ;;  %v6818_v11 = vmax.f32 %v6786_v16, %v6579_v52 }
 0x19b   : > { %v3374_v27 = vand.u32 2147483647, %v3372_v57  ;;  %6133 = vrcp.f32 %v2609_v59  ;;  %v1102_v58 = vand.u32 2147483647, %v1100_v25  ;;  %v6822_v43 = vmax.f32 %v6791_v22, %v6582_v54 }
 0x19c   : > { %v3375_v3 = vsel %vm336_vm0, %v3373_v62, 0.0  ;;  %6135 = vrcp.f32 %v2610_v40  ;;  %v1851_v17 = vmul.f32 %v6481_v4, %v6441_v14  ;;  %v2611_v53 = vmul.f32 %v6775_v33, %v1852_v38 }
 0x19d   : > { %v3376_v46 = vsel %vm336_vm0, %v3374_v27, 0.0  ;;  %v1104_v26 = vsel %vm336_vm0, %v1102_v58, 0.0  ;;  %v6842_v4 = vmax.f32 %v6673_v49, %v6579_v52  ;;  %v6846_v59 = vmax.f32 %v6679_v6, %v6582_v54 }
 0x19e   : > { %v6128_v5 = vpop.eup %6127  ;;  %v3377_v12 = vadd.f32 %v3376_v46, %v3375_v3  ;;  %v1103_v3 = vsel %vm336_vm0, %v1101_v61, 0.0  ;;  %v1853_v57 = vadd.f32 %v1851_v17, %v6485_v10  ;;  %v2613_v27 = vmul.f32 %v6122_v28, %v6596_v56 }
 0x19f   : > { %v6130_v31 = vpop.eup %6129  ;;  %v6825_v44 = vmul.f32 %v6128_v5, %v6811_v34  ;;  %v1105_v41 = vadd.f32 %v1104_v26, %v1103_v3  ;;  %v6855_v10 = vmax.f32 %v6740_v32, %v6453_v21  ;;  %v2614_v6 = vmul.f32 %v6124_v7, %v6620_v20 }
 0x1a0   : > { %3378 = vadd.xlane.f32.xlu0 %v3377_v12  ;;  %v6832_v42 = vmul.f32 %v6130_v31, %v6814_v29  ;;  %v6132_v40 = vpop.eup %6131  ;;  %v6850_v19 = vmul.f32 %v6126_v13, %v1853_v57  ;;  %v2612_v18 = vmul.f32 %v6120_v15, %v1853_v57  ;;  %v2615_v15 = vadd.f32 %v2613_v27, %v2611_v53 }
 0x1a1   : > { %v3813_v39 = vsub.f32 %v6825_v44, %v6818_v11  ;;  %v6848_v62 = vmul.f32 %v6132_v40, %v1852_v38  ;;  %v4228_v56 = vsub.f32 %v6740_v32, %v6855_v10  ;;  %v385_v58 = vsel %vm336_vm0, %v6538_v36, 0.0 }
 0x1a2   : > { %v3814_v14 = vsub.f32 %v6832_v42, %v6822_v43  ;;  %v1863_v13 = vsub.f32 %v6850_v19, %v6846_v59  ;;  %v2616_v46 = vadd.f32 %v2614_v6, %v2612_v18  ;;  %v386_v20 = vsel %vm336_vm0, %v6541_v37, 0.0 }
 0x1a3   : > { %v3815_v33 = vand.u32 2147483647, %v3813_v39  ;;  %v1862_v49 = vsub.f32 %v6848_v62, %v6842_v4  ;;  %v4231_v31 = vmul.f32 1.442695, %v4228_v56  ;;  %v387_v17 = vadd.f32 %v386_v20, %v385_v58 }
 0x1a4   : > { %1106 = vadd.xlane.f32.xlu0 %v1105_v41  ;;  %v3816_v45 = vand.u32 2147483647, %v3814_v14  ;;  %v1865_v7 = vand.u32 2147483647, %v1863_v13  ;;  %v6873_v32 = vmax.f32 %v6842_v4, %v6593_v55  ;;  %v6878_v40 = vmax.f32 %v6846_v59, %v6609_v63 }
 0x1a5   : > { %v6134_v25 = vpop.eup %6133  ;;  %v3817_v5 = vsel %vm336_vm0, %v3815_v33, 0.0  ;;  %v1864_v38 = vand.u32 2147483647, %v1862_v49  ;;  %6137 = vpow2.f32 %v4231_v31  ;;  %388 = vadd.xlane.f32.xlu1 %v387_v17  ;;  %v1151_v41 = vsel %vm336_vm0, %v6734_v60, 0.0 }
 0x1a6   : > { %v3818_v28 = vsel %vm336_vm0, %v3816_v45, 0.0  ;;  %v6136_v12 = vpop.eup %6135  ;;  %v1867_v26 = vsel %vm336_vm0, %v1865_v7, 0.0  ;;  %v6880_v36 = vmul.f32 %v6134_v25, %v2615_v15  ;;  %v1152_v39 = vsel %vm336_vm0, %v6745_v30, 0.0 }
 0x1a7   : > { %v3819_v61 = vadd.f32 %v3818_v28, %v3817_v5  ;;  %v1866_v3 = vsel %vm336_vm0, %v1864_v38, 0.0  ;;  %v6882_v53 = vmul.f32 %v6136_v12, %v2616_v46  ;;  %v1153_v33 = vadd.f32 %v1152_v39, %v1151_v41 }
 0x1a8   : > { %v1868_v37 = vadd.f32 %v1867_v26, %v1866_v3  ;;  %v2625_v57 = vsub.f32 %v6880_v36, %v6873_v32  ;;  %v367_v45 = vmul.f32 %v6565_v47, %v6565_v47  ;;  %v368_v49 = vmul.f32 %v6568_v48, %v6568_v48 }
 0x1a9   : > { %3820 = vadd.xlane.f32.xlu0 %v3819_v61  ;;  %v2626_v14 = vsub.f32 %v6882_v53, %v6878_v40  ;;  %1154 = vadd.xlane.f32.xlu1 %v1153_v33  ;;  %v1117_v15 = vand.u32 2147483647, %v6572_v50  ;;  %v1118_v56 = vand.u32 2147483647, %v6576_v51  ;;  %v1880_v12 = vand.u32 2147483647, %v6586_v2 }
 0x1aa   : > { %v2627_v18 = vand.u32 2147483647, %v2625_v57  ;;  %v369_v6 = vsel %vm336_vm0, %v367_v45, 0.0  ;;  %v370_v25 = vsel %vm336_vm0, %v368_v49, 0.0  ;;  %v1881_v61 = vand.u32 2147483647, %v6590_v9 }
 0x1ab   : > { %v2628_v27 = vand.u32 2147483647, %v2626_v14  ;;  %v371_v13 = vadd.f32 %v370_v25, %v369_v6  ;;  %v1119_v47 = vsel %vm336_vm0, %v1117_v15, 0.0  ;;  %v1120_v48 = vsel %vm336_vm0, %v1118_v56, 0.0  ;;  %v357_v15 = vpop.xlane.xlu0 %356 }
 0x1ac   : > { %v2629_v60 = vsel %vm336_vm0, %v2627_v18, 0.0  ;;  %v1121_v38 = vadd.f32 %v1120_v48, %v1119_v47  ;;  %v1882_v50 = vsel %vm336_vm0, %v1880_v12, 0.0  ;;  %v1883_v51 = vsel %vm336_vm0, %v1881_v61, 0.0 }
 0x1ad   : > { %1869 = vadd.xlane.f32.xlu0 %v1868_v37  ;;  %v2630_v30 = vsel %vm336_vm0, %v2628_v27, 0.0  ;;  %372 = vadd.xlane.f32.xlu1 %v371_v13  ;;  %v1884_v58 = vadd.f32 %v1883_v51, %v1882_v50  ;;  %v6916_v20 = vmul.f32 %v6579_v52, %v6579_v52  ;;  %v6920_v7 = vmul.f32 %v6582_v54, %v6582_v54 }
 0x1ae   : > { %v2631_v5 = vadd.f32 %v2630_v30, %v2629_v60  ;;  %v2643_v31 = vand.u32 2147483647, %v6613_v0  ;;  %v2644_v17 = vand.u32 2147483647, %v6624_v23  ;;  %v6932_v54 = vmul.f32 %v6593_v55, %v6593_v55 }
 0x1af   : > { %v6904_v28 = vpop.eup %6137  ;;  %v1914_v2 = vsel %vm336_vm0, %v6916_v20, 0.0  ;;  %v1915_v9 = vsel %vm336_vm0, %v6920_v7, 0.0  ;;  %v6936_v37 = vmul.f32 %v6609_v63, %v6609_v63  ;;  %v284_v13 = vlaneseq  ;;  %v6944_v51 = vpop.xlane.xlu0 %1138 }
 0x1b0   : > { %v6908_v46 = vmul.f32 %v6904_v28, %v6773_v1  ;;  %v1916_v1 = vadd.f32 %v1915_v9, %v1914_v2  ;;  %v2645_v52 = vsel %vm336_vm0, %v2643_v31, 0.0  ;;  %v2646_v3 = vsel %vm336_vm0, %v2644_v17, 0.0 }
 0x1b1   : > { %2632 = vadd.xlane.f32.xlu0 %v2631_v5  ;;  %1122 = vadd.xlane.f32.xlu1 %v1121_v38  ;;  %v2647_v26 = vadd.f32 %v2646_v3, %v2645_v52  ;;  %v2677_v0 = vsel %vm336_vm0, %v6932_v54, 0.0  ;;  %v2678_v23 = vsel %vm336_vm0, %v6936_v37, 0.0  ;;  %v285_v12 = vshrl.u32 %v284_v13, 7 }
 0x1b2   : > { %v2679_v41 = vadd.f32 %v2678_v23, %v2677_v0  ;;  %v6942_v61 = vand.u32 127, %v284_v13 }
 0x1b3   : > { %vm288_vm1 = vcmp.lt.s32.totalorder %v285_v12, 6 }
 0x1b4   : > { %vm289_vm2 = vcmp.lt.s32.totalorder %v6942_v61, 6  ;;  %vm5109_vm5 = vcmp.eq.s32.totalorder %v6942_v61, 0  ;;  %vm5113_vm6 = vcmp.eq.s32.totalorder %v6942_v61, 1  ;;  %vm5117_vm7 = vcmp.eq.s32.totalorder %v6942_v61, 2 }
 0x1b5   : > { %1885 = vadd.xlane.f32.xlu1 %v1884_v58  ;;  %vm290_vm3 = vmand %vm288_vm1, %vm289_vm2  ;;  %vm5121_vm8 = vcmp.eq.s32.totalorder %v6942_v61, 3  ;;  %vm5125_vm9 = vcmp.eq.s32.totalorder %v6942_v61, 4  ;;  %vm5129_vm10 = vcmp.eq.s32.totalorder %v6942_v61, 5  ;;  %vm5133_vm11 = vcmp.eq.s32.totalorder %v6942_v61, 6 }
 0x1b6   : > { %vm5137_vm12 = vcmp.eq.s32.totalorder %v6942_v61, 7 }
 0x1b9   : > { %1917 = vadd.xlane.f32.xlu1 %v1916_v1 }
 0x1bd   : > { %2648 = vadd.xlane.f32.xlu1 %v2647_v26 }
 0x1c1   : > { %2680 = vadd.xlane.f32.xlu1 %v2679_v41  ;;  %v6947_v41 = vpop.xlane.xlu0 %1901 }
 0x216   : > { %v703_v39 = vpop.f32.mrb[0].mxu1 }
 0x217   : > { %v998_v57 = vmul.f32 2.0, %v703_v39  ;;  %v705_v14 = vpop.f32.mrb[1].mxu1  ;;  %v992_v33 = vmul.f32 %v703_v39, %v703_v39 }
 0x218   : > { %v994_v18 = vmul.f32 %v705_v14, %v705_v14  ;;  %v996_v55 = vmul.f32 %v705_v14, %v703_v39 }
 0x219   : > { %v999_v27 = vmul.f32 %v998_v57, %v705_v14  ;;  %v6950_v14 = vsel %vm290_vm3, 1.0, %v7465_v35 }
 0x21a   : > { %v1004_v45 = vadd.f32 %v994_v18, %v992_v33 }
 0x21b   : > { %v1000_v58 = vadd.f32 0.0001, %v999_v27  ;;  %v6953_v27 = vpop.xlane.xlu0 %2664 }
 0x21c   : > { %v1005_v6 = vadd.f32 0.0001, %v1004_v45 }
 0x21e   : > { %v774_v49 = vpop.f32.mrb[2].mxu1 }
 0x21f   : > { %v993_v63 = vsub.f32 %v774_v49, %v992_v33  ;;  %v776_v60 = vpop.f32.mrb[3].mxu1 }
 0x220   : > { %v995_v30 = vsub.f32 %v776_v60, %v994_v18 }
 0x222   : > { %v1006_v25 = vadd.f32 %v995_v30, %v993_v63 }
 0x224   : > { %v1007_v5 = vadd.f32 0.0009, %v1006_v25 }
 0x225   : > { %v341_v12 = vpop.xlane.xlu0 %340 }
 0x226   : > { %v1008_v56 = vmul.f32 %v1007_v5, %v1005_v6  ;;  %v845_v47 = vpop.f32.mrb[4].mxu1 }
 0x227   : > { %v997_v48 = vsub.f32 %v845_v47, %v996_v55  ;;  %v847_v38 = vpop.f32.mrb[5].mxu1 }
 0x228   : > { %6139 = vrcp.f32 %v1008_v56  ;;  %v1028_v9 = vmul.f32 2.0, %v847_v38  ;;  %v1022_v1 = vmul.f32 %v847_v38, %v847_v38 }
 0x229   : > { %v1001_v50 = vmul.f32 2.0, %v997_v48 }
 0x22b   : > { %v1002_v2 = vadd.f32 0.0009, %v1001_v50 }
 0x22d   : > { %v1003_v31 = vmul.f32 %v1002_v2, %v1000_v58  ;;  %v358_v58 = vrot.slane %v357_v15, 4  ;;  %v342_v2 = vrot.slane %v341_v12, 4 }
 0x22e   : > { %v916_v17 = vpop.f32.mrb[6].mxu1 }
 0x22f   : > { %v1029_v52 = vmul.f32 %v1028_v9, %v916_v17  ;;  %v918_v3 = vpop.f32.mrb[7].mxu1  ;;  %v1024_v26 = vmul.f32 %v916_v17, %v916_v17  ;;  %v1026_v0 = vmul.f32 %v916_v17, %v847_v38 }
 0x230   : > { %v1023_v23 = vsub.f32 %v918_v3, %v1022_v1 }
 0x231   : > { %v1034_v39 = vadd.f32 %v1024_v26, %v1022_v1  ;;  %v1030_v47 = vadd.f32 0.0001, %v1029_v52 }
 0x232   : > { %v6140_v57 = vpop.eup %6139  ;;  %v389_v56 = vpop.xlane.xlu1 %388 }
 0x233   : > { %v1010_v33 = vmul.f32 %v6140_v57, %v1003_v31  ;;  %v1035_v25 = vadd.f32 0.0001, %v1034_v39  ;;  %v390_v31 = vrot.slane %v389_v56, 4 }
 0x235   : > { %v1011_v18 = vmul.f32 %v1010_v33, %v6950_v14  ;;  %v391_v57 = vadd.f32 %v390_v31, %v389_v56 }
 0x236   : > { %v987_v55 = vpop.f32.mrb[8].mxu1  ;;  %v6955_v3 = vpop.xlane.xlu1 %1154 }
 0x237   : > { %v1025_v45 = vsub.f32 %v987_v55, %v1024_v26  ;;  %1012 = vadd.xlane.f32.xlu0 %v1011_v18  ;;  %v989_v49 = vpop.f32.mrb[9].mxu1 }
 0x238   : > { %v1027_v63 = vsub.f32 %v989_v49, %v1026_v0  ;;  %v359_v0 = vadd.f32 %v358_v58, %v357_v15 }
 0x239   : > { %v1036_v60 = vadd.f32 %v1025_v45, %v1023_v23  ;;  %v343_v23 = vadd.f32 %v342_v2, %v341_v12 }
 0x23a   : > { %v1031_v30 = vmul.f32 2.0, %v1027_v63  ;;  %v5601_v6 = vpop.f32.mrb[10].mxu1  ;;  %v373_v18 = vpop.xlane.xlu1 %372  ;;  %v360_v55 = vrot.slane %v359_v0, 2 }
 0x23b   : > { %v1037_v5 = vadd.f32 0.0009, %v1036_v60  ;;  %v1301_v13 = vpop.f32.mrb[11].mxu1  ;;  %v344_v45 = vrot.slane %v343_v23, 2  ;;  %v374_v49 = vrot.slane %v373_v18, 4  ;;  %v392_v60 = vrot.slane %v391_v57, 2 }
 0x23c   : > { %v1032_v48 = vadd.f32 0.0009, %v1031_v30  ;;  %v5831_v38 = vpack.c.bf16 %v5601_v6, %v1301_v13  ;;  %v361_v56 = vadd.f32 %v360_v55, %v359_v0 }
 0x23d   : > { %v1038_v50 = vmul.f32 %v1037_v5, %v1035_v25  ;;  %v375_v15 = vadd.f32 %v374_v49, %v373_v18  ;;  %v345_v13 = vadd.f32 %v344_v45, %v343_v23 }
 0x23e   : > { %v1033_v9 = vmul.f32 %v1032_v48, %v1030_v47  ;;  %v5604_v1 = vpop.f32.mrb[12].mxu1  ;;  %v362_v58 = vrot.slane %v361_v56, 1 }
 0x23f   : > { %6141 = vrcp.f32 %v1038_v50  ;;  %v1311_v17 = vpop.f32.mrb[13].mxu1  ;;  %v376_v5 = vrot.slane %v375_v15, 2  ;;  %v346_v50 = vrot.slane %v345_v13, 1 }
 0x240   : > { %v5829_v26 = vpack.c.bf16 %v5604_v1, %v1311_v17 }
 0x241   : > { %v377_v2 = vadd.f32 %v376_v5, %v375_v15 }
 0x242   : > { %v5607_v39 = vpop.f32.mrb[14].mxu1  ;;  %5830 = vmatprep.subr.bf16.mxu0 %v5829_v26  ;;  %v347_v26 = vadd.f32 %v346_v50, %v345_v13  ;;  %v1933_v50 = vmul.f32 %v6850_v19, %v6846_v59 }
 0x243   : > { %v1321_v52 = vpop.f32.mrb[15].mxu1  ;;  %5832 = vmatpush1.bf16.msra.mxu0 %v5831_v38  ;;  %v393_v38 = vadd.f32 %v392_v60, %v391_v57  ;;  %v378_v0 = vrot.slane %v377_v2, 1 }
 0x244   : > { %v5835_v33 = vpack.c.bf16 %v5607_v39, %v1321_v52  ;;  %v363_v39 = vadd.f32 %v362_v58, %v361_v56  ;;  %5957 = vpush %v347_v26  ;;  %v7468_v56 = vld [vmem:[#allocation5_spill] sm:$0xff] }
 0x245   : > { %v394_v17 = vrot.slane %v393_v38, 1  ;;  %v6185_v58 = vld [vmem:[%s6405_s11 + $0x20] sm:$0xff] }
 0x246   : > { %v5610_v63 = vpop.f32.mrb[16].mxu1  ;;  %5289 = vmatmul.mubr.msk.f32.vlgmr.msra.gmra.mrb[20].mxu0 %vm336_vm0, %v6639_v8  ;;  %5959 = vpush %v363_v39 }
 0x247   : > { %v1331_v30 = vpop.f32.mrb[17].mxu1  ;;  %1535 = vmatprep.mubr.f32.mxu0 %v7465_v35 }
 0x248   : > { %v5833_v6 = vpack.c.bf16 %v5610_v63, %v1331_v30 }
 0x249   : > { %v6142_v25 = vpop.eup %6141 }
 0x24a   : > { %v5613_v47 = vpop.f32.mrb[18].mxu1  ;;  %5834 = vmatprep.subr.bf16.mxu0 %v5833_v6  ;;  %v1040_v48 = vmul.f32 %v6142_v25, %v1033_v9  ;;  %v395_v9 = vadd.f32 %v394_v17, %v393_v38  ;;  %v1931_v38 = vmul.f32 %v6846_v59, %v6846_v59  ;;  %v7017_v17 = vpop.xlane.xlu0 %3378 }
 0x24b   : > { %v1341_v12 = vpop.f32.mrb[19].mxu1  ;;  %5836 = vmatpush1.bf16.msra.mxu0 %v5835_v33  ;;  %v379_v33 = vadd.f32 %v378_v0, %v377_v2  ;;  %v6186_v2 = vld [vmem:[%s6405_s11 + $0x28] sm:$0xff] }
 0x24c   : > { %v5839_v1 = vpack.c.bf16 %v5613_v47, %v1341_v12  ;;  %v1041_v31 = vmul.f32 %v1040_v48, %v6950_v14  ;;  %v1928_v47 = vmul.f32 %v6848_v62, %v6848_v62  ;;  %v1930_v48 = vmul.f32 %v6842_v4, %v6842_v4 }
 0x24d   : > { %5961 = vpush %v379_v33  ;;  %v1932_v12 = vmul.f32 %v6848_v62, %v6842_v4 }
 0x24e   : > { %v5616_v52 = vpop.f32.mrb[20].mxu1  ;;  %5290 = vmatmul.mubr.msk.f32.vlgmr.msra.gmra.mrb[22].mxu0 %vm336_vm0, %v6639_v8  ;;  %1042 = vadd.xlane.f32.xlu1 %v1041_v31  ;;  %5963 = vpush %v395_v9  ;;  %v1934_v31 = vmul.f32 %v6185_v58, %v6185_v58  ;;  %v7019_v26 = vpop.xlane.xlu0 %1106 }
 0x24f   : > { %v1351_v23 = vpop.f32.mrb[21].mxu1  ;;  %1606 = vmatprep.mubr.f32.mxu0 %v7465_v35 }
 0x250   : > { %v5837_v57 = vpack.c.bf16 %v5616_v52, %v1351_v23 }
 0x252   : > { %v5619_v18 = vpop.f32.mrb[22].mxu1  ;;  %5838 = vmatprep.subr.bf16.mxu0 %v5837_v57  ;;  %v7021_v39 = vpop.xlane.xlu0 %3820 }
 0x253   : > { %v1361_v55 = vpop.f32.mrb[23].mxu1  ;;  %5840 = vmatpush1.bf16.msra.mxu0 %v5839_v1  ;;  %v6187_v1 = vld [vmem:[%s6391_s14 + $0x20] sm:$0xff] }
 0x254   : > { %v5843_v45 = vpack.c.bf16 %v5619_v18, %v1361_v55 }
 0x256   : > { %v5622_v49 = vpop.f32.mrb[24].mxu1  ;;  %5291 = vmatmul.mubr.msk.f32.vlgmr.msra.gmra.mrb[24].mxu0 %vm336_vm0, %v6639_v8  ;;  %v7023_v52 = vpop.xlane.xlu0 %1869 }
 0x257   : > { %v1371_v63 = vpop.f32.mrb[25].mxu1  ;;  %1677 = vmatprep.mubr.f32.mxu0 %v7465_v35 }
 0x258   : > { %v5841_v60 = vpack.c.bf16 %v5622_v49, %v1371_v63 }
 0x25a   : > { %v5625_v30 = vpop.f32.mrb[26].mxu1  ;;  %5842 = vmatprep.subr.bf16.mxu0 %v5841_v60  ;;  %v7027_v0 = vpop.xlane.xlu0 %2632 }
 0x25b   : > { %v1381_v15 = vpop.f32.mrb[27].mxu1  ;;  %5844 = vmatpush1.bf16.msra.mxu0 %v5843_v45 }
 0x25c   : > { %v5847_v6 = vpack.c.bf16 %v5625_v30, %v1381_v15 }
 0x25e   : > { %v5628_v25 = vpop.f32.mrb[28].mxu1  ;;  %5292 = vmatmul.mubr.msk.f32.vlgmr.msra.gmra.mrb[26].mxu0 %vm336_vm0, %v6639_v8 }
 0x25f   : > { %v1391_v5 = vpop.f32.mrb[29].mxu1  ;;  %1748 = vmatprep.mubr.f32.mxu0 %v7465_v35 }
 0x260   : > { %v5845_v13 = vpack.c.bf16 %v5628_v25, %v1391_v5 }
 0x262   : > { %5846 = vmatprep.subr.bf16.mxu0 %v5845_v13 }
 0x263   : > { %5848 = vmatpush1.bf16.msra.mxu0 %v5847_v6 }
 0x264   : > { %5850 = vmatprep.subr.bf16.mxu0 %v7468_v56 }
 0x266   : > { %5293 = vmatmul.mubr.msk.f32.vlgmr.msra.gmra.mrb[28].mxu0 %vm336_vm0, %v6639_v8  ;;  %v1929_v8 = vmul.f32 %v6850_v19, %v6850_v19 }
 0x267   : > { %5852 = vmatpush3.bf16.msra.mxu0 %v7468_v56  ;;  %5633 = vmatprep.mubr.msk.f32.mxu0 %vm336_vm0, %v6848_v62  ;;  %v1935_v62 = vmul.f32 %v6186_v2, %v6186_v2 }
 0x26a   : > { %5634 = vmatmul.mubr.msk.f32.vlgmr.msra.gmra.mrb[30].mxu0 %vm336_vm0, %v6850_v19 }
 0x26b   : > { %5636 = vmatprep.mubr.msk.f32.mxu0 %vm336_vm0, %v6842_v4  ;;  %v6188_v4 = vld [vmem:[%s6391_s14 + $0x28] sm:$0xff] }
 0x26c   : > { %v1937_v19 = vmul.f32 %v6188_v4, %v6186_v2 }
 0x26e   : > { %5637 = vmatmul.mubr.msk.f32.gmra.mrb[32].mxu0 %vm336_vm0, %v6846_v59  ;;  %v1936_v59 = vmul.f32 %v6187_v1, %v6185_v58 }
 0x26f   : > { %5639 = vmatprep.mubr.msk.f32.mxu0 %vm336_vm0, %v1928_v47 }
 0x272   : > { %5640 = vmatmul.mubr.msk.f32.gmra.mrb[34].mxu0 %vm336_vm0, %v1929_v8 }
 0x273   : > { %5642 = vmatprep.mubr.msk.f32.mxu0 %vm336_vm0, %v1930_v48 }
 0x275   : > { %s7364_s9 = spop %5957 }
 0x276   : > { %5643 = vmatmul.mubr.msk.f32.gmra.mrb[36].mxu0 %vm336_vm0, %v1931_v38 }
 0x277   : > { %5645 = vmatprep.mubr.msk.f32.mxu0 %vm336_vm0, %v1932_v12  ;;  %s5960_s13 = spop %5959 }
 0x27a   : > { %5646 = vmatmul.mubr.msk.f32.gmra.mrb[38].mxu0 %vm336_vm0, %v1933_v50 }
 0x27b   : > { %5648 = vmatprep.mubr.msk.f32.mxu0 %vm336_vm0, %v6185_v58 }
 0x27e   : > { %5649 = vmatmul.mubr.msk.f32.gmra.mrb[40].mxu0 %vm336_vm0, %v6186_v2 }
 0x27f   : > { %5651 = vmatprep.mubr.msk.f32.mxu0 %vm336_vm0, %v6187_v1 }
 0x282   : > { %5652 = vmatmul.mubr.msk.f32.gmra.mrb[42].mxu0 %vm336_vm0, %v6188_v4 }
 0x283   : > { %5654 = vmatprep.mubr.msk.f32.mxu0 %vm336_vm0, %v1934_v31 }
 0x286   : > { %5655 = vmatmul.mubr.msk.f32.gmra.mrb[44].mxu0 %vm336_vm0, %v1935_v62 }
 0x287   : > { %5657 = vmatprep.mubr.msk.f32.mxu0 %vm336_vm0, %v6916_v20  ;;  %v7025_v20 = vpop.xlane.xlu1 %1122 }
 0x28a   : > { %5658 = vmatmul.mubr.msk.f32.gmra.mrb[46].mxu0 %vm336_vm0, %v6920_v7 }
 0x28b   : > { %5660 = vmatprep.mubr.msk.f32.mxu0 %vm336_vm0, %v1936_v59  ;;  %v7029_v7 = vpop.xlane.xlu1 %1885 }
 0x28e   : > { %5661 = vmatmul.mubr.msk.f32.gmra.mrb[48].mxu0 %vm336_vm0, %v1937_v19 }
 0x28f   : > { %2990 = vmatprep.mubr.f32.mxu0 %v7465_v35  ;;  %v7031_v18 = vpop.xlane.xlu1 %1917 }
 0x293   : > { %v7033_v63 = vpop.xlane.xlu1 %2648 }
 0x297   : > { %v7035_v60 = vpop.xlane.xlu1 %2680 }
 0x2c4   : > { %v1013_v23 = vpop.xlane.xlu0 %1012 }
 0x2c5   : > { %v1014_v9 = vrot.slane %v1013_v23, 4 }
 0x2c7   : > { %v1015_v57 = vadd.f32 %v1014_v9, %v1013_v23 }
 0x2c9   : > { %v1016_v33 = vrot.slane %v1015_v57, 2 }
 0x2cb   : > { %v1017_v55 = vadd.f32 %v1016_v33, %v1015_v57 }
 0x2cd   : > { %v1018_v45 = vrot.slane %v1017_v55, 1 }
 0x2cf   : > { %v1019_v49 = vadd.f32 %v1018_v45, %v1017_v55 }
 0x2d1   : > { %5965 = vpush %v1019_v49 }
 0x2db   : > { %v1043_v30 = vpop.xlane.xlu1 %1042 }
 0x2dc   : > { %v1044_v15 = vrot.slane %v1043_v30, 4 }
 0x2de   : > { %v1045_v6 = vadd.f32 %v1044_v15, %v1043_v30 }
 0x2e0   : > { %v1046_v25 = vrot.slane %v1045_v6, 2 }
 0x2e2   : > { %v1047_v5 = vadd.f32 %v1046_v25, %v1045_v6 }
 0x2e4   : > { %v1048_v13 = vrot.slane %v1047_v5, 1 }
 0x2e6   : > { %v1049_v47 = vadd.f32 %v1048_v13, %v1047_v5 }
 0x2e8   : > { %5967 = vpush %v1049_v47 }
 0x319   : > { %v1466_v8 = vpop.f32.mrb[20].mxu0 }
 0x31a   : > { %v1761_v48 = vmul.f32 2.0, %v1466_v8  ;;  %v1468_v38 = vpop.f32.mrb[21].mxu0  ;;  %v1755_v12 = vmul.f32 %v1466_v8, %v1466_v8 }
 0x31b   : > { %v1757_v50 = vmul.f32 %v1468_v38, %v1468_v38  ;;  %v1759_v58 = vmul.f32 %v1468_v38, %v1466_v8 }
 0x31c   : > { %v1762_v2 = vmul.f32 %v1761_v48, %v1468_v38 }
 0x31d   : > { %v1767_v1 = vadd.f32 %v1757_v50, %v1755_v12 }
 0x31e   : > { %v1763_v30 = vadd.f32 0.0001, %v1762_v2 }
 0x31f   : > { %v1768_v19 = vadd.f32 0.0001, %v1767_v1 }
 0x321   : > { %v1537_v31 = vpop.f32.mrb[22].mxu0 }
 0x322   : > { %v1756_v4 = vsub.f32 %v1537_v31, %v1755_v12  ;;  %v1539_v62 = vpop.f32.mrb[23].mxu0 }
 0x323   : > { %v1758_v59 = vsub.f32 %v1539_v62, %v1757_v50 }
 0x325   : > { %v1769_v23 = vadd.f32 %v1758_v59, %v1756_v4 }
 0x327   : > { %v1770_v9 = vadd.f32 0.0009, %v1769_v23 }
 0x329   : > { %v1771_v57 = vmul.f32 %v1770_v9, %v1768_v19  ;;  %v1608_v33 = vpop.f32.mrb[24].mxu0 }
 0x32a   : > { %v1760_v55 = vsub.f32 %v1608_v33, %v1759_v58  ;;  %v1610_v45 = vpop.f32.mrb[25].mxu0 }
 0x32b   : > { %6143 = vrcp.f32 %v1771_v57  ;;  %v1791_v6 = vmul.f32 2.0, %v1610_v45  ;;  %v1785_v25 = vmul.f32 %v1610_v45, %v1610_v45 }
 0x32c   : > { %v1764_v49 = vmul.f32 2.0, %v1760_v55 }
 0x32e   : > { %v1765_v15 = vadd.f32 0.0009, %v1764_v49  ;;  %v1140_v49 = vrot.slane %v6944_v51, 4 }
 0x330   : > { %v1766_v5 = vmul.f32 %v1765_v15, %v1763_v30 }
 0x331   : > { %v1679_v13 = vpop.f32.mrb[26].mxu0 }
 0x332   : > { %v1792_v47 = vmul.f32 %v1791_v6, %v1679_v13  ;;  %v1681_v8 = vpop.f32.mrb[27].mxu0  ;;  %v1787_v48 = vmul.f32 %v1679_v13, %v1679_v13  ;;  %v1789_v38 = vmul.f32 %v1679_v13, %v1610_v45  ;;  %v1108_v6 = vrot.slane %v7019_v26, 4 }
 0x333   : > { %v1786_v12 = vsub.f32 %v1681_v8, %v1785_v25 }
 0x334   : > { %v1797_v50 = vadd.f32 %v1787_v48, %v1785_v25  ;;  %v1793_v45 = vadd.f32 0.0001, %v1792_v47  ;;  %v1156_v25 = vrot.slane %v6955_v3, 4 }
 0x335   : > { %v6144_v1 = vpop.eup %6143 }
 0x336   : > { %v1773_v31 = vmul.f32 %v6144_v1, %v1766_v5  ;;  %v1798_v57 = vadd.f32 0.0001, %v1797_v50  ;;  %v1124_v5 = vrot.slane %v7025_v20, 4  ;;  %v1141_v50 = vadd.f32 %v1140_v49, %v6944_v51  ;;  %v7049_v51 = vld [vmem:[%s7439_s3] sm:$0xff] }
 0x337   : > { %v1109_v1 = vadd.f32 %v1108_v6, %v7019_v26  ;;  %v1157_v47 = vadd.f32 %v1156_v25, %v6955_v3 }
 0x338   : > { %v1774_v4 = vmul.f32 %v1773_v31, %v6950_v14  ;;  %v1125_v31 = vadd.f32 %v1124_v5, %v7025_v20 }
 0x339   : > { %v1750_v58 = vpop.f32.mrb[28].mxu0 }
 0x33a   : > { %v1788_v62 = vsub.f32 %v1750_v58, %v1787_v48  ;;  %1775 = vadd.xlane.f32.xlu0 %v1774_v4  ;;  %v1752_v59 = vpop.f32.mrb[29].mxu0 }
 0x33b   : > { %v1790_v2 = vsub.f32 %v1752_v59, %v1789_v38  ;;  %v1142_v59 = vrot.slane %v1141_v50, 2 }
 0x33c   : > { %v1799_v19 = vadd.f32 %v1788_v62, %v1786_v12 }
 0x33d   : > { %v1794_v23 = vmul.f32 2.0, %v1790_v2  ;;  %v5635_v9 = vpop.f32.mrb[30].mxu0  ;;  %v1110_v2 = vrot.slane %v1109_v1, 2 }
 0x33e   : > { %v1800_v33 = vadd.f32 0.0009, %v1799_v19  ;;  %v2064_v55 = vpop.f32.mrb[31].mxu0  ;;  %v1158_v19 = vrot.slane %v1157_v47, 2 }
 0x33f   : > { %v1795_v30 = vadd.f32 0.0009, %v1794_v23  ;;  %v5855_v15 = vpack.c.bf16 %v5635_v9, %v2064_v55  ;;  %v1126_v23 = vrot.slane %v1125_v31, 2  ;;  %v1143_v55 = vadd.f32 %v1142_v59, %v1141_v50 }
 0x340   : > { %v1801_v13 = vmul.f32 %v1800_v33, %v1798_v57  ;;  %v1111_v57 = vadd.f32 %v1110_v2, %v1109_v1  ;;  %v1159_v49 = vadd.f32 %v1158_v19, %v1157_v47 }
 0x341   : > { %v1796_v8 = vmul.f32 %v1795_v30, %v1793_v45  ;;  %v5638_v48 = vpop.f32.mrb[32].mxu0  ;;  %v1127_v33 = vadd.f32 %v1126_v23, %v1125_v31  ;;  %v1144_v5 = vrot.slane %v1143_v55, 1 }
 0x342   : > { %6145 = vrcp.f32 %v1801_v13  ;;  %v2074_v38 = vpop.f32.mrb[33].mxu0  ;;  %v1112_v6 = vrot.slane %v1111_v57, 1  ;;  %v1160_v13 = vrot.slane %v1159_v49, 1 }
 0x343   : > { %v5853_v12 = vpack.c.bf16 %v5638_v48, %v2074_v38  ;;  %v1128_v25 = vrot.slane %v1127_v33, 1 }
 0x344   : > { %v1161_v50 = vadd.f32 %v1160_v13, %v1159_v49  ;;  %v2692_v49 = vmul.f32 %v6882_v53, %v6882_v53  ;;  %v6192_v13 = vld [vmem:[%s6391_s14 + $0x30] sm:$0xff] }
 0x345   : > { %v5641_v4 = vpop.f32.mrb[34].mxu0  ;;  %5854 = vmatprep.subr.bf16.mxu1 %v5853_v12  ;;  %v1113_v12 = vadd.f32 %v1112_v6, %v1111_v57  ;;  %v2696_v6 = vmul.f32 %v6882_v53, %v6878_v40 }
 0x346   : > { %v2084_v58 = vpop.f32.mrb[35].mxu0  ;;  %5856 = vmatpush1.bf16.msra.mxu1 %v5855_v15 }
 0x347   : > { %v5859_v62 = vpack.c.bf16 %v5641_v4, %v2084_v58  ;;  %v1129_v4 = vadd.f32 %v1128_v25, %v1127_v33  ;;  %v1145_v58 = vadd.f32 %v1144_v5, %v1143_v55  ;;  %5969 = vpush %v1113_v12  ;;  %v2691_v55 = vmul.f32 %v6880_v36, %v6880_v36  ;;  %v6190_v25 = vld [vmem:[%s6405_s11 + $0x30] sm:$0xff]  ;;  %v6191_v5 = vld [vmem:[%s6405_s11 + $0x38] sm:$0xff] }
 0x349   : > { %v5644_v9 = vpop.f32.mrb[36].mxu0  ;;  %5320 = vmatmul.mubr.msk.f32.vlgmr.msra.gmra.mrb[30].mxu1 %vm336_vm0, %v7049_v51  ;;  %5971 = vpush %v1129_v4 }
 0x34a   : > { %v2094_v3 = vpop.f32.mrb[37].mxu0  ;;  %2298 = vmatprep.mubr.f32.mxu1 %v7465_v35  ;;  %5973 = vpush %v1145_v58 }
 0x34b   : > { %v5857_v26 = vpack.c.bf16 %v5644_v9, %v2094_v3  ;;  %5975 = vpush %v1161_v50 }
 0x34c   : > { %v6146_v20 = vpop.eup %6145 }
 0x34d   : > { %v5647_v45 = vpop.f32.mrb[38].mxu0  ;;  %5858 = vmatprep.subr.bf16.mxu1 %v5857_v26  ;;  %v1803_v30 = vmul.f32 %v6146_v20, %v1796_v8 }
 0x34e   : > { %v2104_v15 = vpop.f32.mrb[39].mxu0  ;;  %5860 = vmatpush1.bf16.msra.mxu1 %v5859_v62 }
 0x34f   : > { %v5863_v48 = vpack.c.bf16 %v5647_v45, %v2104_v15  ;;  %v1804_v38 = vmul.f32 %v1803_v30, %v6950_v14  ;;  %v2693_v45 = vmul.f32 %v6873_v32, %v6873_v32  ;;  %v2694_v30 = vmul.f32 %v6878_v40, %v6878_v40 }
 0x350   : > { %v2695_v15 = vmul.f32 %v6880_v36, %v6873_v32 }
 0x351   : > { %v5650_v9 = vpop.f32.mrb[40].mxu0  ;;  %5321 = vmatmul.mubr.msk.f32.vlgmr.msra.gmra.mrb[32].mxu1 %vm336_vm0, %v7049_v51  ;;  %1805 = vadd.xlane.f32.xlu1 %v1804_v38 }
 0x352   : > { %v2114_v1 = vpop.f32.mrb[41].mxu0  ;;  %2369 = vmatprep.mubr.f32.mxu1 %v7465_v35 }
 0x353   : > { %v5861_v8 = vpack.c.bf16 %v5650_v9, %v2114_v1 }
 0x355   : > { %v5653_v47 = vpop.f32.mrb[42].mxu0  ;;  %5862 = vmatprep.subr.bf16.mxu1 %v5861_v8 }
 0x356   : > { %v2124_v31 = vpop.f32.mrb[43].mxu0  ;;  %5864 = vmatpush1.bf16.msra.mxu1 %v5863_v48  ;;  %v2697_v48 = vmul.f32 %v6190_v25, %v6190_v25 }
 0x357   : > { %v5867_v62 = vpack.c.bf16 %v5653_v47, %v2124_v31 }
 0x359   : > { %v5656_v59 = vpop.f32.mrb[44].mxu0  ;;  %5322 = vmatmul.mubr.msk.f32.vlgmr.msra.gmra.mrb[34].mxu1 %vm336_vm0, %v7049_v51 }
 0x35a   : > { %v2134_v2 = vpop.f32.mrb[45].mxu0  ;;  %2440 = vmatprep.mubr.f32.mxu1 %v7465_v35 }
 0x35b   : > { %v5865_v19 = vpack.c.bf16 %v5656_v59, %v2134_v2 }
 0x35d   : > { %v5659_v23 = vpop.f32.mrb[46].mxu0  ;;  %5866 = vmatprep.subr.bf16.mxu1 %v5865_v19 }
 0x35e   : > { %v2144_v3 = vpop.f32.mrb[47].mxu0  ;;  %5868 = vmatpush1.bf16.msra.mxu1 %v5867_v62 }
 0x35f   : > { %v5871_v26 = vpack.c.bf16 %v5659_v23, %v2144_v3 }
 0x361   : > { %v5662_v20 = vpop.f32.mrb[48].mxu0  ;;  %5323 = vmatmul.mubr.msk.f32.vlgmr.msra.gmra.mrb[36].mxu1 %vm336_vm0, %v7049_v51 }
 0x362   : > { %v2154_v57 = vpop.f32.mrb[49].mxu0  ;;  %2511 = vmatprep.mubr.f32.mxu1 %v7465_v35 }
 0x363   : > { %v5869_v33 = vpack.c.bf16 %v5662_v20, %v2154_v57 }
 0x365   : > { %5870 = vmatprep.subr.bf16.mxu1 %v5869_v33 }
 0x366   : > { %5872 = vmatpush1.bf16.msra.mxu1 %v5871_v26 }
 0x367   : > { %5874 = vmatprep.subr.bf16.mxu1 %v7468_v56 }
 0x369   : > { %5324 = vmatmul.mubr.msk.f32.vlgmr.msra.gmra.mrb[38].mxu1 %vm336_vm0, %v7049_v51 }
 0x36a   : > { %5876 = vmatpush3.bf16.msra.mxu1 %v7468_v56  ;;  %5667 = vmatprep.mubr.msk.f32.mxu1 %vm336_vm0, %v6880_v36  ;;  %v2698_v36 = vmul.f32 %v6191_v5, %v6191_v5 }
 0x36d   : > { %5668 = vmatmul.mubr.msk.f32.vlgmr.msra.gmra.mrb[40].mxu1 %vm336_vm0, %v6882_v53 }
 0x36e   : > { %5670 = vmatprep.mubr.msk.f32.mxu1 %vm336_vm0, %v6873_v32  ;;  %v6193_v32 = vld [vmem:[%s6391_s14 + $0x38] sm:$0xff] }
 0x36f   : > { %v2700_v53 = vmul.f32 %v6193_v32, %v6191_v5 }
 0x371   : > { %5671 = vmatmul.mubr.msk.f32.gmra.mrb[42].mxu1 %vm336_vm0, %v6878_v40  ;;  %v2699_v40 = vmul.f32 %v6192_v13, %v6190_v25 }
 0x372   : > { %5673 = vmatprep.mubr.msk.f32.mxu1 %vm336_vm0, %v2691_v55 }
 0x375   : > { %5674 = vmatmul.mubr.msk.f32.gmra.mrb[44].mxu1 %vm336_vm0, %v2692_v49 }
 0x376   : > { %5676 = vmatprep.mubr.msk.f32.mxu1 %vm336_vm0, %v2693_v45 }
 0x379   : > { %5677 = vmatmul.mubr.msk.f32.gmra.mrb[46].mxu1 %vm336_vm0, %v2694_v30 }
 0x37a   : > { %5679 = vmatprep.mubr.msk.f32.mxu1 %vm336_vm0, %v2695_v15 }
 0x37d   : > { %5680 = vmatmul.mubr.msk.f32.gmra.mrb[48].mxu1 %vm336_vm0, %v2696_v6 }
 0x37e   : > { %5682 = vmatprep.mubr.msk.f32.mxu1 %vm336_vm0, %v6190_v25 }
 0x381   : > { %5683 = vmatmul.mubr.msk.f32.gmra.mrb[50].mxu1 %vm336_vm0, %v6191_v5 }
 0x382   : > { %5685 = vmatprep.mubr.msk.f32.mxu1 %vm336_vm0, %v6192_v13 }
 0x385   : > { %5686 = vmatmul.mubr.msk.f32.gmra.mrb[52].mxu1 %vm336_vm0, %v6193_v32 }
 0x386   : > { %5688 = vmatprep.mubr.msk.f32.mxu1 %vm336_vm0, %v2697_v48 }
 0x389   : > { %5689 = vmatmul.mubr.msk.f32.gmra.mrb[54].mxu1 %vm336_vm0, %v2698_v36 }
 0x38a   : > { %5691 = vmatprep.mubr.msk.f32.mxu1 %vm336_vm0, %v6932_v54 }
 0x38d   : > { %5692 = vmatmul.mubr.msk.f32.gmra.mrb[56].mxu1 %vm336_vm0, %v6936_v37 }
 0x38e   : > { %5694 = vmatprep.mubr.msk.f32.mxu1 %vm336_vm0, %v2699_v40 }
 0x391   : > { %5695 = vmatmul.mubr.msk.f32.gmra.mrb[58].mxu1 %vm336_vm0, %v2700_v53 }
 0x392   : > { %3604 = vmatprep.mubr.f32.mxu1 %v7465_v35 }
 0x3c7   : > { %v1776_v38 = vpop.xlane.xlu0 %1775 }
 0x3c8   : > { %v1777_v12 = vrot.slane %v1776_v38, 4 }
 0x3ca   : > { %v1778_v4 = vadd.f32 %v1777_v12, %v1776_v38 }
 0x3cc   : > { %v1779_v58 = vrot.slane %v1778_v4, 2 }
 0x3ce   : > { %v1780_v9 = vadd.f32 %v1779_v58, %v1778_v4 }
 0x3d0   : > { %v1781_v50 = vrot.slane %v1780_v9, 1 }
 0x3d2   : > { %v1782_v1 = vadd.f32 %v1781_v50, %v1780_v9 }
 0x3d4   : > { %5977 = vpush %v1782_v1 }
 0x3de   : > { %v1806_v54 = vpop.xlane.xlu1 %1805 }
 0x3df   : > { %v1807_v8 = vrot.slane %v1806_v54, 4 }
 0x3e1   : > { %v1808_v47 = vadd.f32 %v1807_v8, %v1806_v54 }
 0x3e3   : > { %v1809_v31 = vrot.slane %v1808_v47, 2 }
 0x3e5   : > { %v1810_v37 = vadd.f32 %v1809_v31, %v1808_v47 }
 0x3e7   : > { %v1811_v62 = vrot.slane %v1810_v37, 1 }
 0x3e9   : > { %v1812_v59 = vadd.f32 %v1811_v62, %v1810_v37 }
 0x3eb   : > { %5979 = vpush %v1812_v59 }
 0x41c   : > { %v2229_v2 = vpop.f32.mrb[30].mxu1 }
 0x41d   : > { %v2524_v19 = vmul.f32 2.0, %v2229_v2  ;;  %v2231_v23 = vpop.f32.mrb[31].mxu1  ;;  %v2518_v3 = vmul.f32 %v2229_v2, %v2229_v2 }
 0x41e   : > { %v2520_v26 = vmul.f32 %v2231_v23, %v2231_v23  ;;  %v2522_v20 = vmul.f32 %v2231_v23, %v2229_v2 }
 0x41f   : > { %v2525_v57 = vmul.f32 %v2524_v19, %v2231_v23 }
 0x420   : > { %v2530_v33 = vadd.f32 %v2520_v26, %v2518_v3 }
 0x421   : > { %v2526_v40 = vadd.f32 0.0001, %v2525_v57 }
 0x422   : > { %v2531_v15 = vadd.f32 0.0001, %v2530_v33 }
 0x424   : > { %v2300_v55 = vpop.f32.mrb[32].mxu1 }
 0x425   : > { %v2519_v49 = vsub.f32 %v2300_v55, %v2518_v3  ;;  %v2302_v45 = vpop.f32.mrb[33].mxu1 }
 0x426   : > { %v2521_v30 = vsub.f32 %v2302_v45, %v2520_v26 }
 0x428   : > { %v2532_v6 = vadd.f32 %v2521_v30, %v2519_v49  ;;  %v1903_v49 = vrot.slane %v6947_v41, 4 }
 0x42a   : > { %v2533_v25 = vadd.f32 0.0009, %v2532_v6  ;;  %v1871_v6 = vrot.slane %v7023_v52, 4 }
 0x42c   : > { %v2534_v5 = vmul.f32 %v2533_v25, %v2531_v15  ;;  %v2371_v13 = vpop.f32.mrb[34].mxu1  ;;  %v1887_v25 = vrot.slane %v7029_v7, 4 }
 0x42d   : > { %v2523_v48 = vsub.f32 %v2371_v13, %v2522_v20  ;;  %v2373_v32 = vpop.f32.mrb[35].mxu1 }
 0x42e   : > { %6147 = vrcp.f32 %v2534_v5  ;;  %v2554_v38 = vmul.f32 2.0, %v2373_v32  ;;  %v2548_v12 = vmul.f32 %v2373_v32, %v2373_v32  ;;  %v1919_v5 = vrot.slane %v7031_v18, 4 }
 0x42f   : > { %v2527_v36 = vmul.f32 2.0, %v2523_v48 }
 0x431   : > { %v2528_v53 = vadd.f32 0.0009, %v2527_v36 }
 0x433   : > { %v2529_v4 = vmul.f32 %v2528_v53, %v2526_v40  ;;  %v1904_v53 = vadd.f32 %v1903_v49, %v6947_v41 }
 0x434   : > { %v2442_v58 = vpop.f32.mrb[36].mxu1 }
 0x435   : > { %v2555_v9 = vmul.f32 %v2554_v38, %v2442_v58  ;;  %v2444_v50 = vpop.f32.mrb[37].mxu1  ;;  %v2550_v1 = vmul.f32 %v2442_v58, %v2442_v58  ;;  %v2552_v54 = vmul.f32 %v2442_v58, %v2373_v32  ;;  %v1872_v38 = vadd.f32 %v1871_v6, %v7023_v52 }
 0x436   : > { %v2549_v8 = vsub.f32 %v2444_v50, %v2548_v12 }
 0x437   : > { %v2560_v47 = vadd.f32 %v2550_v1, %v2548_v12  ;;  %v2556_v45 = vadd.f32 0.0001, %v2555_v9  ;;  %v1888_v12 = vadd.f32 %v1887_v25, %v7029_v7 }
 0x438   : > { %v6148_v31 = vpop.eup %6147 }
 0x439   : > { %v2536_v37 = vmul.f32 %v6148_v31, %v2529_v4  ;;  %v2561_v57 = vadd.f32 0.0001, %v2560_v47  ;;  %v1920_v4 = vadd.f32 %v1919_v5, %v7031_v18 }
 0x43b   : > { %v2537_v62 = vmul.f32 %v2536_v37, %v6950_v14  ;;  %v1921_v47 = vrot.slane %v1920_v4, 2 }
 0x43c   : > { %v2513_v59 = vpop.f32.mrb[38].mxu1 }
 0x43d   : > { %v2551_v2 = vsub.f32 %v2513_v59, %v2550_v1  ;;  %2538 = vadd.xlane.f32.xlu0 %v2537_v62  ;;  %v2515_v19 = vpop.f32.mrb[39].mxu1  ;;  %v1905_v1 = vrot.slane %v1904_v53, 2  ;;  %v1922_v59 = vadd.f32 %v1921_v47, %v1920_v4  ;;  %v3391_v47 = vmul.f32 %v6786_v16, %v6786_v16 }
 0x43e   : > { %v2553_v23 = vsub.f32 %v2515_v19, %v2552_v54  ;;  %v1873_v54 = vrot.slane %v1872_v38, 2 }
 0x43f   : > { %v2562_v3 = vadd.f32 %v2551_v2, %v2549_v8  ;;  %v1889_v8 = vrot.slane %v1888_v12, 2  ;;  %v1906_v62 = vadd.f32 %v1905_v1, %v1904_v53  ;;  %v7469_v1 = vld [vmem:[#allocation11_spill] sm:$0xff] }
 0x440   : > { %v2557_v26 = vmul.f32 2.0, %v2553_v23  ;;  %v5669_v20 = vpop.f32.mrb[40].mxu1  ;;  %v1874_v37 = vadd.f32 %v1873_v54, %v1872_v38  ;;  %v3389_v54 = vmul.f32 %v7469_v1, %v7469_v1 }
 0x441   : > { %v2563_v33 = vadd.f32 0.0009, %v2562_v3  ;;  %v2827_v55 = vpop.f32.mrb[41].mxu1  ;;  %v1890_v18 = vadd.f32 %v1889_v8, %v1888_v12  ;;  %v3390_v8 = vmul.f32 %v6793_v24, %v6793_v24 }
 0x442   : > { %v2558_v30 = vadd.f32 0.0009, %v2557_v26  ;;  %v5879_v15 = vpack.c.bf16 %v5669_v20, %v2827_v55  ;;  %v1875_v3 = vrot.slane %v1874_v37, 1  ;;  %v1907_v20 = vrot.slane %v1906_v62, 1 }
 0x443   : > { %v2564_v13 = vmul.f32 %v2563_v33, %v2561_v57  ;;  %v1891_v26 = vrot.slane %v1890_v18, 1  ;;  %v1923_v57 = vrot.slane %v1922_v59, 1 }
 0x444   : > { %v2559_v48 = vmul.f32 %v2558_v30, %v2556_v45  ;;  %v5672_v32 = vpop.f32.mrb[42].mxu1  ;;  %v1876_v49 = vadd.f32 %v1875_v3, %v1874_v37  ;;  %v1908_v30 = vadd.f32 %v1907_v20, %v1906_v62 }
 0x445   : > { %6149 = vrcp.f32 %v2564_v13  ;;  %v2837_v36 = vpop.f32.mrb[43].mxu1  ;;  %v1892_v45 = vadd.f32 %v1891_v26, %v1890_v18  ;;  %v1924_v6 = vadd.f32 %v1923_v57, %v1922_v59 }
 0x446   : > { %v5877_v40 = vpack.c.bf16 %v5672_v32, %v2837_v36  ;;  %5981 = vpush %v1876_v49 }
 0x447   : > { %5983 = vpush %v1892_v45 }
 0x448   : > { %v5675_v58 = vpop.f32.mrb[44].mxu1  ;;  %5878 = vmatprep.subr.bf16.mxu0 %v5877_v40  ;;  %5985 = vpush %v1908_v30 }
 0x449   : > { %v2847_v9 = vpop.f32.mrb[45].mxu1  ;;  %5880 = vmatpush1.bf16.msra.mxu0 %v5879_v15  ;;  %5987 = vpush %v1924_v6 }
 0x44a   : > { %v5883_v50 = vpack.c.bf16 %v5675_v58, %v2847_v9 }
 0x44c   : > { %v5678_v31 = vpop.f32.mrb[46].mxu1  ;;  %5351 = vmatmul.mubr.msk.f32.vlgmr.msra.gmra.mrb[50].mxu0 %vm336_vm0, %v7049_v51 }
 0x44d   : > { %v2857_v41 = vpop.f32.mrb[47].mxu1  ;;  %3061 = vmatprep.mubr.f32.mxu0 %v7465_v35 }
 0x44e   : > { %v5881_v52 = vpack.c.bf16 %v5678_v31, %v2857_v41  ;;  %v3392_v31 = vmul.f32 %v6791_v22, %v6791_v22  ;;  %v3393_v41 = vmul.f32 %v7469_v1, %v6786_v16 }
 0x44f   : > { %v6150_v7 = vpop.eup %6149 }
 0x450   : > { %v5681_v2 = vpop.f32.mrb[48].mxu1  ;;  %5882 = vmatprep.subr.bf16.mxu0 %v5881_v52  ;;  %v2566_v19 = vmul.f32 %v6150_v7, %v2559_v48  ;;  %v3394_v52 = vmul.f32 %v6793_v24, %v6791_v22 }
 0x451   : > { %v2867_v23 = vpop.f32.mrb[49].mxu1  ;;  %5884 = vmatpush1.bf16.msra.mxu0 %v5883_v50 }
 0x452   : > { %v5887_v33 = vpack.c.bf16 %v5681_v2, %v2867_v23  ;;  %v2567_v55 = vmul.f32 %v2566_v19, %v6950_v14 }
 0x454   : > { %v5684_v15 = vpop.f32.mrb[50].mxu1  ;;  %5352 = vmatmul.mubr.msk.f32.vlgmr.msra.gmra.mrb[52].mxu0 %vm336_vm0, %v7049_v51  ;;  %2568 = vadd.xlane.f32.xlu1 %v2567_v55 }
 0x455   : > { %v2877_v25 = vpop.f32.mrb[51].mxu1  ;;  %3132 = vmatprep.mubr.f32.mxu0 %v7465_v35 }
 0x456   : > { %v5885_v5 = vpack.c.bf16 %v5684_v15, %v2877_v25 }
 0x458   : > { %v5687_v13 = vpop.f32.mrb[52].mxu1  ;;  %5886 = vmatprep.subr.bf16.mxu0 %v5885_v5 }
 0x459   : > { %v2887_v48 = vpop.f32.mrb[53].mxu1  ;;  %5888 = vmatpush1.bf16.msra.mxu0 %v5887_v33 }
 0x45a   : > { %v5891_v32 = vpack.c.bf16 %v5687_v13, %v2887_v48 }
 0x45c   : > { %v5690_v36 = vpop.f32.mrb[54].mxu1  ;;  %5353 = vmatmul.mubr.msk.f32.vlgmr.msra.gmra.mrb[54].mxu0 %vm336_vm0, %v7049_v51 }
 0x45d   : > { %v2897_v40 = vpop.f32.mrb[55].mxu1  ;;  %3203 = vmatprep.mubr.f32.mxu0 %v7465_v35 }
 0x45e   : > { %v5889_v53 = vpack.c.bf16 %v5690_v36, %v2897_v40 }
 0x460   : > { %v5693_v38 = vpop.f32.mrb[56].mxu1  ;;  %5890 = vmatprep.subr.bf16.mxu0 %v5889_v53 }
 0x461   : > { %v2907_v12 = vpop.f32.mrb[57].mxu1  ;;  %5892 = vmatpush1.bf16.msra.mxu0 %v5891_v32 }
 0x462   : > { %v5895_v4 = vpack.c.bf16 %v5693_v38, %v2907_v12 }
 0x464   : > { %v5696_v58 = vpop.f32.mrb[58].mxu1  ;;  %5354 = vmatmul.mubr.msk.f32.vlgmr.msra.gmra.mrb[56].mxu0 %vm336_vm0, %v7049_v51 }
 0x465   : > { %v2917_v9 = vpop.f32.mrb[59].mxu1  ;;  %3274 = vmatprep.mubr.f32.mxu0 %v7465_v35 }
 0x466   : > { %v5893_v50 = vpack.c.bf16 %v5696_v58, %v2917_v9 }
 0x468   : > { %5894 = vmatprep.subr.bf16.mxu0 %v5893_v50 }
 0x469   : > { %5896 = vmatpush1.bf16.msra.mxu0 %v5895_v4 }
 0x46a   : > { %5898 = vmatprep.subr.bf16.mxu0 %v7468_v56 }
 0x46c   : > { %5355 = vmatmul.mubr.msk.f32.vlgmr.msra.gmra.mrb[58].mxu0 %vm336_vm0, %v7049_v51 }
 0x46d   : > { %5900 = vmatpush3.bf16.msra.mxu0 %v7468_v56  ;;  %5701 = vmatprep.mubr.msk.f32.mxu0 %vm336_vm0, %v7469_v1 }
 0x470   : > { %5702 = vmatmul.mubr.msk.f32.vlgmr.msra.gmra.mrb[60].mxu0 %vm336_vm0, %v6793_v24 }
 0x471   : > { %5704 = vmatprep.mubr.msk.f32.mxu0 %vm336_vm0, %v6786_v16 }
 0x474   : > { %5705 = vmatmul.mubr.msk.f32.gmra.mrb[62].mxu0 %vm336_vm0, %v6791_v22 }
 0x475   : > { %5707 = vmatprep.mubr.msk.f32.mxu0 %vm336_vm0, %v3389_v54 }
 0x478   : > { %5708 = vmatmul.mubr.msk.f32.gmra.mrb[64].mxu0 %vm336_vm0, %v3390_v8 }
 0x479   : > { %5710 = vmatprep.mubr.msk.f32.mxu0 %vm336_vm0, %v3391_v47 }
 0x47c   : > { %5711 = vmatmul.mubr.msk.f32.gmra.mrb[66].mxu0 %vm336_vm0, %v3392_v31 }
 0x47d   : > { %5713 = vmatprep.mubr.msk.f32.mxu0 %vm336_vm0, %v3393_v41 }
 0x480   : > { %5714 = vmatmul.mubr.msk.f32.gmra.mrb[68].mxu0 %vm336_vm0, %v3394_v52 }
 0x481   : > { %4046 = vmatprep.mubr.f32.mxu0 %v7465_v35 }
 0x4ca   : > { %v2539_v7 = vpop.xlane.xlu0 %2538 }
 0x4cb   : > { %v2540_v37 = vrot.slane %v2539_v7, 4 }
 0x4cd   : > { %v2541_v18 = vadd.f32 %v2540_v37, %v2539_v7 }
 0x4cf   : > { %v2542_v62 = vrot.slane %v2541_v18, 2 }
 0x4d1   : > { %v2543_v59 = vadd.f32 %v2542_v62, %v2541_v18 }
 0x4d3   : > { %v2544_v2 = vrot.slane %v2543_v59, 1 }
 0x4d5   : > { %v2545_v19 = vadd.f32 %v2544_v2, %v2543_v59 }
 0x4d7   : > { %5989 = vpush %v2545_v19 }
 0x4e1   : > { %v2569_v16 = vpop.xlane.xlu1 %2568 }
 0x4e2   : > { %v2570_v23 = vrot.slane %v2569_v16, 4 }
 0x4e4   : > { %v2571_v3 = vadd.f32 %v2570_v23, %v2569_v16 }
 0x4e6   : > { %v2572_v26 = vrot.slane %v2571_v3, 2 }
 0x4e8   : > { %v2573_v20 = vadd.f32 %v2572_v26, %v2571_v3 }
 0x4ea   : > { %v2574_v22 = vrot.slane %v2573_v20, 1 }
 0x4ec   : > { %v2575_v24 = vadd.f32 %v2574_v22, %v2573_v20 }
 0x4ee   : > { %5991 = vpush %v2575_v24 }
 0x51f   : > { %v2992_v57 = vpop.f32.mrb[50].mxu0 }
 0x520   : > { %v3287_v33 = vmul.f32 2.0, %v2992_v57  ;;  %v2994_v55 = vpop.f32.mrb[51].mxu0  ;;  %v3281_v49 = vmul.f32 %v2992_v57, %v2992_v57 }
 0x521   : > { %v3283_v45 = vmul.f32 %v2994_v55, %v2994_v55  ;;  %v3285_v30 = vmul.f32 %v2994_v55, %v2992_v57 }
 0x522   : > { %v3288_v15 = vmul.f32 %v3287_v33, %v2994_v55  ;;  %v2666_v55 = vrot.slane %v6953_v27, 4 }
 0x523   : > { %v3293_v6 = vadd.f32 %v3283_v45, %v3281_v49 }
 0x524   : > { %v3289_v9 = vadd.f32 0.0001, %v3288_v15  ;;  %v2634_v15 = vrot.slane %v7027_v0, 4 }
 0x525   : > { %v3294_v32 = vadd.f32 0.0001, %v3293_v6  ;;  %v2650_v6 = vrot.slane %v7033_v63, 4 }
 0x527   : > { %v3063_v25 = vpop.f32.mrb[52].mxu0 }
 0x528   : > { %v3282_v5 = vsub.f32 %v3063_v25, %v3281_v49  ;;  %v3065_v13 = vpop.f32.mrb[53].mxu0  ;;  %v2682_v25 = vrot.slane %v7035_v60, 4 }
 0x529   : > { %v3284_v48 = vsub.f32 %v3065_v13, %v3283_v45 }
 0x52b   : > { %v3295_v36 = vadd.f32 %v3284_v48, %v3282_v5 }
 0x52d   : > { %v3296_v40 = vadd.f32 0.0009, %v3295_v36 }
 0x52f   : > { %v3297_v53 = vmul.f32 %v3296_v40, %v3294_v32  ;;  %v3134_v38 = vpop.f32.mrb[54].mxu0  ;;  %v2667_v40 = vadd.f32 %v2666_v55, %v6953_v27  ;;  %v3833_v55 = vmul.f32 %v6818_v11, %v6818_v11 }
 0x530   : > { %v3286_v12 = vsub.f32 %v3134_v38, %v3285_v30  ;;  %v3136_v4 = vpop.f32.mrb[55].mxu0  ;;  %v2651_v38 = vadd.f32 %v2650_v6, %v7033_v63 }
 0x531   : > { %6151 = vrcp.f32 %v3297_v53  ;;  %v3317_v1 = vmul.f32 2.0, %v3136_v4  ;;  %v3311_v54 = vmul.f32 %v3136_v4, %v3136_v4  ;;  %v2635_v53 = vadd.f32 %v2634_v15, %v7027_v0 }
 0x532   : > { %v3290_v58 = vmul.f32 2.0, %v3286_v12  ;;  %v2683_v12 = vadd.f32 %v2682_v25, %v7035_v60 }
 0x534   : > { %v3291_v50 = vadd.f32 0.0009, %v3290_v58 }
 0x536   : > { %v3292_v8 = vmul.f32 %v3291_v50, %v3289_v9  ;;  %v2668_v50 = vrot.slane %v2667_v40, 2 }
 0x537   : > { %v3205_v47 = vpop.f32.mrb[56].mxu0 }
 0x538   : > { %v3318_v31 = vmul.f32 %v3317_v1, %v3205_v47  ;;  %v3207_v41 = vpop.f32.mrb[57].mxu0  ;;  %v3313_v52 = vmul.f32 %v3205_v47, %v3205_v47  ;;  %v3315_v7 = vmul.f32 %v3205_v47, %v3136_v4  ;;  %v2636_v1 = vrot.slane %v2635_v53, 2 }
 0x539   : > { %v3312_v37 = vsub.f32 %v3207_v41, %v3311_v54  ;;  %v2669_v41 = vadd.f32 %v2668_v50, %v2667_v40 }
 0x53a   : > { %v3323_v18 = vadd.f32 %v3313_v52, %v3311_v54  ;;  %v3319_v49 = vadd.f32 0.0001, %v3318_v31  ;;  %v2652_v54 = vrot.slane %v2651_v38, 2  ;;  %v2637_v31 = vadd.f32 %v2636_v1, %v2635_v53 }
 0x53b   : > { %v6152_v62 = vpop.eup %6151 }
 0x53c   : > { %v3299_v59 = vmul.f32 %v6152_v62, %v3292_v8  ;;  %v3324_v24 = vadd.f32 0.0001, %v3323_v18  ;;  %v2684_v8 = vrot.slane %v2683_v12, 2  ;;  %v2653_v60 = vadd.f32 %v2652_v54, %v2651_v38 }
 0x53d   : > { %v2638_v62 = vrot.slane %v2637_v31, 1 }
 0x53e   : > { %v3300_v2 = vmul.f32 %v3299_v59, %v6950_v14  ;;  %v2654_v59 = vrot.slane %v2653_v60, 1 }
 0x53f   : > { %v3276_v19 = vpop.f32.mrb[58].mxu0 }
 0x540   : > { %v3314_v16 = vsub.f32 %v3276_v19, %v3313_v52  ;;  %3301 = vadd.xlane.f32.xlu0 %v3300_v2  ;;  %v3278_v23 = vpop.f32.mrb[59].mxu0  ;;  %v2685_v52 = vadd.f32 %v2684_v8, %v2683_v12  ;;  %v2670_v2 = vrot.slane %v2669_v41, 1 }
 0x541   : > { %v3316_v3 = vsub.f32 %v3278_v23, %v3315_v7  ;;  %v6273_v23 = vmov 0.0|0.0  }
 0x542   : > { %v3325_v26 = vadd.f32 %v3314_v16, %v3312_v37  ;;  %v2686_v19 = vrot.slane %v2685_v52, 1 }
 0x543   : > { %v3320_v20 = vmul.f32 2.0, %v3316_v3  ;;  %v5703_v22 = vpop.f32.mrb[60].mxu0 }
 0x544   : > { %v3326_v57 = vadd.f32 0.0009, %v3325_v26  ;;  %v3491_v33 = vpop.f32.mrb[61].mxu0  ;;  %v2639_v26 = vadd.f32 %v2638_v62, %v2637_v31 }
 0x545   : > { %v3321_v45 = vadd.f32 0.0009, %v3320_v20  ;;  %v5903_v30 = vpack.c.bf16 %v5703_v22, %v3491_v33  ;;  %v2655_v20 = vadd.f32 %v2654_v59, %v2653_v60  ;;  %v2671_v22 = vadd.f32 %v2670_v2, %v2669_v41 }
 0x546   : > { %v3327_v5 = vmul.f32 %v3326_v57, %v3324_v24  ;;  %v2687_v24 = vadd.f32 %v2686_v19, %v2685_v52  ;;  %5993 = vpush %v2639_v26  ;;  %v3831_v57 = vmul.f32 %v6825_v44, %v6825_v44  ;;  %v3832_v33 = vmul.f32 %v6832_v42, %v6832_v42 }
 0x547   : > { %v3322_v13 = vmul.f32 %v3321_v45, %v3319_v49  ;;  %v5706_v48 = vpop.f32.mrb[62].mxu0  ;;  %5995 = vpush %v2655_v20  ;;  %v3834_v49 = vmul.f32 %v6822_v43, %v6822_v43  ;;  %v3835_v45 = vmul.f32 %v6825_v44, %v6818_v11  ;;  %v4234_v60 = vsub.f32 %v6453_v21, %v6855_v10 }
 0x548   : > { %6153 = vrcp.f32 %v3327_v5  ;;  %v3501_v32 = vpop.f32.mrb[63].mxu0  ;;  %5997 = vpush %v2671_v22 }
 0x549   : > { %v5901_v36 = vpack.c.bf16 %v5706_v48, %v3501_v32  ;;  %5999 = vpush %v2687_v24 }
 0x54b   : > { %5902 = vmatprep.subr.bf16.mxu1 %v5901_v36  ;;  %v5709_v4 = vpop.f32.mrb[64].mxu0 }
 0x54c   : > { %5904 = vmatpush1.bf16.msra.mxu1 %v5903_v30  ;;  %v3511_v58 = vpop.f32.mrb[65].mxu0  ;;  %v3836_v30 = vmul.f32 %v6832_v42, %v6822_v43 }
 0x54d   : > { %v5907_v9 = vpack.c.bf16 %v5709_v4, %v3511_v58  ;;  %v7470_v4 = vld [vmem:[#allocation7_spill] sm:$0xff]  ;;  %v7471_v58 = vld [vmem:[#allocation9_spill] sm:$0xff] }
 0x54f   : > { %v5712_v47 = vpop.f32.mrb[66].mxu0  ;;  %5366 = vmatmul.mubr.msk.f32.vlgmr.msra.gmra.mrb[60].mxu1 %vm336_vm0, %v7049_v51 }
 0x550   : > { %v3521_v27 = vpop.f32.mrb[67].mxu0  ;;  %3675 = vmatprep.mubr.f32.mxu1 %v7465_v35 }
 0x551   : > { %v5905_v0 = vpack.c.bf16 %v5712_v47, %v3521_v27 }
 0x552   : > { %v6154_v63 = vpop.eup %6153 }
 0x553   : > { %5906 = vmatprep.subr.bf16.mxu1 %v5905_v0  ;;  %v5715_v7 = vpop.f32.mrb[68].mxu0  ;;  %v3329_v37 = vmul.f32 %v6154_v63, %v3322_v13 }
 0x554   : > { %5908 = vmatpush1.bf16.msra.mxu1 %v5907_v9  ;;  %v3531_v18 = vpop.f32.mrb[69].mxu0  ;;  %v7215_v9 = vmax.f32 %v7471_v58, %v7470_v4 }
 0x555   : > { %v5910_v16 = vpack.c.bf16 %v5715_v7, %v3531_v18  ;;  %5909 = vmatprep.subr.bf16.mxu1 %v6273_v23  ;;  %v3330_v3 = vmul.f32 %v3329_v37, %v6950_v14  ;;  %v4237_v37 = vmul.f32 1.442695, %v4234_v60 }
 0x556   : > { %v4227_v50 = vsub.f32 %v7471_v58, %v7215_v9  ;;  %v4233_v54 = vsub.f32 %v7470_v4, %v7215_v9 }
 0x557   : > { %5367 = vmatmul.mubr.msk.f32.vlgmr.msra.gmra.mrb[62].mxu1 %vm336_vm0, %v7049_v51  ;;  %3331 = vadd.xlane.f32.xlu1 %v3330_v3 }
 0x558   : > { %5911 = vmatpush3.bf16.msra.mxu1 %v5910_v16  ;;  %5720 = vmatprep.mubr.msk.f32.mxu1 %vm6274_vm4, %v7465_v35  ;;  %v4229_v1 = vmul.f32 1.442695, %v4227_v50  ;;  %v4235_v52 = vmul.f32 1.442695, %v4233_v54 }
 0x559   : > { %5913 = vmatprep.subr.bf16.mxu1 %v7468_v56 }
 0x55a   : > { %6155 = vpow2.f32 %v4229_v1  ;;  %v6194_v1 = vld [vmem:[%s6405_s11 + $0x10] sm:$0xff] }
 0x55b   : > { %5721 = vmatmul.mubr.msk.f32.vlgmr.msra.gmra.mrb[64].mxu1 %vm336_vm0, %v7049_v51  ;;  %6157 = vpow2.f32 %v4235_v52 }
 0x55c   : > { %5915 = vmatpush3.bf16.msra.mxu1 %v7468_v56  ;;  %5727 = vmatprep.mubr.msk.f32.mxu1 %vm336_vm0, %v6825_v44  ;;  %6159 = vpow2.f32 %v4237_v37 }
 0x55f   : > { %5728 = vmatmul.mubr.msk.f32.vlgmr.msra.gmra.mrb[66].mxu1 %vm336_vm0, %v6832_v42 }
 0x560   : > { %5730 = vmatprep.mubr.msk.f32.mxu1 %vm336_vm0, %v6818_v11 }
 0x563   : > { %5731 = vmatmul.mubr.msk.f32.gmra.mrb[68].mxu1 %vm336_vm0, %v6822_v43 }
 0x564   : > { %5733 = vmatprep.mubr.msk.f32.mxu1 %vm336_vm0, %v3831_v57  ;;  %v6156_v3 = vpop.eup %6155 }
 0x567   : > { %5734 = vmatmul.mubr.msk.f32.gmra.mrb[70].mxu1 %vm336_vm0, %v3832_v33 }
 0x568   : > { %5736 = vmatprep.mubr.msk.f32.mxu1 %vm336_vm0, %v3833_v55  ;;  %v7472_v55 = vld [vmem:[#allocation10_spill] sm:$0xff] }
 0x56b   : > { %5737 = vmatmul.mubr.msk.f32.gmra.mrb[72].mxu1 %vm336_vm0, %v3834_v49  ;;  %v4239_v49 = vmul.f32 %v6156_v3, %v7472_v55 }
 0x56c   : > { %5739 = vmatprep.mubr.msk.f32.mxu1 %vm336_vm0, %v3835_v45  ;;  %v6158_v45 = vpop.eup %6157 }
 0x56d   : > { %v4245_v54 = vmul.f32 %v6194_v1, %v6158_v45 }
 0x56f   : > { %5740 = vmatmul.mubr.msk.f32.gmra.mrb[74].mxu1 %vm336_vm0, %v3836_v30 }
 0x570   : > { %4488 = vmatprep.mubr.f32.mxu1 %v7465_v35 }
 0x5cd   : > { %v3302_v15 = vpop.xlane.xlu0 %3301 }
 0x5ce   : > { %v3303_v6 = vrot.slane %v3302_v15, 4 }
 0x5d0   : > { %v3304_v25 = vadd.f32 %v3303_v6, %v3302_v15 }
 0x5d2   : > { %v3305_v5 = vrot.slane %v3304_v25, 2 }
 0x5d4   : > { %v3306_v13 = vadd.f32 %v3305_v5, %v3304_v25 }
 0x5d6   : > { %v3307_v48 = vrot.slane %v3306_v13, 1 }
 0x5d8   : > { %v3308_v32 = vadd.f32 %v3307_v48, %v3306_v13  ;;  %v6160_v13 = vpop.eup %6159 }
 0x5da   : > { %6001 = vpush %v3308_v32  ;;  %v7224_v32 = vadd.f32 %v6158_v45, %v4239_v49 }
 0x5e4   : > { %v3332_v44 = vpop.xlane.xlu1 %3331 }
 0x5e5   : > { %v3333_v36 = vrot.slane %v3332_v44, 4 }
 0x5e7   : > { %v3334_v40 = vadd.f32 %v3333_v36, %v3332_v44 }
 0x5e9   : > { %v3335_v53 = vrot.slane %v3334_v40, 2 }
 0x5eb   : > { %v3336_v38 = vadd.f32 %v3335_v53, %v3334_v40  ;;  %v7227_v40 = vadd.f32 %v6160_v13, %v6908_v46  ;;  %v4243_v46 = vmul.f32 %v6156_v3, %v6811_v34 }
 0x5ed   : > { %v3337_v42 = vrot.slane %v3336_v38, 1 }
 0x5ef   : > { %v3338_v12 = vadd.f32 %v3337_v42, %v3336_v38 }
 0x5f1   : > { %6003 = vpush %v3338_v12 }
 0x622   : > { %v3606_v8 = vpop.f32.mrb[60].mxu1 }
 0x623   : > { %v3758_v47 = vmul.f32 2.0, %v3606_v8  ;;  %v3608_v27 = vpop.f32.mrb[61].mxu1  ;;  %v3752_v0 = vmul.f32 %v3606_v8, %v3606_v8 }
 0x624   : > { %v3754_v63 = vmul.f32 %v3608_v27, %v3608_v27  ;;  %v3756_v31 = vmul.f32 %v3608_v27, %v3606_v8 }
 0x625   : > { %v3759_v41 = vmul.f32 %v3758_v47, %v3608_v27 }
 0x626   : > { %v3764_v7 = vadd.f32 %v3754_v63, %v3752_v0 }
 0x627   : > { %v3760_v30 = vadd.f32 0.0001, %v3759_v41  ;;  %v7240_v41 = vadd.f32 %v4245_v54, %v4243_v46 }
 0x628   : > { %v3765_v22 = vadd.f32 0.0001, %v3764_v7 }
 0x62a   : > { %v3677_v18 = vpop.f32.mrb[62].mxu1 }
 0x62b   : > { %v3753_v62 = vsub.f32 %v3677_v18, %v3752_v0  ;;  %v3679_v59 = vpop.f32.mrb[63].mxu1  ;;  %v4244_v0 = vmul.f32 %v6904_v28, %v6814_v29  ;;  %v3380_v28 = vrot.slane %v7017_v17, 4 }
 0x62c   : > { %v3755_v2 = vsub.f32 %v3679_v59, %v3754_v63  ;;  %v6195_v63 = vld [vmem:[%s6405_s11 + $0x18] sm:$0xff] }
 0x62e   : > { %v3766_v19 = vadd.f32 %v3755_v2, %v3753_v62  ;;  %v3748_v16 = vpop.f32.mrb[64].mxu1  ;;  %v6196_v62 = vld [vmem:[%s6391_s14 + $0x10] sm:$0xff]  ;;  %v3381_v2 = vadd.f32 %v3380_v28, %v7017_v17 }
 0x62f   : > { %v3757_v26 = vsub.f32 %v3748_v16, %v3756_v31  ;;  %v5722_v20 = vpop.f32.mrb[65].mxu1  ;;  %v4246_v31 = vmul.f32 %v6195_v63, %v6160_v13  ;;  %v7264_v59 = vmax.f32 %v6818_v11, %v6196_v62 }
 0x630   : > { %v3767_v24 = vadd.f32 0.0009, %v3766_v19  ;;  %v6197_v19 = vld [vmem:[%s6391_s14 + $0x18] sm:$0xff]  ;;  %v3382_v3 = vrot.slane %v3381_v2, 2 }
 0x631   : > { %v3761_v57 = vmul.f32 2.0, %v3757_v26  ;;  %v7245_v7 = vadd.f32 %v4246_v31, %v4244_v0  ;;  %v4275_v17 = vmul.f32 %v7264_v59, %v7264_v59 }
 0x632   : > { %v3768_v21 = vmul.f32 %v3767_v24, %v3765_v22  ;;  %v5729_v33 = vpop.f32.mrb[66].mxu1 }
 0x633   : > { %v3762_v15 = vadd.f32 0.0009, %v3761_v57  ;;  %v3933_v6 = vpop.f32.mrb[67].mxu1 }
 0x634   : > { %6161 = vrcp.f32 %v3768_v21  ;;  %v5918_v25 = vpack.c.bf16 %v5729_v33, %v3933_v6  ;;  %v7473_v6 = vld [vmem:[#allocation6_spill] sm:$0xff] }
 0x635   : > { %v3763_v5 = vmul.f32 %v3762_v15, %v3760_v30  ;;  %6163 = vrcp.f32 %v7224_v32 }
 0x636   : > { %v5732_v48 = vpop.f32.mrb[68].mxu1  ;;  %6165 = vrcp.f32 %v7227_v40 }
 0x637   : > { %v3943_v44 = vpop.f32.mrb[69].mxu1 }
 0x638   : > { %v5916_v36 = vpack.c.bf16 %v5732_v48, %v3943_v44 }
 0x63a   : > { %v5735_v53 = vpop.f32.mrb[70].mxu1  ;;  %5917 = vmatprep.subr.bf16.mxu0 %v5916_v36 }
 0x63b   : > { %v3953_v38 = vpop.f32.mrb[71].mxu1  ;;  %5919 = vmatpush1.bf16.msra.mxu0 %v5918_v25  ;;  %v4667_v25 = vmax.f32 %v7215_v9, %v7473_v6 }
 0x63c   : > { %v5922_v42 = vpack.c.bf16 %v5735_v53, %v3953_v38 }
 0x63d   : > { %v4669_v48 = vsub.f32 %v7215_v9, %v4667_v25  ;;  %v4675_v53 = vsub.f32 %v7473_v6, %v4667_v25 }
 0x63e   : > { %v6162_v12 = vpop.eup %6161  ;;  %v5738_v4 = vpop.f32.mrb[72].mxu1  ;;  %5379 = vmatmul.mubr.msk.f32.vlgmr.msra.gmra.mrb[70].mxu0 %vm336_vm0, %v7049_v51 }
 0x63f   : > { %v3963_v58 = vpop.f32.mrb[73].mxu1  ;;  %v3770_v50 = vmul.f32 %v6162_v12, %v3763_v5  ;;  %4117 = vmatprep.mubr.f32.mxu0 %v7465_v35  ;;  %v6164_v52 = vpop.eup %6163  ;;  %v7474_v5 = vld [vmem:[#allocation8_spill] sm:$0xff]  ;;  %v4671_v36 = vmul.f32 1.442695, %v4669_v48 }
 0x640   : > { %v5920_v8 = vpack.c.bf16 %v5738_v4, %v3963_v58  ;;  %v6166_v37 = vpop.eup %6165  ;;  %v7250_v29 = vmul.f32 %v6164_v52, %v7240_v41  ;;  %v4668_v13 = vmax.f32 %v6855_v10, %v7474_v5 }
 0x641   : > { %v3771_v47 = vmul.f32 %v3770_v50, %v6950_v14  ;;  %v7257_v18 = vmul.f32 %v6166_v37, %v7245_v7  ;;  %6167 = vpow2.f32 %v4671_v36  ;;  %v6199_v36 = vld [vmem:[%s6405_s11] sm:$0xff] }
 0x642   : > { %5921 = vmatprep.subr.bf16.mxu0 %v5920_v8  ;;  %v5741_v27 = vpop.f32.mrb[74].mxu1  ;;  %v4273_v16 = vmul.f32 %v7250_v29, %v7250_v29  ;;  %v4277_v20 = vmul.f32 %v7250_v29, %v7264_v59  ;;  %v4670_v44 = vsub.f32 %v6855_v10, %v4668_v13  ;;  %v4676_v1 = vsub.f32 %v7474_v5, %v4668_v13 }
 0x643   : > { %5923 = vmatpush1.bf16.msra.mxu0 %v5922_v42  ;;  %3772 = vadd.xlane.f32.xlu1 %v3771_v47  ;;  %v3973_v60 = vpop.f32.mrb[75].mxu1  ;;  %v4274_v11 = vmul.f32 %v7257_v18, %v7257_v18  ;;  %v4677_v8 = vmul.f32 1.442695, %v4675_v53 }
 0x644   : > { %v5925_v34 = vpack.c.bf16 %v5741_v27, %v3973_v60  ;;  %5924 = vmatprep.subr.bf16.mxu0 %v6273_v23  ;;  %v4673_v46 = vmul.f32 1.442695, %v4670_v44  ;;  %v4679_v9 = vmul.f32 1.442695, %v4676_v1 }
 0x646   : > { %5380 = vmatmul.mubr.msk.f32.vlgmr.msra.gmra.mrb[72].mxu0 %vm336_vm0, %v7049_v51  ;;  %6169 = vpow2.f32 %v4673_v46 }
 0x647   : > { %5926 = vmatpush3.bf16.msra.mxu0 %v5925_v34  ;;  %5746 = vmatprep.mubr.msk.f32.mxu0 %vm6274_vm4, %v7465_v35  ;;  %6171 = vpow2.f32 %v4677_v8 }
 0x648   : > { %5928 = vmatprep.subr.bf16.mxu0 %v7468_v56  ;;  %6173 = vpow2.f32 %v4679_v9  ;;  %v3822_v9 = vrot.slane %v7021_v39, 4 }
 0x64a   : > { %5747 = vmatmul.mubr.msk.f32.vlgmr.msra.gmra.mrb[74].mxu0 %vm336_vm0, %v7049_v51  ;;  %v7271_v51 = vmax.f32 %v6822_v43, %v6197_v19  ;;  %v3383_v43 = vadd.f32 %v3382_v3, %v3381_v2 }
 0x64b   : > { %5930 = vmatpush3.bf16.msra.mxu0 %v7468_v56  ;;  %5753 = vmatprep.mubr.msk.f32.mxu0 %vm336_vm0, %v7250_v29  ;;  %v6168_v52 = vpop.eup %6167 }
 0x64c   : > { %v4276_v26 = vmul.f32 %v7271_v51, %v7271_v51  ;;  %v3384_v22 = vrot.slane %v3383_v43, 1  ;;  %v4278_v57 = vmul.f32 %v7257_v18, %v7271_v51  ;;  %v4685_v44 = vmul.f32 %v6168_v52, %v7240_v41 }
 0x64e   : > { %5754 = vmatmul.mubr.msk.f32.vlgmr.msra.gmra.mrb[76].mxu0 %vm336_vm0, %v7257_v18  ;;  %v3385_v24 = vadd.f32 %v3384_v22, %v3383_v43 }
 0x64f   : > { %5756 = vmatprep.mubr.msk.f32.mxu0 %vm336_vm0, %v7264_v59 }
 0x650   : > { %6005 = vpush %v3385_v24  ;;  %v6170_v19 = vpop.eup %6169 }
 0x652   : > { %5757 = vmatmul.mubr.msk.f32.gmra.mrb[78].mxu0 %vm336_vm0, %v7271_v51 }
 0x653   : > { %5759 = vmatprep.mubr.msk.f32.mxu0 %vm336_vm0, %v4273_v16 }
 0x656   : > { %5760 = vmatmul.mubr.msk.f32.gmra.mrb[80].mxu0 %vm336_vm0, %v4274_v11  ;;  %v4681_v11 = vmul.f32 %v6168_v52, %v7224_v32 }
 0x657   : > { %5762 = vmatprep.mubr.msk.f32.mxu0 %vm336_vm0, %v4275_v17  ;;  %v6172_v17 = vpop.eup %6171 }
 0x658   : > { %v4687_v53 = vmul.f32 %v6199_v36, %v6172_v17 }
 0x65a   : > { %5763 = vmatmul.mubr.msk.f32.gmra.mrb[82].mxu0 %vm336_vm0, %v4276_v26  ;;  %v4689_v1 = vadd.f32 %v4687_v53, %v4685_v44 }
 0x65b   : > { %5765 = vmatprep.mubr.msk.f32.mxu0 %vm336_vm0, %v4277_v20 }
 0x65e   : > { %5766 = vmatmul.mubr.msk.f32.gmra.mrb[84].mxu0 %vm336_vm0, %v4278_v57  ;;  %v4682_v57 = vmul.f32 %v6170_v19, %v7227_v40  ;;  %v7309_v40 = vld [vmem:[%s7439_s3] sm:$0xff] }
 0x65f   : > { %4930 = vmatprep.mubr.f32.mxu0 %v7465_v35 }
 0x6d0   : > { %v3773_v21 = vpop.xlane.xlu1 %3772 }
 0x6d1   : > { %v3774_v33 = vrot.slane %v3773_v21, 4 }
 0x6d3   : > { %v3775_v55 = vadd.f32 %v3774_v33, %v3773_v21  ;;  %v6174_v21 = vpop.eup %6173 }
 0x6d5   : > { %v3776_v49 = vrot.slane %v3775_v55, 2 }
 0x6d7   : > { %v3777_v45 = vadd.f32 %v3776_v49, %v3775_v55  ;;  %v4683_v55 = vadd.f32 %v6172_v17, %v4681_v11  ;;  %v4256_v11 = vsub.f32 %v7257_v18, %v7271_v51 }
 0x6d9   : > { %v3778_v30 = vrot.slane %v3777_v45, 1 }
 0x6db   : > { %v3779_v15 = vadd.f32 %v3778_v30, %v3777_v45  ;;  %v4684_v30 = vadd.f32 %v6174_v21, %v4682_v57 }
 0x6dd   : > { %6007 = vpush %v3779_v15 }
 0x711   : > { %v4048_v38 = vpop.f32.mrb[70].mxu0 }
 0x712   : > { %v4200_v42 = vmul.f32 2.0, %v4048_v38  ;;  %v4050_v12 = vpop.f32.mrb[71].mxu0  ;;  %v4194_v4 = vmul.f32 %v4048_v38, %v4048_v38 }
 0x713   : > { %v4196_v58 = vmul.f32 %v4050_v12, %v4050_v12  ;;  %v4198_v50 = vmul.f32 %v4050_v12, %v4048_v38 }
 0x714   : > { %v4201_v54 = vmul.f32 %v4200_v42, %v4050_v12 }
 0x715   : > { %v4206_v47 = vadd.f32 %v4196_v58, %v4194_v4 }
 0x716   : > { %v4202_v43 = vadd.f32 0.0001, %v4201_v54 }
 0x717   : > { %v4207_v28 = vadd.f32 0.0001, %v4206_v47 }
 0x719   : > { %v4119_v10 = vpop.f32.mrb[72].mxu0 }
 0x71a   : > { %v4195_v27 = vsub.f32 %v4119_v10, %v4194_v4  ;;  %v4121_v0 = vpop.f32.mrb[73].mxu0  ;;  %v4686_v4 = vmul.f32 %v6170_v19, %v7245_v7 }
 0x71b   : > { %v4197_v63 = vsub.f32 %v4121_v0, %v4196_v58  ;;  %v6200_v58 = vld [vmem:[%s6405_s11 + $0x8] sm:$0xff] }
 0x71d   : > { %v4208_v31 = vadd.f32 %v4197_v63, %v4195_v27  ;;  %v4190_v60 = vpop.f32.mrb[74].mxu0  ;;  %v6201_v27 = vld [vmem:[%s6391_s14] sm:$0xff]  ;;  %v3823_v63 = vadd.f32 %v3822_v9, %v7021_v39 }
 0x71e   : > { %v4199_v34 = vsub.f32 %v4190_v60, %v4198_v50  ;;  %v5748_v37 = vpop.f32.mrb[75].mxu0  ;;  %v4688_v50 = vmul.f32 %v6200_v58, %v6174_v21  ;;  %v4691_v0 = vmax.f32 %v7264_v59, %v6201_v27 }
 0x71f   : > { %v4209_v62 = vadd.f32 0.0009, %v4208_v31  ;;  %v6202_v31 = vld [vmem:[%s6391_s14 + $0x8] sm:$0xff]  ;;  %s5962_s14 = spop %5961 }
 0x720   : > { %v4203_v2 = vmul.f32 2.0, %v4199_v34  ;;  %v4690_v41 = vadd.f32 %v4688_v50, %v4686_v4  ;;  %v4692_v60 = vmax.f32 %v7271_v51, %v6202_v31  ;;  %v3824_v34 = vrot.slane %v3823_v63, 2  ;;  %s5964_s21 = spop %5963 }
 0x721   : > { %v4210_v16 = vmul.f32 %v4209_v62, %v4207_v28  ;;  %v5755_v3 = vpop.f32.mrb[76].mxu0  ;;  %s7366_s8 = spop %5965 }
 0x722   : > { %v4204_v26 = vadd.f32 0.0009, %v4203_v2  ;;  %v4375_v20 = vpop.f32.mrb[77].mxu0  ;;  %v3825_v28 = vadd.f32 %v3824_v34, %v3823_v63  ;;  %v4718_v62 = vmul.f32 %v4692_v60, %v4692_v60  ;;  %s7368_s10 = spop %5967 }
 0x723   : > { %6175 = vrcp.f32 %v4210_v16  ;;  %v5933_v22 = vpack.c.bf16 %v5755_v3, %v4375_v20  ;;  %v4255_v3 = vsub.f32 %v7250_v29, %v7264_v59  ;;  %s7370_s11 = spop %5969 }
 0x724   : > { %v4205_v24 = vmul.f32 %v4204_v26, %v4202_v43  ;;  %6177 = vrcp.f32 %v4683_v55  ;;  %v3826_v2 = vrot.slane %v3825_v28, 1  ;;  %v4258_v43 = vand.u32 2147483647, %v4256_v11  ;;  %s5972_s12 = spop %5971 }
 0x725   : > { %v5758_v33 = vpop.f32.mrb[78].mxu0  ;;  %6179 = vrcp.f32 %v4684_v30  ;;  %v4257_v17 = vand.u32 2147483647, %v4255_v3  ;;  %s5974_s15 = spop %5973 }
 0x726   : > { %v4385_v49 = vpop.f32.mrb[79].mxu0  ;;  %v3827_v19 = vadd.f32 %v3826_v2, %v3825_v28  ;;  %v4260_v20 = vsel %vm336_vm0, %v4258_v43, 0.0  ;;  %s5976_s27 = spop %5975 }
 0x727   : > { %v5931_v45 = vpack.c.bf16 %v5758_v33, %v4385_v49  ;;  %v4259_v26 = vsel %vm336_vm0, %v4257_v17, 0.0  ;;  %s7372_s16 = spop %5977 }
 0x728   : > { %6009 = vpush %v3827_v19  ;;  %v4261_v57 = vadd.f32 %v4260_v20, %v4259_v26  ;;  %s7374_s17 = spop %5979 }
 0x729   : > { %v5761_v15 = vpop.f32.mrb[80].mxu0  ;;  %5932 = vmatprep.subr.bf16.mxu1 %v5931_v45  ;;  %s7376_s18 = spop %5981 }
 0x72a   : > { %v4395_v32 = vpop.f32.mrb[81].mxu0  ;;  %5934 = vmatpush1.bf16.msra.mxu1 %v5933_v22  ;;  %4262 = vadd.xlane.f32.xlu0 %v4261_v57  ;;  %s5984_s24 = spop %5983 }
 0x72b   : > { %v5937_v6 = vpack.c.bf16 %v5761_v15, %v4395_v32  ;;  %s5986_s25 = spop %5985 }
 0x72c   : > { %s5988_s28 = spop %5987 }
 0x72d   : > { %v6176_v25 = vpop.eup %6175  ;;  %v5764_v5 = vpop.f32.mrb[82].mxu0  ;;  %5392 = vmatmul.mubr.msk.f32.vlgmr.msra.gmra.mrb[76].mxu1 %vm336_vm0, %v7309_v40  ;;  %s7378_s29 = spop %5989 }
 0x72e   : > { %v4405_v13 = vpop.f32.mrb[83].mxu0  ;;  %v4212_v48 = vmul.f32 %v6176_v25, %v4205_v24  ;;  %4559 = vmatprep.mubr.f32.mxu1 %v7465_v35  ;;  %v6178_v54 = vpop.eup %6177  ;;  %s7380_s30 = spop %5991 }
 0x72f   : > { %v5935_v38 = vpack.c.bf16 %v5764_v5, %v4405_v13  ;;  %v6180_v47 = vpop.eup %6179  ;;  %v4694_v7 = vmul.f32 %v6178_v54, %v4689_v1  ;;  %s7382_s6 = spop %5993 }
 0x730   : > { %v4213_v42 = vmul.f32 %v4212_v48, %v6950_v14  ;;  %v4696_v10 = vmul.f32 %v6180_v47, %v4690_v41  ;;  %s5996_s7 = spop %5995 }
 0x731   : > { %5936 = vmatprep.subr.bf16.mxu1 %v5935_v38  ;;  %v5767_v12 = vpop.f32.mrb[84].mxu0  ;;  %v4715_v52 = vmul.f32 %v4694_v7, %v4694_v7  ;;  %v4719_v39 = vmul.f32 %v4694_v7, %v4691_v0  ;;  %v4697_v22 = vsub.f32 %v4694_v7, %v4691_v0 }
 0x732   : > { %5938 = vmatpush1.bf16.msra.mxu1 %v5937_v6  ;;  %4214 = vadd.xlane.f32.xlu1 %v4213_v42  ;;  %v4415_v46 = vpop.f32.mrb[85].mxu0  ;;  %v4716_v37 = vmul.f32 %v4696_v10, %v4696_v10  ;;  %v4720_v16 = vmul.f32 %v4696_v10, %v4692_v60  ;;  %v4698_v24 = vsub.f32 %v4696_v10, %v4692_v60 }
 0x733   : > { %v5940_v8 = vpack.c.bf16 %v5767_v12, %v4415_v46  ;;  %5939 = vmatprep.subr.bf16.mxu1 %v6273_v23  ;;  %v4699_v21 = vand.u32 2147483647, %v4697_v22 }
 0x734   : > { %v4700_v33 = vand.u32 2147483647, %v4698_v24 }
 0x735   : > { %5393 = vmatmul.mubr.msk.f32.vlgmr.msra.gmra.mrb[78].mxu1 %vm336_vm0, %v7309_v40  ;;  %v4701_v55 = vsel %vm336_vm0, %v4699_v21, 0.0 }
 0x736   : > { %5941 = vmatpush3.bf16.msra.mxu1 %v5940_v8  ;;  %5772 = vmatprep.mubr.msk.f32.mxu1 %vm6274_vm4, %v7465_v35  ;;  %v4702_v49 = vsel %vm336_vm0, %v4700_v33, 0.0 }
 0x737   : > { %5943 = vmatprep.subr.bf16.mxu1 %v7468_v56  ;;  %v4703_v29 = vadd.f32 %v4702_v49, %v4701_v55 }
 0x739   : > { %5773 = vmatmul.mubr.msk.f32.vlgmr.msra.gmra.mrb[80].mxu1 %vm336_vm0, %v7309_v40  ;;  %4704 = vadd.xlane.f32.xlu0 %v4703_v29 }
 0x73a   : > { %5945 = vmatpush3.bf16.msra.mxu1 %v7468_v56  ;;  %5779 = vmatprep.mubr.msk.f32.mxu1 %vm336_vm0, %v4694_v7  ;;  %v4717_v56 = vmul.f32 %v4691_v0, %v4691_v0 }
 0x73d   : > { %5780 = vmatmul.mubr.msk.f32.vlgmr.msra.gmra.mrb[82].mxu1 %vm336_vm0, %v4696_v10 }
 0x73e   : > { %5782 = vmatprep.mubr.msk.f32.mxu1 %vm336_vm0, %v4691_v0 }
 0x741   : > { %5783 = vmatmul.mubr.msk.f32.gmra.mrb[84].mxu1 %vm336_vm0, %v4692_v60 }
 0x742   : > { %5785 = vmatprep.mubr.msk.f32.mxu1 %vm336_vm0, %v4715_v52 }
 0x745   : > { %5786 = vmatmul.mubr.msk.f32.gmra.mrb[86].mxu1 %vm336_vm0, %v4716_v37 }
 0x746   : > { %5788 = vmatprep.mubr.msk.f32.mxu1 %vm336_vm0, %v4717_v56 }
 0x749   : > { %5789 = vmatmul.mubr.msk.f32.gmra.mrb[88].mxu1 %vm336_vm0, %v4718_v62 }
 0x74a   : > { %5791 = vmatprep.mubr.msk.f32.mxu1 %vm336_vm0, %v4719_v39 }
 0x74d   : > { %5792 = vmatmul.mubr.msk.f32.gmra.mrb[90].mxu1 %vm336_vm0, %v4720_v16 }
 0x7b7   : > { %v4263_v43 = vpop.xlane.xlu0 %4262 }
 0x7b8   : > { %v4264_v26 = vrot.slane %v4263_v43, 4 }
 0x7ba   : > { %v4265_v20 = vadd.f32 %v4264_v26, %v4263_v43  ;;  %v1894_v43 = vstv %s5984_s24  ;;  %v1910_v26 = vstv %s5986_s25  ;;  %s280_s25 = scalar_lea.vmem %s7441_s5, %s7480_s22 }
 0x7bc   : > { %v4266_v22 = vrot.slane %v4265_v20, 2 }
 0x7be   : > { %v4267_v24 = vadd.f32 %v4266_v22, %v4265_v20 }
 0x7bf   : > { %v4215_v59 = vpop.xlane.xlu1 %4214 }
 0x7c0   : > { %v4216_v18 = vrot.slane %v4215_v59, 4  ;;  %v4268_v57 = vrot.slane %v4267_v24, 1 }
 0x7c2   : > { %v4217_v51 = vadd.f32 %v4216_v18, %v4215_v59  ;;  %v4269_v21 = vadd.f32 %v4268_v57, %v4267_v24  ;;  %v1926_v57 = vstv %s5988_s28 }
 0x7c4   : > { %v4218_v45 = vrot.slane %v4217_v51, 2 }
 0x7c6   : > { %v4219_v30 = vadd.f32 %v4218_v45, %v4217_v51  ;;  %v4705_v33 = vpop.xlane.xlu0 %4704 }
 0x7c8   : > { %v4220_v15 = vrot.slane %v4219_v30, 1 }
 0x7ca   : > { %v4221_v32 = vadd.f32 %v4220_v15, %v4219_v30 }
 0x7cc   : > { %6011 = vpush %v4221_v32 }
 0x7cd   : > { %6013 = vpush %v4269_v21  ;;  %v2657_v21 = vstv %s5996_s7 }
 0x800   : > { %v4490_v6 = vpop.f32.mrb[76].mxu1 }
 0x801   : > { %v4642_v25 = vmul.f32 2.0, %v4490_v6  ;;  %v4492_v5 = vpop.f32.mrb[77].mxu1  ;;  %v4636_v13 = vmul.f32 %v4490_v6, %v4490_v6 }
 0x802   : > { %v4638_v48 = vmul.f32 %v4492_v5, %v4492_v5  ;;  %v4640_v44 = vmul.f32 %v4492_v5, %v4490_v6 }
 0x803   : > { %v4643_v36 = vmul.f32 %v4642_v25, %v4492_v5 }
 0x804   : > { %v4648_v53 = vadd.f32 %v4638_v48, %v4636_v13 }
 0x805   : > { %v4644_v9 = vadd.f32 0.0001, %v4643_v36 }
 0x806   : > { %v4649_v54 = vadd.f32 0.0001, %v4648_v53 }
 0x808   : > { %v4561_v38 = vpop.f32.mrb[78].mxu1 }
 0x809   : > { %v4637_v42 = vsub.f32 %v4561_v38, %v4636_v13  ;;  %v4563_v12 = vpop.f32.mrb[79].mxu1 }
 0x80a   : > { %v4639_v4 = vsub.f32 %v4563_v12, %v4638_v48 }
 0x80c   : > { %v4650_v58 = vadd.f32 %v4639_v4, %v4637_v42  ;;  %v4632_v50 = vpop.f32.mrb[80].mxu1 }
 0x80d   : > { %v4641_v46 = vsub.f32 %v4632_v50, %v4640_v44  ;;  %v5774_v1 = vpop.f32.mrb[81].mxu1 }
 0x80e   : > { %v4651_v8 = vadd.f32 0.0009, %v4650_v58 }
 0x80f   : > { %v4645_v41 = vmul.f32 2.0, %v4641_v46 }
 0x810   : > { %v4652_v47 = vmul.f32 %v4651_v8, %v4649_v54  ;;  %v5781_v7 = vpop.f32.mrb[82].mxu1 }
 0x811   : > { %v4646_v10 = vadd.f32 0.0009, %v4645_v41  ;;  %v4817_v27 = vpop.f32.mrb[83].mxu1 }
 0x812   : > { %6181 = vrcp.f32 %v4652_v47  ;;  %v5948_v0 = vpack.c.bf16 %v5781_v7, %v4817_v27 }
 0x813   : > { %v4647_v63 = vmul.f32 %v4646_v10, %v4644_v9 }
 0x814   : > { %v5784_v31 = vpop.f32.mrb[84].mxu1 }
 0x815   : > { %v4827_v60 = vpop.f32.mrb[85].mxu1 }
 0x816   : > { %v5946_v52 = vpack.c.bf16 %v5784_v31, %v4827_v60 }
 0x818   : > { %v5787_v34 = vpop.f32.mrb[86].mxu1  ;;  %5947 = vmatprep.subr.bf16.mxu0 %v5946_v52 }
 0x819   : > { %v4837_v37 = vpop.f32.mrb[87].mxu1  ;;  %5949 = vmatpush1.bf16.msra.mxu0 %v5948_v0 }
 0x81a   : > { %v5952_v56 = vpack.c.bf16 %v5787_v34, %v4837_v37 }
 0x81c   : > { %v6182_v28 = vpop.eup %6181  ;;  %v5790_v62 = vpop.f32.mrb[88].mxu1  ;;  %5405 = vmatmul.mubr.msk.f32.vlgmr.msra.gmra.mrb[86].mxu0 %vm336_vm0, %v7309_v40 }
 0x81d   : > { %v4847_v39 = vpop.f32.mrb[89].mxu1  ;;  %v4654_v2 = vmul.f32 %v6182_v28, %v4647_v63  ;;  %5001 = vmatprep.mubr.f32.mxu0 %v7465_v35 }
 0x81e   : > { %v5950_v19 = vpack.c.bf16 %v5790_v62, %v4847_v39  ;;  %v381_v39 = vstv %s5962_s14 }
 0x81f   : > { %v4655_v16 = vmul.f32 %v4654_v2, %v6950_v14  ;;  %v1131_v2 = vstv %s5972_s12 }
 0x820   : > { %5951 = vmatprep.subr.bf16.mxu0 %v5950_v19  ;;  %v5793_v3 = vpop.f32.mrb[90].mxu1  ;;  %v1147_v19 = vstv %s5974_s15 }
 0x821   : > { %5953 = vmatpush1.bf16.msra.mxu0 %v5952_v56  ;;  %4656 = vadd.xlane.f32.xlu1 %v4655_v16  ;;  %v4857_v11 = vpop.f32.mrb[91].mxu1 }
 0x822   : > { %v5955_v17 = vpack.c.bf16 %v5793_v3, %v4857_v11  ;;  %5954 = vmatprep.subr.bf16.mxu0 %v6273_v23  ;;  %v4706_v23 = vrot.slane %v4705_v33, 4  ;;  %v1148_v3 = vadd.f32 %v1147_v19, %v381_v39  ;;  %v397_v11 = vstv %s5964_s21 }
 0x823   : > { %v5130_v39 = vsel %vm5129_vm10, 1.0, %v7465_v35 }
 0x824   : > { %5406 = vmatmul.mubr.msk.f32.vlgmr.msra.gmra.mrb[88].mxu0 %vm336_vm0, %v7309_v40  ;;  %v4707_v55 = vadd.f32 %v4706_v23, %v4705_v33  ;;  %v1911_v24 = vadd.f32 %v1910_v26, %v1148_v3  ;;  %v349_v23 = vstv %s7364_s9 }
 0x825   : > { %5956 = vmatpush3.bf16.msra.mxu0 %v5955_v17  ;;  %5798 = vmatprep.mubr.msk.f32.mxu0 %vm6274_vm4, %v7465_v35  ;;  %v1163_v17 = vstv %s5976_s27 }
 0x826   : > { %v4708_v49 = vrot.slane %v4707_v55, 2  ;;  %v1164_v20 = vadd.f32 %v1163_v17, %v397_v11 }
 0x828   : > { %5799 = vmatmul.mubr.msk.f32.vlgmr.msra.gmra.mrb[90].mxu0 %vm336_vm0, %v7309_v40  ;;  %v4709_v18 = vadd.f32 %v4708_v49, %v4707_v55  ;;  %v1115_v55 = vstv %s7370_s11  ;;  %v1927_v49 = vadd.f32 %v1926_v57, %v1164_v20 }
 0x82a   : > { %v4710_v30 = vrot.slane %v4709_v18, 1 }
 0x82c   : > { %v4711_v32 = vadd.f32 %v4710_v30, %v4709_v18  ;;  %v1814_v18 = vstv %s7374_s17 }
 0x8ae   : > { %v4657_v29 = vpop.xlane.xlu1 %4656 }
 0x8af   : > { %v4658_v59 = vrot.slane %v4657_v29, 4 }
 0x8b1   : > { %v4659_v51 = vadd.f32 %v4658_v59, %v4657_v29 }
 0x8b3   : > { %v4660_v45 = vrot.slane %v4659_v51, 2 }
 0x8b5   : > { %v4661_v15 = vadd.f32 %v4660_v45, %v4659_v51  ;;  %v5110_v51 = vsel %vm5109_vm5, 1.0, %v7465_v35  ;;  %v5114_v45 = vsel %vm5113_vm6, 1.0, %v7465_v35 }
 0x8b7   : > { %v4662_v40 = vrot.slane %v4661_v15, 1 }
 0x8b9   : > { %v4663_v6 = vadd.f32 %v4662_v40, %v4661_v15  ;;  %v1051_v15 = vstv %s7368_s10  ;;  %v1116_v40 = vadd.f32 %v1115_v55, %v349_v23 }
 0x8bb   : > { %6015 = vpush %v4663_v6  ;;  %v1816_v6 = vadd.f32 %v1814_v18, %v1051_v15 }
 0x8bc   : > { %6017 = vpush %v4711_v32  ;;  %v2577_v32 = vstv %s7380_s30 }
 0x8ef   : > { %v4932_v25 = vpop.f32.mrb[86].mxu0 }
 0x8f0   : > { %v5084_v5 = vmul.f32 2.0, %v4932_v25  ;;  %v4934_v13 = vpop.f32.mrb[87].mxu0  ;;  %v5078_v48 = vmul.f32 %v4932_v25, %v4932_v25 }
 0x8f1   : > { %v5080_v44 = vmul.f32 %v4934_v13, %v4934_v13  ;;  %v5082_v36 = vmul.f32 %v4934_v13, %v4932_v25 }
 0x8f2   : > { %v5085_v53 = vmul.f32 %v5084_v5, %v4934_v13 }
 0x8f3   : > { %v5090_v38 = vadd.f32 %v5080_v44, %v5078_v48 }
 0x8f4   : > { %v5086_v9 = vadd.f32 0.0001, %v5085_v53  ;;  %v2579_v53 = vadd.f32 %v2577_v32, %v1816_v6 }
 0x8f5   : > { %v5091_v8 = vadd.f32 0.0001, %v5090_v38 }
 0x8f7   : > { %v5003_v42 = vpop.f32.mrb[88].mxu0 }
 0x8f8   : > { %v5079_v12 = vsub.f32 %v5003_v42, %v5078_v48  ;;  %v5005_v4 = vpop.f32.mrb[89].mxu0  ;;  %v1878_v48 = vstv %s7376_s18 }
 0x8f9   : > { %v5081_v58 = vsub.f32 %v5005_v4, %v5080_v44  ;;  %v5118_v44 = vsel %vm5117_vm7, 1.0, %v7465_v35 }
 0x8fb   : > { %v5092_v50 = vadd.f32 %v5081_v58, %v5079_v12  ;;  %v5074_v46 = vpop.f32.mrb[90].mxu0  ;;  %v1879_v12 = vadd.f32 %v1878_v48, %v1116_v40 }
 0x8fc   : > { %v5083_v1 = vsub.f32 %v5074_v46, %v5082_v36  ;;  %v5800_v54 = vpop.f32.mrb[91].mxu0  ;;  %v2641_v46 = vstv %s7382_s6 }
 0x8fd   : > { %v5093_v41 = vadd.f32 0.0009, %v5092_v50  ;;  %v1784_v54 = vstv %s7372_s16 }
 0x8fe   : > { %v5087_v47 = vmul.f32 2.0, %v5083_v1  ;;  %v5122_v1 = vsel %vm5121_vm8, 1.0, %v7465_v35 }
 0x8ff   : > { %v5094_v7 = vmul.f32 %v5093_v41, %v5091_v8  ;;  %v1021_v41 = vstv %s7366_s8 }
 0x900   : > { %v5088_v10 = vadd.f32 0.0009, %v5087_v47 }
 0x901   : > { %6183 = vrcp.f32 %v5094_v7  ;;  %v2547_v7 = vstv %s7378_s29 }
 0x902   : > { %v5089_v27 = vmul.f32 %v5088_v10, %v5086_v9  ;;  %v2642_v9 = vadd.f32 %v2641_v46, %v1879_v12 }
 0x90b   : > { %v6184_v0 = vpop.eup %6183 }
 0x90c   : > { %v5096_v63 = vmul.f32 %v6184_v0, %v5089_v27  ;;  %v1815_v0 = vadd.f32 %v1784_v54, %v1021_v41 }
 0x90e   : > { %v5097_v31 = vmul.f32 %v5096_v63, %v6950_v14  ;;  %v365_v14 = vstv %s5960_s13  ;;  %s5998_s13 = spop %5997  ;;  %v5126_v63 = vsel %vm5125_vm9, 1.0, %v7465_v35 }
 0x90f   : > { %v1132_v16 = vadd.f32 %v1131_v2, %v365_v14  ;;  %v2673_v33 = vstv %s5998_s13  ;;  %s6000_s14 = spop %5999 }
 0x910   : > { %5098 = vadd.xlane.f32.xlu1 %v5097_v31  ;;  %v2674_v59 = vadd.f32 %v2673_v33, %v1911_v24  ;;  %s7388_s21 = spop %6001  ;;  %v2689_v30 = vstv %s6000_s14 }
 0x911   : > { %v1895_v22 = vadd.f32 %v1894_v43, %v1132_v16  ;;  %s6004_s12 = spop %6003  ;;  %v2690_v13 = vadd.f32 %v2689_v30, %v1927_v49  ;;  %v5134_v16 = vsel %vm5133_vm11, 1.0, %v7465_v35 }
 0x912   : > { %s6006_s15 = spop %6005  ;;  %v5115_v5 = vmul.f32 %v5114_v45, %v2674_v59  ;;  %v3340_v36 = vstv %s6004_s12 }
 0x913   : > { %v2658_v29 = vadd.f32 %v2657_v21, %v1895_v22  ;;  %s7396_s9 = spop %6007  ;;  %v3387_v38 = vstv %s6006_s15  ;;  %v5119_v58 = vmul.f32 %v5118_v44, %v2690_v13  ;;  %v3342_v50 = vadd.f32 %v3340_v36, %v2579_v53 }
 0x914   : > { %s6010_s11 = spop %6009  ;;  %v3781_v2 = vstv %s7396_s9  ;;  %v5138_v22 = vsel %vm5137_vm12, 1.0, %v7465_v35 }
 0x915   : > { %v5111_v25 = vmul.f32 %v5110_v51, %v2658_v29  ;;  %v3829_v42 = vstv %s6010_s11  ;;  %s7401_s10 = spop %6011  ;;  %v5123_v27 = vmul.f32 %v5122_v1, %v3342_v50 }
 0x916   : > { %s6014_s27 = spop %6013  ;;  %v3830_v8 = vadd.f32 %v3829_v42, %v3387_v38 }
 0x917   : > { %v5116_v4 = vadd.f32 %v5115_v5, %v5111_v25  ;;  %s6016_s17 = spop %6015  ;;  %v4271_v47 = vstv %s6014_s27 }
 0x918   : > { %s6018_s18 = spop %6017  ;;  %v4272_v31 = vadd.f32 %v4271_v47, %v3830_v8  ;;  %v4665_v19 = vstv %s6016_s17 }
 0x919   : > { %v5120_v10 = vadd.f32 %v5119_v58, %v5116_v4 }
 0x99d   : > { %v5099_v60 = vpop.xlane.xlu1 %5098 }
 0x99e   : > { %v5100_v52 = vrot.slane %v5099_v60, 4 }
 0x9a0   : > { %v5101_v34 = vadd.f32 %v5100_v52, %v5099_v60  ;;  %v2578_v60 = vadd.f32 %v2547_v7, %v1815_v0  ;;  %v3310_v52 = vstv %s7388_s21 }
 0x9a2   : > { %v5102_v37 = vrot.slane %v5101_v34, 2 }
 0x9a4   : > { %v5103_v56 = vadd.f32 %v5102_v37, %v5101_v34  ;;  %v4713_v34 = vstv %s6018_s18  ;;  %v5127_v37 = vmul.f32 %v5126_v63, %v2642_v9 }
 0x9a5   : > { %v4714_v14 = vadd.f32 %v4713_v34, %v4272_v31 }
 0x9a6   : > { %v5104_v28 = vrot.slane %v5103_v56, 1 }
 0x9a7   : > { %v5135_v26 = vmul.f32 %v5134_v16, %v4714_v14 }
 0x9a8   : > { %v5105_v62 = vadd.f32 %v5104_v28, %v5103_v56  ;;  %v5124_v56 = vadd.f32 %v5123_v27, %v5120_v10  ;;  %v4223_v28 = vstv %s7401_s10 }
 0x9a9   : > { %v4224_v11 = vadd.f32 %v4223_v28, %v3781_v2 }
 0x9aa   : > { %6019 = vpush %v5105_v62  ;;  %v3341_v62 = vadd.f32 %v3310_v52, %v2578_v60  ;;  %v5128_v3 = vadd.f32 %v5127_v37, %v5124_v56 }
 0x9ab   : > { %v4666_v43 = vadd.f32 %v4665_v19, %v4224_v11 }
 0x9ac   : > { %v5131_v17 = vmul.f32 %v5130_v39, %v3341_v62 }
 0x9ae   : > { %v5132_v24 = vadd.f32 %v5131_v17, %v5128_v3 }
 0x9b0   : > { %v5136_v21 = vadd.f32 %v5135_v26, %v5132_v24 }
 0x9db   : > { %s6020_s8 = spop %6019 }
 0x9dc   : > { %v5107_v20 = vstv %s6020_s8 }
 0x9dd   : > { %v5108_v57 = vadd.f32 %v5107_v20, %v4666_v43 }
 0x9df   : > { %v5139_v33 = vmul.f32 %v5138_v22, %v5108_v57 }
 0x9e1   : > { %v5140_v23 = vadd.f32 %v5139_v33, %v5136_v21 }
 0x9e3   : > { %5142 = vst.msk [vmem:[%s280_s25] sm:$0x1] %vm5141_vm13, %v5140_v23 }
 0x9e4 PF: > { %p15_p7 = scmp.ge.s32.totalorder %s6327_s23, 4   ;;  %s7475_s18 = smov %s6259_s19 }
 0x9e5   : > { %s7476_s19 = smov %s6263_s20  ;;  %s7477_s20 = smov %s6337_s26 }
 0x9e6   : > { %s7478_s21 = smov %s6327_s23  ;;  %17 = sbr.rel (!%p15_p7) target bundleno = 3 (0x3), region = 95 }
 0x9ed   :  { %5160 = vsyncpa [#allocation3], 1 }
 0x9ee   :  { %5162 = vsyncpa [#allocation3 + $0x1], 1 }

</bundles_post_ra>
